<compile_context>
chip_gen: v6e
topology: v6e:2x2x1
jax: 0.10.0
libtpu: 0.0.40
codegen_flags: <defaults>
</compile_context>

<pallas_src>
import functools

import jax
import jax.numpy as jnp
from jax import lax
from jax.experimental import pallas as pl
from jax.experimental.pallas import tpu as pltpu


def _round_up(x, m):
    return ((x + m - 1) // m) * m


# ----------------------------------------------------------------------------
# projector: 1x1 conv -> ReLU -> 1x1 conv  (per-pixel MLP), fused normalize out
# ----------------------------------------------------------------------------
def _projector_kernel(x_ref, w1_ref, b1_ref, w2_ref, b2_ref, o_ref, nf_ref):
    # x: (tm, Cin) bf16   w1: (Cin, Ch) bf16   b1: (1, Ch) f32
    # w2: (Ch, Cout) bf16 b2: (1, Cout) f32
    h = jnp.dot(x_ref[...], w1_ref[...], preferred_element_type=jnp.float32)
    h = jnp.maximum(h + b1_ref[...], 0.0)                       # f32 elementwise
    o = jnp.dot(h.astype(jnp.bfloat16), w2_ref[...],
                preferred_element_type=jnp.float32) + b2_ref[...]
    o_ref[...] = o

    # F.normalize(dim=1) on NCHW == row-wise L2 normalize in rows x C layout.
    ssq = jnp.sum(o * o, axis=-1, keepdims=True)
    inv = lax.rsqrt(jnp.maximum(ssq, 1e-24))                     # EUP rsqrt
    nf_ref[...] = (o * inv).astype(nf_ref.dtype)


def projector_pallas(x_rows, w1, b1, w2, b2, tm=512):
    """Apply the projector MLP to (M, Cin) rows.

    Returns (projected_rows_f32 (M, Cout), normalized_rows_bf16 (M, Cout)).
    """
    M, Cin = x_rows.shape
    Ch = w1.shape[1]
    Cout = w2.shape[1]

    Mp = _round_up(M, tm)
    if Mp != M:
        x_rows = jnp.pad(x_rows, ((0, Mp - M), (0, 0)))

    x_bf = x_rows.astype(jnp.bfloat16)
    w1_bf = w1.astype(jnp.bfloat16)
    w2_bf = w2.astype(jnp.bfloat16)
    b1_2d = b1.reshape(1, Ch).astype(jnp.float32)
    b2_2d = b2.reshape(1, Cout).astype(jnp.float32)

    o, nf = pl.pallas_call(
        _projector_kernel,
        out_shape=(
            jax.ShapeDtypeStruct((Mp, Cout), jnp.float32),
            jax.ShapeDtypeStruct((Mp, Cout), jnp.bfloat16),
        ),
        grid_spec=pltpu.PrefetchScalarGridSpec(
            num_scalar_prefetch=0,
            grid=(Mp // tm,),
            in_specs=[
                pl.BlockSpec((tm, Cin), lambda i: (i, 0)),
                pl.BlockSpec((Cin, Ch), lambda i: (0, 0)),
                pl.BlockSpec((1, Ch), lambda i: (0, 0)),
                pl.BlockSpec((Ch, Cout), lambda i: (0, 0)),
                pl.BlockSpec((1, Cout), lambda i: (0, 0)),
            ],
            out_specs=[
                pl.BlockSpec((tm, Cout), lambda i: (i, 0)),
                pl.BlockSpec((tm, Cout), lambda i: (i, 0)),
            ],
        ),
        compiler_params=pltpu.CompilerParams(
            dimension_semantics=("parallel",),
            vmem_limit_bytes=32 * 1024 * 1024,
        ),
    )(x_bf, w1_bf, b1_2d, w2_bf, b2_2d)

    return o[:M], nf[:M]


# ----------------------------------------------------------------------------
# get_mask: tiled NxN cosine similarity with streaming top-2 reduction
# ----------------------------------------------------------------------------
def _get_mask_kernel(q_ref, k_ref, mask_ref, dist_ref, m1_ref, m2_ref,
                     *, thr, n_valid, tk, needs_mask):
    kb = pl.program_id(2)

    @pl.when(kb == 0)
    def _():
        m1_ref[...] = jnp.full_like(m1_ref, -jnp.inf)
        m2_ref[...] = jnp.full_like(m2_ref, -jnp.inf)

    q = q_ref[0]  # (tq, C) bf16, already L2-normalized
    k = k_ref[0]  # (tk, C) bf16
    # Contract last dims directly (no explicit transpose); f32 accumulation.
    sim = lax.dot_general(q, k, (((1,), (1,)), ((), ())),
                          preferred_element_type=jnp.float32)   # (tq, tk)

    col = lax.broadcasted_iota(jnp.int32, sim.shape, 1)
    if needs_mask:
        valid = (kb * tk + col) < n_valid
        sim = jnp.where(valid, sim, -jnp.inf)

    # Block top-2 per row (value-based, duplicates counted): drop exactly one
    # occurrence of the block max, then take the max again.
    b1 = jnp.max(sim, axis=-1, keepdims=True)
    i1 = jnp.min(jnp.where(sim >= b1, col, tk), axis=-1, keepdims=True)
    b2 = jnp.max(jnp.where(col == i1, -jnp.inf, sim), axis=-1, keepdims=True)

    # Merge with running top-2.
    m1 = m1_ref[...]
    m2 = m2_ref[...]
    m1_ref[...] = jnp.maximum(m1, b1)
    m2_ref[...] = jnp.maximum(jnp.minimum(m1, b1), jnp.maximum(m2, b2))

    @pl.when(kb == pl.num_programs(2) - 1)
    def _():
        s2 = m2_ref[...]                                         # (tq, 1)
        # ||nf_i - nf_j|| = sqrt(2 - 2*sim) for L2-normalized rows.
        dist = jnp.sqrt(jnp.maximum(2.0 - 2.0 * s2, 0.0))
        dist_ref[0] = dist
        mask_ref[0] = jnp.where(dist > thr, 1.0, 0.0)


def get_mask_pallas(nf, H, W, mask_thr=0.2, tile=256):
    """DTD.get_mask on pre-normalized (B, N, C) bf16 features.

    Returns (bad_pixel_mask [B,1,H,W] f32, nn_distance [B, N] f32).
    """
    B, N, C = nf.shape
    t = min(tile, _round_up(N, 8))
    Npad = _round_up(N, t)
    if Npad != N:
        nf = jnp.pad(nf, ((0, 0), (0, Npad - N), (0, 0)))
    nb = Npad // t

    kernel = functools.partial(
        _get_mask_kernel, thr=mask_thr, n_valid=N, tk=t, needs_mask=(Npad != N))

    mask, dist = pl.pallas_call(
        kernel,
        out_shape=(
            jax.ShapeDtypeStruct((B, Npad, 1), jnp.float32),
            jax.ShapeDtypeStruct((B, Npad, 1), jnp.float32),
        ),
        grid_spec=pltpu.PrefetchScalarGridSpec(
            num_scalar_prefetch=0,
            grid=(B, nb, nb),
            in_specs=[
                pl.BlockSpec((1, t, C), lambda b, qi, ki: (b, qi, 0)),
                pl.BlockSpec((1, t, C), lambda b, qi, ki: (b, ki, 0)),
            ],
            out_specs=[
                pl.BlockSpec((1, t, 1), lambda b, qi, ki: (b, qi, 0)),
                pl.BlockSpec((1, t, 1), lambda b, qi, ki: (b, qi, 0)),
            ],
            scratch_shapes=[
                pltpu.VMEM((t, 1), jnp.float32),   # running max
                pltpu.VMEM((t, 1), jnp.float32),   # running 2nd max
            ],
        ),
        compiler_params=pltpu.CompilerParams(
            dimension_semantics=("parallel", "parallel", "arbitrary"),
            vmem_limit_bytes=32 * 1024 * 1024,
        ),
    )(nf, nf)

    bad_pixel_mask = mask[:, :N, 0].reshape(B, 1, H, W)
    nn_distance = dist[:, :N, 0]
    return bad_pixel_mask, nn_distance


# ----------------------------------------------------------------------------
# DTD forward (the parts defined inside the module)
# ----------------------------------------------------------------------------
def dtd_forward(feature0, feature1, proj_params, mask_thr=0.2, tm=512):
    """num_scales=1 path: projector on both feature maps + get_mask(feature0).
    TODO(synk): transformer / correlation / propagation / upsampler stages depend
                on external modules not present in masked_stereo.py.
    """
    B, Cin, H, W = feature0.shape
    N = H * W
    w1, b1, w2, b2 = proj_params
    Cout = w2.shape[1]

    # NCHW -> row-major once; both images share a single projector call.
    x0 = jnp.transpose(feature0, (0, 2, 3, 1)).reshape(B * N, Cin)
    x1 = jnp.transpose(feature1, (0, 2, 3, 1)).reshape(B * N, Cin)
    x = jnp.concatenate([x0, x1], axis=0)

    o_rows, nf_rows = projector_pallas(x, w1, b1, w2, b2, tm=tm)

    # get_mask consumes the already-normalized rows directly (no NCHW round trip)
    nf0 = nf_rows[: B * N].reshape(B, N, Cout)
    bad_pixel_mask, nn_distance = get_mask_pallas(nf0, H, W, mask_thr)

    proj0 = jnp.transpose(o_rows[: B * N].reshape(B, H, W, Cout), (0, 3, 1, 2))
    proj1 = jnp.transpose(o_rows[B * N:].reshape(B, H, W, Cout), (0, 3, 1, 2))

    return {
        "proj_feature0": proj0,
        "proj_feature1": proj1,
        "bad_pixel_mask": [bad_pixel_mask],
        "nn_distance": [nn_distance],
    }


# ----------------------------------------------------------------------------
# plain-JAX references (for sanity checking)
# ----------------------------------------------------------------------------
def _projector_ref(x_nchw, w1, b1, w2, b2):
    B, Cin, H, W = x_nchw.shape
    x = jnp.transpose(x_nchw, (0, 2, 3, 1)).reshape(-1, Cin)
    h = jnp.maximum(x @ w1 + b1, 0.0)
    o = h @ w2 + b2
    return jnp.transpose(o.reshape(B, H, W, -1), (0, 3, 1, 2))


def _get_mask_ref(feat, thr):
    B, C, H, W = feat.shape
    nrm = jnp.sqrt(jnp.sum(feat * feat, axis=1, keepdims=True))
    nf = feat / jnp.maximum(nrm, 1e-12)
    rf = jnp.transpose(nf, (0, 2, 3, 1)).reshape(B, H * W, C)
    sim = jnp.einsum("bnc,bmc->bnm", rf, rf)
    s2 = lax.top_k(sim, 2)[0][..., 1]
    dist = jnp.sqrt(jnp.maximum(2.0 - 2.0 * s2, 0.0))
    mask = (dist > thr).astype(jnp.float32).reshape(B, 1, H, W)
    return mask, dist


if __name__ == "__main__":
    key = jax.random.PRNGKey(0)
    k0, k1, kw1, kb1, kw2, kb2 = jax.random.split(key, 6)

    # small but module-consistent shapes: input_dim=384, output_dim=128.
    # W=20 makes B*H*W non-multiples of the tiles -> exercises padding/masking.
    B, Cin, H, W = 2, 384, 16, 20
    Ch, Cout = 256, 128
    mask_thr = 0.2

    feature0 = jax.random.normal(k0, (B, Cin, H, W), jnp.float32)
    feature1 = jax.random.normal(k1, (B, Cin, H, W), jnp.float32)

    # deterministic projector params (Conv2d 1x1 weights stored as (Cin, Cout))
    w1 = jax.random.normal(kw1, (Cin, Ch), jnp.float32) * 0.05
    b1 = jax.random.normal(kb1, (Ch,), jnp.float32) * 0.05
    w2 = jax.random.normal(kw2, (Ch, Cout), jnp.float32) * 0.05
    b2 = jax.random.normal(kb2, (Cout,), jnp.float32) * 0.05
    proj_params = (w1, b1, w2, b2)

    out = dtd_forward(feature0, feature1, proj_params, mask_thr)
    jax.tree_util.tree_map(jax.block_until_ready, out)

    # sanity check against plain-JAX f32 references (kernels use bf16 MXU inputs
    # with f32 accumulation, so tolerances are bf16-level).
    f0_ref = _projector_ref(feature0, *proj_params)
    f1_ref = _projector_ref(feature1, *proj_params)
    mask_ref, dist_ref = _get_mask_ref(f0_ref, mask_thr)

    assert jnp.allclose(out["proj_feature0"], f0_ref, rtol=5e-2, atol=5e-2)
    assert jnp.allclose(out["proj_feature1"], f1_ref, rtol=5e-2, atol=5e-2)
    assert jnp.allclose(out["nn_distance"][0], dist_ref, rtol=2e-2, atol=2e-2)
    agree = jnp.mean(out["bad_pixel_mask"][0] == mask_ref)
    assert agree > 0.99, f"mask agreement {agree}"

    print("KERNEL_OK")
</pallas_src>

<mosaic_0001>
module attributes {stable_mosaic.version = 11 : i64} {
  func.func @_projector_kernel(%arg0: i32, %arg1: memref<512x384xbf16, #tpu.memory_space<vmem>>, %arg2: memref<384x256xbf16, #tpu.memory_space<vmem>>, %arg3: memref<1x256xf32, #tpu.memory_space<vmem>>, %arg4: memref<256x128xbf16, #tpu.memory_space<vmem>>, %arg5: memref<1x128xf32, #tpu.memory_space<vmem>>, %arg6: memref<512x128xf32, #tpu.memory_space<vmem>>, %arg7: memref<512x128xbf16, #tpu.memory_space<vmem>>) attributes {dimension_semantics = [#tpu.dimension_semantics<parallel>], iteration_bounds = array<i64: 3>, scalar_prefetch = 0 : i64, scratch_operands = 0 : i64, tpu.core_type = #tpu.core_type<tc>, window_params = [{transform_indices = @transform_0, window_bounds = array<i64: 512, 384>}, {pipeline_mode = #tpu.pipeline_mode<synchronous>, transform_indices = @transform_1, window_bounds = array<i64: 384, 256>}, {pipeline_mode = #tpu.pipeline_mode<synchronous>, transform_indices = @transform_2, window_bounds = array<i64: 1, 256>}, {pipeline_mode = #tpu.pipeline_mode<synchronous>, transform_indices = @transform_3, window_bounds = array<i64: 256, 128>}, {pipeline_mode = #tpu.pipeline_mode<synchronous>, transform_indices = @transform_4, window_bounds = array<i64: 1, 128>}, {transform_indices = @transform_5, window_bounds = array<i64: 512, 128>}, {transform_indices = @transform_6, window_bounds = array<i64: 512, 128>}]} {
    %c0 = arith.constant 0 : index
    %c0_0 = arith.constant 0 : index
    %0 = vector.load %arg1[%c0, %c0_0] : memref<512x384xbf16, #tpu.memory_space<vmem>>, vector<512x384xbf16>
    %c0_1 = arith.constant 0 : index
    %c0_2 = arith.constant 0 : index
    %1 = vector.load %arg2[%c0_1, %c0_2] : memref<384x256xbf16, #tpu.memory_space<vmem>>, vector<384x256xbf16>
    %cst = arith.constant dense<0.000000e+00> : vector<512x256xf32>
    %2 = tpu.matmul %0, %1, %cst {dimension_numbers = #tpu.dot_dimension_numbers<[1], [0], [0], [1], [0, 0, 1, 1], [], []>} : vector<512x384xbf16>, vector<384x256xbf16>, vector<512x256xf32> -> vector<512x256xf32>
    %c0_3 = arith.constant 0 : index
    %c0_4 = arith.constant 0 : index
    %3 = vector.load %arg3[%c0_3, %c0_4] : memref<1x256xf32, #tpu.memory_space<vmem>>, vector<1x256xf32>
    %4 = vector.broadcast %3 : vector<1x256xf32> to vector<512x256xf32>
    %5 = arith.addf %2, %4 : vector<512x256xf32>
    %cst_5 = arith.constant 0.000000e+00 : f32
    %6 = vector.broadcast %cst_5 : f32 to vector<512x256xf32>
    %7 = arith.maximumf %5, %6 : vector<512x256xf32>
    %8 = arith.truncf %7 : vector<512x256xf32> to vector<512x256xbf16>
    %c0_6 = arith.constant 0 : index
    %c0_7 = arith.constant 0 : index
    %9 = vector.load %arg4[%c0_6, %c0_7] : memref<256x128xbf16, #tpu.memory_space<vmem>>, vector<256x128xbf16>
    %cst_8 = arith.constant dense<0.000000e+00> : vector<512x128xf32>
    %10 = tpu.matmul %8, %9, %cst_8 {dimension_numbers = #tpu.dot_dimension_numbers<[1], [0], [0], [1], [0, 0, 1, 1], [], []>} : vector<512x256xbf16>, vector<256x128xbf16>, vector<512x128xf32> -> vector<512x128xf32>
    %c0_9 = arith.constant 0 : index
    %c0_10 = arith.constant 0 : index
    %11 = vector.load %arg5[%c0_9, %c0_10] : memref<1x128xf32, #tpu.memory_space<vmem>>, vector<1x128xf32>
    %12 = vector.broadcast %11 : vector<1x128xf32> to vector<512x128xf32>
    %13 = arith.addf %10, %12 : vector<512x128xf32>
    %c0_11 = arith.constant 0 : index
    %c0_12 = arith.constant 0 : index
    %14 = vector.load %arg6[%c0_11, %c0_12] : memref<512x128xf32, #tpu.memory_space<vmem>>, vector<512x128xf32>
    tpu.vector_store %arg6[%c0_11, %c0_12], %13 {strides = array<i32>} : memref<512x128xf32, #tpu.memory_space<vmem>>, vector<512x128xf32>,
    %15 = arith.mulf %13, %13 : vector<512x128xf32>
    %cst_13 = arith.constant dense<0.000000e+00> : vector<512xf32>
    %16 = vector.multi_reduction <add>, %15, %cst_13 [1] : vector<512x128xf32> to vector<512xf32>
    %17 = vector.shape_cast %16 : vector<512xf32> to vector<512x1xf32>
    %cst_14 = arith.constant 1.000000e-24 : f32
    %18 = vector.broadcast %cst_14 : f32 to vector<512x1xf32>
    %19 = arith.maximumf %17, %18 : vector<512x1xf32>
    %20 = math.rsqrt %19 : vector<512x1xf32>
    %21 = vector.broadcast %20 : vector<512x1xf32> to vector<512x128xf32>
    %22 = arith.mulf %13, %21 : vector<512x128xf32>
    %23 = arith.truncf %22 : vector<512x128xf32> to vector<512x128xbf16>
    %c0_15 = arith.constant 0 : index
    %c0_16 = arith.constant 0 : index
    %24 = vector.load %arg7[%c0_15, %c0_16] : memref<512x128xbf16, #tpu.memory_space<vmem>>, vector<512x128xbf16>
    tpu.vector_store %arg7[%c0_15, %c0_16], %23 {strides = array<i32>} : memref<512x128xbf16, #tpu.memory_space<vmem>>, vector<512x128xbf16>,
    return
  }
  func.func @transform_0(%arg0: i32) -> (i32, i32) {
    %c0_i32 = arith.constant 0 : i32
    %c0_i32_0 = arith.constant 0 : i32
    return %arg0, %c0_i32 : i32, i32
  }
  func.func @transform_1(%arg0: i32) -> (i32, i32) {
    %c0_i32 = arith.constant 0 : i32
    %c0_i32_0 = arith.constant 0 : i32
    %c0_i32_1 = arith.constant 0 : i32
    return %c0_i32, %c0_i32_0 : i32, i32
  }
  func.func @transform_2(%arg0: i32) -> (i32, i32) {
    %c0_i32 = arith.constant 0 : i32
    %c0_i32_0 = arith.constant 0 : i32
    %c0_i32_1 = arith.constant 0 : i32
    return %c0_i32, %c0_i32_0 : i32, i32
  }
  func.func @transform_3(%arg0: i32) -> (i32, i32) {
    %c0_i32 = arith.constant 0 : i32
    %c0_i32_0 = arith.constant 0 : i32
    %c0_i32_1 = arith.constant 0 : i32
    return %c0_i32, %c0_i32_0 : i32, i32
  }
  func.func @transform_4(%arg0: i32) -> (i32, i32) {
    %c0_i32 = arith.constant 0 : i32
    %c0_i32_0 = arith.constant 0 : i32
    %c0_i32_1 = arith.constant 0 : i32
    return %c0_i32, %c0_i32_0 : i32, i32
  }
  func.func @transform_5(%arg0: i32) -> (i32, i32) {
    %c0_i32 = arith.constant 0 : i32
    %c0_i32_0 = arith.constant 0 : i32
    return %arg0, %c0_i32 : i32, i32
  }
  func.func @transform_6(%arg0: i32) -> (i32, i32) {
    %c0_i32 = arith.constant 0 : i32
    %c0_i32_0 = arith.constant 0 : i32
    return %arg0, %c0_i32 : i32, i32
  }
}

</mosaic_0001>

<bundles_post_ra>
// kernel: tpu_custom_call.1
= control target key start
LH: loop header
LB: loop body
LE: loop exit
PB: predicated region body
PF: predicated region fallthrough
CT: control target
= control target key end

     0   :  { %12 = vsyncpa [#allocation3], 0  ;;  %s6371_s0 = inlined_call_operand.hbm [shape: bf16[1536,384], index: 0, kind: input, shape index: {}]   ;;  %s6372_s1 = inlined_call_operand.hbm [shape: bf16[384,256], index: 1, kind: input, shape index: {}]   ;;  %s6373_s2 = inlined_call_operand.hbm [shape: f32[1,256], index: 2, kind: input, shape index: {}]   ;;  %s6374_s3 = inlined_call_operand.hbm [shape: bf16[256,128], index: 3, kind: input, shape index: {}]   ;;  %s6375_s4 = inlined_call_operand.hbm [shape: f32[1,128], index: 4, kind: input, shape index: {}]   ;;  %s6376_s5 = inlined_call_operand.hbm [shape: f32[1536,128], index: 5, kind: output, shape index: {0}]   ;;  %s6377_s6 = inlined_call_operand.hbm [shape: bf16[1536,128], index: 6, kind: output, shape index: {1}]  }
   0x1   :  { %14 = vsyncpa [#allocation3 + $0x1], 0 }
   0x2   :  { %15 = vsyncpa [#allocation6], 0 }
   0x3   :  { %16 = vsyncpa [#allocation9], 0 }
   0x4   :  { %17 = vsyncpa [#allocation4], 0 }
   0x5   :  { %19 = vsyncpa [#allocation4 + $0x1], 0 }
   0x6   :  { %20 = vsyncpa [#allocation13], 0 }
   0x7   :  { %22 = vsyncpa [#allocation13 + $0x1], 0  ;;  %s4811_s21 = smov 0   ;;  %s4813_s22 = smov 0  }
   0x8   :  { %s4815_s23 = smov 0   ;;  %s4817_s24 = smov 0  }
   0x9 LB: > { %s4832_s25 = sadd.s32 4294967295, %s4756_s24   ;;  %s3548_s26 = sadd.s32 4294967294, %s4756_s24   ;;  %s4756_s24 = sphi %s4817_s24, %s6505_s24   ;;  %s4752_s23 = sphi %s4815_s23, %s6504_s23   ;;  %s4748_s22 = sphi %s4813_s22, %s6503_s22   ;;  %s4744_s21 = sphi %s4811_s21, %s6502_s21  }
   0xa   : > { %p48_p0 = scmp.ne.s32.totalorder %s4748_s22, %s4744_s21  ;;  %p6378_p1 = scmp.eq.s32.totalorder %s4832_s25, 0 }
   0xb   : > { %p162_p3 = scmp.eq.s32.totalorder %s3548_s26, 2  ;;  %p3549_p5 = scmp.ge.s32.totalorder %s4756_s24, 1 }
   0xc   : > { %p4841_p4 = por %p6378_p1, %p48_p0  ;;  %p195_p7 = scmp.lt.s32.totalorder %s4756_s24, 4 }
   0xd   : > { %p4846_p6 = por %p162_p3, %p48_p0  ;;  %s4758_s30 = smov [#allocation5]  }
   0xe   : > { %s6384_s27 = scalar_select %p4841_p4, 1, 0 }
   0xf   : > { %s6385_s28 = scalar_select %p4846_p6, 1, 0 }
  0x10   : > { %p4851_p8 = pnand %p3549_p5, %p195_p7  ;;  %s207_s7 = sshll.u32 %s4758_s30, 4  ;;  %s208_s7 = int_to_ptr.vmem [resolvable:$true] %s207_s7 }
  0x11   : > { %s4759_s9 = smov [#allocation8]   ;;  %s4533_s11 = scalar_lea.vmem %s208_s7, 6144 }
  0x12   : > { %s6386_s29 = scalar_select %p4851_p8, 1, 0 }
  0x13   : > { %p4096_p9 = pneg %p4851_p8  ;;  %s231_s10 = sshll.u32 %s4759_s9, 4  ;;  %s232_s10 = int_to_ptr.vmem [resolvable:$true] %s231_s10 }
  0x14   : > { %p4534_p12 = scmp.ne.s32.totalorder %s208_s7, %s4533_s11  ;;  %p4541_p3 = scmp.lt.s32.totalorder %s208_s7, %s208_s7 }
  0x15   : > { %p4859_p10 = pnand %p4096_p9, %p6378_p1  ;;  %p4542_p5 = scmp.lt.s32.totalorder %s4533_s11, %s4533_s11 }
  0x17   : > { %p4524_p11 = pneg %p4859_p10  ;;  %p4543_p7 = por %p4542_p5, %p4541_p3 }
  0x19   : > { %p4536_p13 = pnand %p4534_p12, %p4524_p11 }
  0x1b   : > { %p4537_p0 = pneg %p4536_p13 }
  0x1d   : > { %p4544_p9 = pnand %p4543_p7, %p4537_p0 }
  0x1f   : > { %4547 = shalt.err (!%p4544_p9)
}
  0x20   : > { %s4760_s12 = smov 128   ;;  %s4761_s13 = smov 8  }
  0x21   : > { %4099 = dma.hbm_to_vmem [thread:$0]  (!%p4859_p10), %s6372_s1, 6144, %s208_s7, [#allocation6], %s4760_s12, %s4760_s12, %s4761_s13  }
  0x22   : > { %s4559_s16 = scalar_lea.vmem %s232_s10, 2048  ;;  %p4567_p2 = scmp.lt.s32.totalorder %s232_s10, %s232_s10 }
  0x23   : > { %p4560_p1 = scmp.ne.s32.totalorder %s232_s10, %s4559_s16  ;;  %p4568_p6 = scmp.lt.s32.totalorder %s4559_s16, %s4559_s16 }
  0x25   : > { %p4562_p12 = pnand %p4560_p1, %p4524_p11  ;;  %p4569_p3 = por %p4568_p6, %p4567_p2 }
  0x27   : > { %p4563_p13 = pneg %p4562_p12 }
  0x29   : > { %p4570_p0 = pnand %p4569_p3, %p4563_p13 }
  0x2b   : > { %4573 = shalt.err (!%p4570_p0)
}
  0x2c   : > { %s4762_s17 = smov 64   ;;  %s4763_s18 = smov 4  }
  0x2d   : > { %4105 = dma.hbm_to_vmem [thread:$0]  (!%p4859_p10), %s6374_s3, 2048, %s232_s10, [#allocation9], %s4762_s17, %s4762_s17, %s4763_s18  }
  0x2e   : > { %s4764_s26 = smov [#allocation7]   ;;  %s4765_s7 = smov [#allocation10]  }
  0x2f   : > { %s221_s30 = sshll.u32 %s4764_s26, 4  ;;  %s245_s9 = sshll.u32 %s4765_s7, 4  ;;  %s222_s30 = int_to_ptr.vmem [resolvable:$true] %s221_s30  ;;  %s246_s9 = int_to_ptr.vmem [resolvable:$true] %s245_s9 }
  0x30   : > { %s4585_s11 = scalar_lea.vmem %s222_s30, 32  ;;  %p4593_p5 = scmp.lt.s32.totalorder %s222_s30, %s222_s30 }
  0x31   : > { %p4586_p1 = scmp.ne.s32.totalorder %s222_s30, %s4585_s11  ;;  %p4594_p7 = scmp.lt.s32.totalorder %s4585_s11, %s4585_s11 }
  0x33   : > { %p4588_p2 = pnand %p4586_p1, %p4524_p11  ;;  %p4595_p9 = por %p4594_p7, %p4593_p5 }
  0x35   : > { %p4589_p6 = pneg %p4588_p2 }
  0x37   : > { %p4596_p12 = pnand %p4595_p9, %p4589_p6 }
  0x39   : > { %4599 = shalt.err (!%p4596_p12)
}
  0x3a   : > { %4102 = dma.hbm_to_vmem [thread:$0]  (!%p4859_p10), %s6373_s2, 32, %s222_s30, [#allocation6]  }
  0x3b   : > { %s4611_s13 = scalar_lea.vmem %s246_s9, 16  ;;  %s4618_s14 = scalar_lea.vmem %s246_s9, 32 }
  0x3c   : > { %p4612_p13 = scmp.ne.s32.totalorder %s246_s9, %s4611_s13  ;;  %p4619_p1 = scmp.lt.s32.totalorder %s246_s9, %s246_s9 }
  0x3d   : > { %p4620_p2 = scmp.lt.s32.totalorder %s4618_s14, %s4611_s13 }
  0x3e   : > { %p4614_p3 = pnand %p4612_p13, %p4524_p11 }
  0x3f   : > { %p4621_p4 = por %p4620_p2, %p4619_p1 }
  0x40   : > { %p4615_p0 = pneg %p4614_p3 }
  0x42   : > { %p4622_p5 = pnand %p4621_p4, %p4615_p0 }
  0x44   : > { %4625 = shalt.err (!%p4622_p5)
}
  0x45   : > { %4108 = dma.hbm_to_vmem [thread:$0]  (!%p4859_p10), %s6375_s4, 16, %s246_s9, [#allocation9]  }
  0x46   : > { %s4898_s17 = sadd.s32 1, %s4756_s24   ;;  %s35_s8 = sadd.s32 1, %s4752_s23 }
  0x47   : > { %s32_s18 = ssub.s32 %s4756_s24, %s4898_s17  ;;  %p42_p11 = scmp.ne.s32.totalorder %s4752_s23, %s4748_s22 }
  0x48   : > { %p33_p4 = scmp.eq.s32.totalorder %s32_s18, 0  ;;  %p43_p6 = scmp.eq.s32.totalorder %s4756_s24, 0 }
  0x49   : > { %p6388_p9 = scmp.eq.s32.totalorder %s4832_s25, 2  ;;  %p4124_p13 = scmp.lt.s32.totalorder %s4756_s24, 3 }
  0x4a   : > { %s4907_s19 = scalar_select %p33_p4, %s4752_s23, %s35_s8  }
  0x4b   : > { %p44_p7 = por %p43_p6, %p42_p11  ;;  %p4911_p12 = por %p6388_p9, %p42_p11 }
  0x4c   : > { %s256_s26 = sand.u32 1, %s4752_s23   ;;  %s4072_s7 = smul.u32 12288, %s4756_s24 }
  0x4d   : > { %s6389_s20 = scalar_select %p4911_p12, 1, 0 }
  0x4e   : > { %s4071_s30 = smul.u32 768, %s256_s26  ;;  %p4918_p10 = pnand %p4124_p13, %p44_p7 }
  0x4f   : > { %s4925_s12 = scalar_lea.hbm %s6371_s0, %s4072_s7  ;;  %s4929_s15 = scalar_lea.sflag [#allocation3], %s256_s26 }
  0x50   : > { %s260_s13 = scalar_lea.vmem [#allocation2], %s4071_s30  ;;  %s4626_s16 = scalar_lea.hbm %s4925_s12, 12288 }
  0x51   : > { %s268_s14 = sshll.u32 %s260_s13, 4  ;;  %p4627_p3 = scmp.ne.s32.totalorder %s4925_s12, %s4626_s16  ;;  %s4927_s14 = int_to_ptr.vmem [resolvable:$true] %s268_s14 }
  0x52   : > { %p4628_p0 = pneg %p4918_p10  ;;  %s4631_s7 = scalar_lea.hbm %s6371_s0, 36864 }
  0x53   : > { %p4632_p5 = scmp.lt.s32.totalorder %s4925_s12, %s6371_s0  ;;  %p4633_p4 = scmp.lt.s32.totalorder %s4631_s7, %s4626_s16 }
  0x54   : > { %p4629_p1 = pnand %p4628_p0, %p4627_p3 }
  0x55   : > { %p4634_p11 = por %p4633_p4, %p4632_p5 }
  0x56   : > { %p4630_p2 = pneg %p4629_p1 }
  0x58   : > { %p4635_p6 = pnand %p4634_p11, %p4630_p2 }
  0x5a   : > { %4638 = shalt.err (!%p4635_p6)
}
  0x5b   : > { %s4639_s26 = scalar_lea.vmem %s4927_s14, 12288  ;;  %s4766_s30 = smov [#allocation2]  }
  0x5c   : > { %p4640_p7 = scmp.ne.s32.totalorder %s4927_s14, %s4639_s26  ;;  %s4644_s13 = sshll.u32 %s4766_s30, 4  ;;  %s4645_s13 = int_to_ptr.vmem [resolvable:$false] %s4644_s13 }
  0x5d   : > { %s4646_s18 = scalar_lea.vmem %s4645_s13, 24576  ;;  %p4647_p3 = scmp.lt.s32.totalorder %s4927_s14, %s4645_s13 }
  0x5e   : > { %p4642_p9 = pnand %p4640_p7, %p4628_p0  ;;  %p4648_p1 = scmp.lt.s32.totalorder %s4646_s18, %s4639_s26 }
  0x60   : > { %p4643_p13 = pneg %p4642_p9  ;;  %p4649_p12 = por %p4648_p1, %p4647_p3 }
  0x62   : > { %p4650_p8 = pnand %p4649_p12, %p4643_p13 }
  0x64   : > { %4653 = shalt.err (!%p4650_p8)
}
  0x65   : > { %s4767_s16 = smov 192   ;;  %s4768_s8 = smov 12  }
  0x66   : > { %4112 = dma.hbm_to_vmem [thread:$0]  (!%p4918_p10), %s4925_s12, 12288, %s4927_s14, %s4929_s15, %s4767_s16, %s4767_s16, %s4768_s8  }
  0x67   : > { %p6391_p0 = scmp.ne.s32.totalorder %s6386_s29, 0 }
  0x69   : > { %280 = sbr.rel (%p6391_p0) target bundleno = 1270 (0x4f6), region = 40 }
  0x6e   : > { %s4953_s7 = sand.u32 1, %s4748_s22   ;;  %p6392_p8 = scmp.ne.s32.totalorder %s6384_s27, 0 }
  0x6f   : > { %s4073_s11 = smul.u32 768, %s4953_s7  ;;  %s283_s10 = scalar_lea.sflag [#allocation3], %s4953_s7 }
  0x71   : > { %s4957_s26 = scalar_lea.vmem [#allocation2], %s4073_s11 }
  0x72   : > { %4723 = dma.done.wait (%p6392_p8), %s283_s10, 12288  }
  0x73   : > { %4725 = vsyncadd (%p6392_p8), %s283_s10, 4294955008  ;;  %p6393_p12 = scmp.eq.s32.totalorder %s4832_s25, 0 }
  0x75   : > { %4727 = dma.done.wait (%p6393_p12), [#allocation6], 6176   ;;  %p6394_p10 = pmov %p6393_p12 }
  0x77   : > { %4729 = vsyncadd (%p6394_p10), [#allocation6], 4294961120  ;;  %p6395_p2 = pmov %p6394_p10 }
  0x79   : > { %4731 = dma.done.wait (%p6395_p2), [#allocation9], 2064   ;;  %p6396_p5 = pmov %p6395_p2 }
  0x7a   : > { %v4177_v0 = vld [vmem:[#allocation5 + $0x74] ss:$8 sps:$4 sm:$0xff]   ;;  %v4179_v1 = vld [vmem:[#allocation5 + $0x70] ss:$8 sps:$4 sm:$0xff]   ;;  %v4180_v2 = vld [vmem:[#allocation5 + $0x64] ss:$8 sps:$4 sm:$0xff]  }
  0x7b   : > { %4733 = vsyncadd (%p6396_p5), [#allocation9], 4294965232  ;;  %1280 = vmatprep.subr.bf16.mxu0 %v4177_v0  ;;  %v4182_v3 = vld [vmem:[#allocation5 + $0x60] ss:$8 sps:$4 sm:$0xff]   ;;  %v4183_v4 = vld [vmem:[#allocation5 + $0x54] ss:$8 sps:$4 sm:$0xff]  }
  0x7c   : > { %1281 = vmatpush1.bf16.msra.mxu0 %v4179_v1  ;;  %v4185_v5 = vld [vmem:[#allocation5 + $0x50] ss:$8 sps:$4 sm:$0xff]   ;;  %v4186_v6 = vld [vmem:[#allocation5 + $0x44] ss:$8 sps:$4 sm:$0xff]   ;;  %v4188_v7 = vld [vmem:[#allocation5 + $0x40] ss:$8 sps:$4 sm:$0xff]  }
  0x7d   : > { %1282 = vmatprep.subr.bf16.mxu0 %v4180_v2  ;;  %v4189_v8 = vld [vmem:[#allocation5 + $0x34] ss:$8 sps:$4 sm:$0xff]   ;;  %v4191_v9 = vld [vmem:[#allocation5 + $0x30] ss:$8 sps:$4 sm:$0xff]   ;;  %v4192_v10 = vld [vmem:[#allocation5 + $0x24] ss:$8 sps:$4 sm:$0xff]  }
  0x7e   : > { %v4194_v11 = vld [vmem:[#allocation5 + $0x20] ss:$8 sps:$4 sm:$0xff]   ;;  %v4195_v12 = vld [vmem:[#allocation5 + $0x14] ss:$8 sps:$4 sm:$0xff]   ;;  %v4197_v13 = vld [vmem:[#allocation5 + $0x10] ss:$8 sps:$4 sm:$0xff]  }
  0x7f   : > { %v4227_v14 = vld [vmem:[%s4957_s26 + $0x4] ss:$12 sps:$4 sm:$0xff]   ;;  %v4974_v16 = vld [vmem:[#allocation5 + $0x174] ss:$8 sps:$4 sm:$0xff]   ;;  %v4200_v18 = vld [vmem:[#allocation5] ss:$8 sps:$4 sm:$0xff]  }
  0x80   : > { %1283 = vmatpush1.bf16.msra.mxu0 %v4182_v3  ;;  %v4972_v15 = vld [vmem:[#allocation5 + $0x170] ss:$8 sps:$4 sm:$0xff]   ;;  %v4198_v17 = vld [vmem:[#allocation5 + $0x4] ss:$8 sps:$4 sm:$0xff]   ;;  %1312 = vmatprep.mubr.bf16.mxu0 %v4227_v14  ;;  %v4201_v19 = vld [vmem:[#allocation5 + $0xf4] ss:$8 sps:$4 sm:$0xff]  }
  0x81   : > { %1284 = vmatprep.subr.bf16.mxu0 %v4183_v4  ;;  %4055 = vmatprep.subr.bf16.mxu1 %v4974_v16  ;;  %v4978_v20 = vld [vmem:[#allocation5 + $0x160] ss:$8 sps:$4 sm:$0xff]   ;;  %v4980_v21 = vld [vmem:[#allocation5 + $0x164] ss:$8 sps:$4 sm:$0xff]   ;;  %v4203_v22 = vld [vmem:[#allocation5 + $0xf0] ss:$8 sps:$4 sm:$0xff]  }
  0x82   : > { %4063 = vmatpush1.bf16.msra.mxu1 %v4972_v15  ;;  %v4204_v23 = vld [vmem:[#allocation5 + $0xe4] ss:$8 sps:$4 sm:$0xff]   ;;  %v4206_v24 = vld [vmem:[#allocation5 + $0xe0] ss:$8 sps:$4 sm:$0xff]   ;;  %v4207_v25 = vld [vmem:[#allocation5 + $0xd4] ss:$8 sps:$4 sm:$0xff]  }
  0x83   : > { %4056 = vmatprep.subr.bf16.mxu1 %v4980_v21  ;;  %v4984_v26 = vld [vmem:[#allocation5 + $0x150] ss:$8 sps:$4 sm:$0xff]   ;;  %v4986_v27 = vld [vmem:[#allocation5 + $0x154] ss:$8 sps:$4 sm:$0xff]   ;;  %v4210_v29 = vld [vmem:[#allocation5 + $0xc4] ss:$8 sps:$4 sm:$0xff]  }
  0x84   : > { %1285 = vmatpush1.bf16.msra.mxu0 %v4185_v5  ;;  %v4209_v28 = vld [vmem:[#allocation5 + $0xd0] ss:$8 sps:$4 sm:$0xff]   ;;  %v4990_v30 = vld [vmem:[#allocation5 + $0x144] ss:$8 sps:$4 sm:$0xff]   ;;  %v4212_v31 = vld [vmem:[#allocation5 + $0xc0] ss:$8 sps:$4 sm:$0xff]  }
  0x85   : > { %1286 = vmatprep.subr.bf16.mxu0 %v4186_v6  ;;  %v4213_v32 = vld [vmem:[#allocation5 + $0xb4] ss:$8 sps:$4 sm:$0xff]   ;;  %v4274_v33 = vld [vmem:[#allocation5 + $0x140] ss:$8 sps:$4 sm:$0xff]   ;;  %v4993_v35 = vld [vmem:[#allocation5 + $0x130] ss:$8 sps:$4 sm:$0xff]  }
  0x86   : > { %4064 = vmatpush1.bf16.msra.mxu1 %v4978_v20  ;;  %v4276_v34 = vld [vmem:[#allocation5 + $0x134] ss:$8 sps:$4 sm:$0xff]   ;;  %v4995_v36 = vld [vmem:[#allocation5 + $0x124] ss:$8 sps:$4 sm:$0xff]   ;;  %v4215_v37 = vld [vmem:[#allocation5 + $0xb0] ss:$8 sps:$4 sm:$0xff]  }
  0x87   : > { %4057 = vmatprep.subr.bf16.mxu1 %v4986_v27  ;;  %v4216_v38 = vld [vmem:[#allocation5 + $0xa4] ss:$8 sps:$4 sm:$0xff]   ;;  %v4283_v39 = vld [vmem:[#allocation5 + $0x120] ss:$8 sps:$4 sm:$0xff]   ;;  %v4285_v40 = vld [vmem:[#allocation5 + $0x114] ss:$8 sps:$4 sm:$0xff]  }
  0x88   : > { %1287 = vmatpush1.bf16.msra.mxu0 %v4188_v7  ;;  %v4218_v41 = vld [vmem:[#allocation5 + $0xa0] ss:$8 sps:$4 sm:$0xff]   ;;  %v6382_v42 = vmov 0   ;;  %v4219_v43 = vld [vmem:[#allocation5 + $0x94] ss:$8 sps:$4 sm:$0xff]   ;;  %s3563_s27 = sshll.u32 %s4953_s7, 9 }
  0x89   : > { %1288 = vmatprep.subr.bf16.mxu0 %v4189_v8  ;;  %1805 = vmatprep.mubr.bf16.mxu1 %v6382_v42  ;;  %v4221_v44 = vld [vmem:[#allocation5 + $0x90] ss:$8 sps:$4 sm:$0xff]   ;;  %v4222_v46 = vld [vmem:[#allocation5 + $0x84] ss:$8 sps:$4 sm:$0xff]   ;;  %v4292_v48 = vld [vmem:[#allocation5 + $0x100] ss:$8 sps:$4 sm:$0xff]  }
  0x8a   : > { %4065 = vmatpush1.bf16.msra.mxu1 %v4984_v26  ;;  %v4287_v45 = vld [vmem:[#allocation5 + $0x110] ss:$8 sps:$4 sm:$0xff]   ;;  %v4288_v47 = vld [vmem:[#allocation5 + $0x104] ss:$8 sps:$4 sm:$0xff]   ;;  %v4224_v49 = vld [vmem:[#allocation5 + $0x80] ss:$8 sps:$4 sm:$0xff]  }
  0x8b   : > { %4058 = vmatprep.subr.bf16.mxu1 %v4990_v30  ;;  %v4294_v50 = vld [vmem:[%s4957_s26 + $0x158] ss:$12 sps:$4 sm:$0xff]   ;;  %v4225_v51 = vld [vmem:[%s4957_s26] ss:$12 sps:$4 sm:$0xff]   ;;  %v4231_v52 = vld [vmem:[%s4957_s26 + $0x1c] ss:$12 sps:$4 sm:$0xff]  }
  0x8c   : > { %1289 = vmatpush1.bf16.msra.mxu0 %v4191_v9  ;;  %v4298_v53 = vld [vmem:[%s4957_s26 + $0x170] ss:$12 sps:$4 sm:$0xff]   ;;  %v4233_v54 = vld [vmem:[%s4957_s26 + $0x18] ss:$12 sps:$4 sm:$0xff]   ;;  %v4234_v55 = vld [vmem:[%s4957_s26 + $0x34] ss:$12 sps:$4 sm:$0xff]  }
  0x8d   : > { %1290 = vmatprep.subr.bf16.mxu0 %v4192_v10  ;;  %v4302_v56 = vld [vmem:[%s4957_s26 + $0x188] ss:$12 sps:$4 sm:$0xff]   ;;  %v4236_v57 = vld [vmem:[%s4957_s26 + $0x30] ss:$12 sps:$4 sm:$0xff]   ;;  %v4237_v58 = vld [vmem:[%s4957_s26 + $0x4c] ss:$12 sps:$4 sm:$0xff]  }
  0x8e   : > { %4066 = vmatpush1.bf16.msra.mxu1 %v4274_v33  ;;  %v4306_v59 = vld [vmem:[%s4957_s26 + $0x1a0] ss:$12 sps:$4 sm:$0xff]   ;;  %v4239_v60 = vld [vmem:[%s4957_s26 + $0x48] ss:$12 sps:$4 sm:$0xff]   ;;  %v4240_v61 = vld [vmem:[%s4957_s26 + $0x64] ss:$12 sps:$4 sm:$0xff]  }
  0x8f   : > { %4059 = vmatprep.subr.bf16.mxu1 %v4276_v34  ;;  %v4310_v62 = vld [vmem:[%s4957_s26 + $0x1b8] ss:$12 sps:$4 sm:$0xff]   ;;  %v4242_v63 = vld [vmem:[%s4957_s26 + $0x60] ss:$12 sps:$4 sm:$0xff]   ;;  %v4246_v0 = vld [vmem:[%s4957_s26 + $0x7c] ss:$12 sps:$4 sm:$0xff]  }
  0x90   : > { %1291 = vmatpush1.bf16.msra.mxu0 %v4194_v11  ;;  %v4314_v1 = vld [vmem:[%s4957_s26 + $0x1d0] ss:$12 sps:$4 sm:$0xff]   ;;  %v4248_v2 = vld [vmem:[%s4957_s26 + $0x78] ss:$12 sps:$4 sm:$0xff]   ;;  %v4249_v3 = vld [vmem:[%s4957_s26 + $0x94] ss:$12 sps:$4 sm:$0xff]  }
  0x91   : > { %1292 = vmatprep.subr.bf16.mxu0 %v4195_v12  ;;  %v4318_v4 = vld [vmem:[%s4957_s26 + $0x1e8] ss:$12 sps:$4 sm:$0xff]   ;;  %v4251_v5 = vld [vmem:[%s4957_s26 + $0x90] ss:$12 sps:$4 sm:$0xff]   ;;  %v4252_v6 = vld [vmem:[%s4957_s26 + $0xac] ss:$12 sps:$4 sm:$0xff]  }
  0x92   : > { %4067 = vmatpush1.bf16.msra.mxu1 %v4993_v35  ;;  %v4322_v7 = vld [vmem:[%s4957_s26 + $0x200] ss:$12 sps:$4 sm:$0xff]   ;;  %v4254_v8 = vld [vmem:[%s4957_s26 + $0xa8] ss:$12 sps:$4 sm:$0xff]   ;;  %v4255_v9 = vld [vmem:[%s4957_s26 + $0xc4] ss:$12 sps:$4 sm:$0xff]  }
  0x93   : > { %4060 = vmatprep.subr.bf16.mxu1 %v4995_v36  ;;  %v4326_v10 = vld [vmem:[%s4957_s26 + $0x218] ss:$12 sps:$4 sm:$0xff]   ;;  %v4257_v11 = vld [vmem:[%s4957_s26 + $0xc0] ss:$12 sps:$4 sm:$0xff]   ;;  %v4261_v12 = vld [vmem:[%s4957_s26 + $0xdc] ss:$12 sps:$4 sm:$0xff]  }
  0x94   : > { %1293 = vmatpush1.bf16.msra.mxu0 %v4197_v13  ;;  %v4330_v13 = vld [vmem:[%s4957_s26 + $0x230] ss:$12 sps:$4 sm:$0xff]   ;;  %v4263_v14 = vld [vmem:[%s4957_s26 + $0xd8] ss:$12 sps:$4 sm:$0xff]   ;;  %s5735_s29 = scalar_lea.vmem [#allocation11], %s3563_s27  ;;  %s3564_s9 = sshll.u32 %s4953_s7, 8 }
  0x95   : > { %1294 = vmatprep.subr.bf16.mxu0 %v4198_v17  ;;  %v4266_v17 = vld [vmem:[%s4957_s26 + $0xf0] ss:$12 sps:$4 sm:$0xff]   ;;  %s6040_s12 = scalar_lea.vmem [#allocation12], %s3564_s9  ;;  %s3862_s14 = sshll.u32 %s4832_s25, 13 }
  0x96   : > { %4068 = vmatpush1.bf16.msra.mxu1 %v4283_v39  ;;  %s3389_s15 = sshll.u32 %s5735_s29, 4  ;;  %s6247_s18 = scalar_lea.hbm %s6376_s5, %s3862_s14  ;;  %s6249_s15 = int_to_ptr.vmem [resolvable:$true] %s3389_s15 }
  0x97   : > { %4061 = vmatprep.subr.bf16.mxu1 %v4285_v40  ;;  %s3371_s16 = scalar_lea.sflag [#allocation4], %s4953_s7  ;;  %s4654_s8 = scalar_lea.vmem %s6249_s15, 8192 }
  0x98   : > { %1295 = vmatpush1.bf16.msra.mxu0 %v4200_v18  ;;  %v4267_v18 = vld [vmem:[%s4957_s26 + $0x10c] ss:$12 sps:$4 sm:$0xff]   ;;  %p4655_p4 = scmp.ne.s32.totalorder %s6249_s15, %s4654_s8  ;;  %p6500_p11 = scmp.ne.s32.totalorder %s6389_s20, 0 }
  0x99   : > { %1296 = vmatprep.subr.bf16.mxu0 %v4201_v19  ;;  %v4338_v19 = vld [vmem:[%s4957_s26 + $0x260] ss:$12 sps:$4 sm:$0xff]   ;;  %s4770_s11 = smov [#allocation11]  }
  0x9a   : > { %4069 = vmatpush1.bf16.msra.mxu1 %v4287_v45  ;;  %p4656_p6 = pnand %p4655_p4, %p6500_p11  ;;  %s4658_s10 = sshll.u32 %s4770_s11, 4  ;;  %s4659_s10 = int_to_ptr.vmem [resolvable:$false] %s4658_s10 }
  0x9b   : > { %4062 = vmatprep.subr.bf16.mxu1 %v4288_v47  ;;  %p4661_p9 = scmp.lt.s32.totalorder %s6249_s15, %s4659_s10 }
  0x9c   : > { %1297 = vmatpush2.bf16.msra.mxu0 %v4203_v22  ;;  %v4342_v22 = vld [vmem:[%s4957_s26 + $0x278] ss:$12 sps:$4 sm:$0xff]   ;;  %p4657_p7 = pneg %p4656_p6 }
  0x9d   : > { %1298 = vmatprep.subr.bf16.mxu0 %v4204_v23  ;;  %v4275_v23 = vld [vmem:[%s4957_s26 + $0x120] ss:$12 sps:$4 sm:$0xff]  }
  0x9e   : > { %4070 = vmatpush1.bf16.msra.mxu1 %v4292_v48 }
  0x9f   : > { %2313 = vmatprep.subr.bf16.mxu1 %v6382_v42 }
  0xa0   : > { %1299 = vmatpush2.bf16.msra.mxu0 %v4206_v24  ;;  %v4281_v24 = vld [vmem:[%s4957_s26 + $0x13c] ss:$12 sps:$4 sm:$0xff]  }
  0xa1   : > { %1300 = vmatprep.subr.bf16.mxu0 %v4207_v25  ;;  %1806 = vmatmul.mubr.bf16.vlgmr.msra.gmra.mxu1 %v4294_v50  ;;  %v4346_v25 = vld [vmem:[%s4957_s26 + $0x290] ss:$12 sps:$4 sm:$0xff]   ;;  %v4327_v50 = vld [vmem:[%s4957_s26 + $0x22c] ss:$12 sps:$4 sm:$0xff]  }
  0xa2   : > { %1815 = vmatprep.mubr.bf16.mxu1 %v6382_v42 }
  0xa4   : > { %1301 = vmatpush2.bf16.msra.mxu0 %v4209_v28  ;;  %v4350_v28 = vld [vmem:[%s4957_s26 + $0x2a8] ss:$12 sps:$4 sm:$0xff]  }
  0xa5   : > { %1302 = vmatprep.subr.bf16.mxu0 %v4210_v29  ;;  %v4293_v29 = vld [vmem:[%s4957_s26 + $0x150] ss:$12 sps:$4 sm:$0xff]  }
  0xa8   : > { %1303 = vmatpush2.bf16.msra.mxu0 %v4212_v31  ;;  %v4354_v31 = vld [vmem:[%s4957_s26 + $0x2c0] ss:$12 sps:$4 sm:$0xff]  }
  0xa9   : > { %1304 = vmatprep.subr.bf16.mxu0 %v4213_v32  ;;  %1816 = vmatmul.mubr.bf16.gmra.mxu1 %v4298_v53  ;;  %v4297_v32 = vld [vmem:[%s4957_s26 + $0x168] ss:$12 sps:$4 sm:$0xff]   ;;  %v4333_v53 = vld [vmem:[%s4957_s26 + $0x240] ss:$12 sps:$4 sm:$0xff]  }
  0xaa   : > { %1825 = vmatprep.mubr.bf16.mxu1 %v6382_v42 }
  0xac   : > { %1305 = vmatpush2.bf16.msra.mxu0 %v4215_v37  ;;  %v4362_v37 = vld [vmem:[%s4957_s26 + $0x2f0] ss:$12 sps:$4 sm:$0xff]  }
  0xad   : > { %1306 = vmatprep.subr.bf16.mxu0 %v4216_v38  ;;  %v4305_v38 = vld [vmem:[%s4957_s26 + $0x198] ss:$12 sps:$4 sm:$0xff]  }
  0xb0   : > { %1307 = vmatpush2.bf16.msra.mxu0 %v4218_v41  ;;  %v4311_v41 = vld [vmem:[%s4957_s26 + $0x1cc] ss:$12 sps:$4 sm:$0xff]  }
  0xb1   : > { %1308 = vmatprep.subr.bf16.mxu0 %v4219_v43  ;;  %1826 = vmatmul.mubr.bf16.gmra.mxu1 %v4302_v56  ;;  %v4313_v43 = vld [vmem:[%s4957_s26 + $0x1c8] ss:$12 sps:$4 sm:$0xff]  }
  0xb2   : > { %1835 = vmatprep.mubr.bf16.mxu1 %v6382_v42 }
  0xb4   : > { %1309 = vmatpush2.bf16.msra.mxu0 %v4221_v44  ;;  %v4315_v44 = vld [vmem:[%s4957_s26 + $0x1e4] ss:$12 sps:$4 sm:$0xff]  }
  0xb5   : > { %1310 = vmatprep.subr.bf16.mxu0 %v4222_v46  ;;  %v4319_v46 = vld [vmem:[%s4957_s26 + $0x1fc] ss:$12 sps:$4 sm:$0xff]  }
  0xb8   : > { %1311 = vmatpush2.bf16.msra.mxu0 %v4224_v49  ;;  %v4325_v49 = vld [vmem:[%s4957_s26 + $0x210] ss:$12 sps:$4 sm:$0xff]  }
  0xb9   : > { %1633 = vmatprep.subr.bf16.mxu0 %v4974_v16  ;;  %1836 = vmatmul.mubr.bf16.gmra.mxu1 %v4306_v59  ;;  %v4334_v16 = vld [vmem:[%s4957_s26 + $0x248] ss:$12 sps:$4 sm:$0xff]  }
  0xba   : > { %1845 = vmatprep.mubr.bf16.mxu1 %v6382_v42 }
  0xbb   : > { %1313 = vmatmul.mubr.bf16.vlgmr.msra.gmra.mxu0 %v4225_v51  ;;  %v4329_v51 = vld [vmem:[%s4957_s26 + $0x228] ss:$12 sps:$4 sm:$0xff]  }
  0xbc   : > { %1634 = vmatpush1.bf16.msra.mxu0 %v4972_v15  ;;  %1322 = vmatprep.mubr.bf16.mxu0 %v4231_v52  ;;  %v4264_v15 = vld [vmem:[%s4957_s26 + $0xf4] ss:$12 sps:$4 sm:$0xff]   ;;  %v4331_v52 = vld [vmem:[%s4957_s26 + $0x244] ss:$12 sps:$4 sm:$0xff]  }
  0xbd   : > { %1635 = vmatprep.subr.bf16.mxu0 %v4980_v21  ;;  %v4272_v21 = vld [vmem:[%s4957_s26 + $0x124] ss:$12 sps:$4 sm:$0xff]  }
  0xc0   : > { %1636 = vmatpush1.bf16.msra.mxu0 %v4978_v20  ;;  %v4269_v20 = vld [vmem:[%s4957_s26 + $0x108] ss:$12 sps:$4 sm:$0xff]  }
  0xc1   : > { %1637 = vmatprep.subr.bf16.mxu0 %v4986_v27  ;;  %1846 = vmatmul.mubr.bf16.gmra.mxu1 %v4310_v62  ;;  %v4290_v27 = vld [vmem:[%s4957_s26 + $0x154] ss:$12 sps:$4 sm:$0xff]   ;;  %v4337_v62 = vld [vmem:[%s4957_s26 + $0x258] ss:$12 sps:$4 sm:$0xff]  }
  0xc2   : > { %1855 = vmatprep.mubr.bf16.mxu1 %v6382_v42 }
  0xc3   : > { %1323 = vmatmul.mubr.bf16.gmra.mxu0 %v4233_v54  ;;  %v4335_v54 = vld [vmem:[%s4957_s26 + $0x25c] ss:$12 sps:$4 sm:$0xff]  }
  0xc4   : > { %1332 = vmatprep.mubr.bf16.mxu0 %v4234_v55  ;;  %1638 = vmatpush1.bf16.msra.mxu0 %v4984_v26  ;;  %v4284_v26 = vld [vmem:[%s4957_s26 + $0x138] ss:$12 sps:$4 sm:$0xff]  }
  0xc5   : > { %1639 = vmatprep.subr.bf16.mxu0 %v4990_v30  ;;  %v4295_v30 = vld [vmem:[%s4957_s26 + $0x16c] ss:$12 sps:$4 sm:$0xff]  }
  0xc8   : > { %1640 = vmatpush1.bf16.msra.mxu0 %v4274_v33  ;;  %v4299_v33 = vld [vmem:[%s4957_s26 + $0x184] ss:$12 sps:$4 sm:$0xff]  }
  0xc9   : > { %1641 = vmatprep.subr.bf16.mxu0 %v4276_v34  ;;  %1856 = vmatmul.mubr.bf16.gmra.mxu1 %v4314_v1  ;;  %v4358_v34 = vld [vmem:[%s4957_s26 + $0x2d8] ss:$12 sps:$4 sm:$0xff]  }
  0xca   : > { %1865 = vmatprep.mubr.bf16.mxu1 %v6382_v42 }
  0xcb   : > { %1333 = vmatmul.mubr.bf16.gmra.mxu0 %v4236_v57 }
  0xcc   : > { %1342 = vmatprep.mubr.bf16.mxu0 %v4237_v58  ;;  %1642 = vmatpush1.bf16.msra.mxu0 %v4993_v35  ;;  %v4301_v35 = vld [vmem:[%s4957_s26 + $0x180] ss:$12 sps:$4 sm:$0xff]  }
  0xcd   : > { %1643 = vmatprep.subr.bf16.mxu0 %v4995_v36  ;;  %v4303_v36 = vld [vmem:[%s4957_s26 + $0x19c] ss:$12 sps:$4 sm:$0xff]  }
  0xd0   : > { %1644 = vmatpush1.bf16.msra.mxu0 %v4283_v39  ;;  %v4307_v39 = vld [vmem:[%s4957_s26 + $0x1b4] ss:$12 sps:$4 sm:$0xff]  }
  0xd1   : > { %1645 = vmatprep.subr.bf16.mxu0 %v4285_v40  ;;  %1866 = vmatmul.mubr.bf16.gmra.mxu1 %v4318_v4  ;;  %v4309_v40 = vld [vmem:[%s4957_s26 + $0x1b0] ss:$12 sps:$4 sm:$0xff]  }
  0xd2   : > { %1875 = vmatprep.mubr.bf16.mxu1 %v6382_v42 }
  0xd3   : > { %1343 = vmatmul.mubr.bf16.gmra.mxu0 %v4239_v60  ;;  %v4371_v60 = vld [vmem:[#allocation8 + $0x38] sm:$0xff]  }
  0xd4   : > { %1352 = vmatprep.mubr.bf16.mxu0 %v4240_v61  ;;  %1646 = vmatpush1.bf16.msra.mxu0 %v4287_v45  ;;  %v4317_v45 = vld [vmem:[%s4957_s26 + $0x1e0] ss:$12 sps:$4 sm:$0xff]  }
  0xd5   : > { %1647 = vmatprep.subr.bf16.mxu0 %v4288_v47  ;;  %v4321_v47 = vld [vmem:[%s4957_s26 + $0x1f8] ss:$12 sps:$4 sm:$0xff]   ;;  %2314 = vmatpush1.bf16.msra.mxu1 %v4371_v60 }
  0xd6   : > { %2315 = vmatprep.subr.bf16.mxu1 %v6382_v42 }
  0xd8   : > { %1648 = vmatpush1.bf16.msra.mxu0 %v4292_v48  ;;  %v4323_v48 = vld [vmem:[%s4957_s26 + $0x214] ss:$12 sps:$4 sm:$0xff]  }
  0xd9   : > { %1876 = vmatmul.mubr.bf16.gmra.mxu1 %v4322_v7  ;;  %v4374_v7 = vld [vmem:[#allocation8 + $0x30] sm:$0xff]  }
  0xda   : > { %1885 = vmatprep.mubr.bf16.mxu1 %v6382_v42  ;;  %2316 = vmatpush1.bf16.msra.mxu1 %v4374_v7  ;;  %v4359_v7 = vld [vmem:[%s4957_s26 + $0x2e8] ss:$12 sps:$4 sm:$0xff]  }
  0xdb   : > { %1353 = vmatmul.mubr.bf16.gmra.mxu0 %v4242_v63  ;;  %2317 = vmatprep.subr.bf16.mxu1 %v6382_v42 }
  0xdc   : > { %1362 = vmatprep.mubr.bf16.mxu0 %v4246_v0  ;;  %v4339_v0 = vld [vmem:[%s4957_s26 + $0x274] ss:$12 sps:$4 sm:$0xff]  }
  0xe1   : > { %1886 = vmatmul.mubr.bf16.gmra.mxu1 %v4326_v10 }
  0xe2   : > { %1895 = vmatprep.mubr.bf16.mxu1 %v6382_v42 }
  0xe3   : > { %1363 = vmatmul.mubr.bf16.gmra.mxu0 %v4248_v2 }
  0xe4   : > { %1372 = vmatprep.mubr.bf16.mxu0 %v4249_v3 }
  0xe9   : > { %1896 = vmatmul.mubr.bf16.gmra.mxu1 %v4330_v13 }
  0xea   : > { %1905 = vmatprep.mubr.bf16.mxu1 %v6382_v42 }
  0xeb   : > { %1373 = vmatmul.mubr.bf16.gmra.mxu0 %v4251_v5 }
  0xec   : > { %1382 = vmatprep.mubr.bf16.mxu0 %v4252_v6 }
  0xf1   : > { %1906 = vmatmul.mubr.bf16.gmra.mxu1 %v4334_v16 }
  0xf2   : > { %1915 = vmatprep.mubr.bf16.mxu1 %v6382_v42 }
  0xf3   : > { %1383 = vmatmul.mubr.bf16.gmra.mxu0 %v4254_v8 }
  0xf4   : > { %1392 = vmatprep.mubr.bf16.mxu0 %v4255_v9  ;;  %v4341_v9 = vld [vmem:[%s4957_s26 + $0x270] ss:$12 sps:$4 sm:$0xff]  }
  0xf9   : > { %1916 = vmatmul.mubr.bf16.gmra.mxu1 %v4338_v19 }
  0xfa   : > { %1925 = vmatprep.mubr.bf16.mxu1 %v6382_v42 }
  0xfb   : > { %1393 = vmatmul.mubr.bf16.gmra.mxu0 %v4257_v11  ;;  %v4343_v11 = vld [vmem:[%s4957_s26 + $0x28c] ss:$12 sps:$4 sm:$0xff]  }
  0xfc   : > { %1402 = vmatprep.mubr.bf16.mxu0 %v4261_v12 }
 0x101   : > { %1926 = vmatmul.mubr.bf16.gmra.mxu1 %v4342_v22  ;;  %v4349_v22 = vld [vmem:[%s4957_s26 + $0x2a4] ss:$12 sps:$4 sm:$0xff]  }
 0x102   : > { %1935 = vmatprep.mubr.bf16.mxu1 %v6382_v42 }
 0x103   : > { %1403 = vmatmul.mubr.bf16.gmra.mxu0 %v4263_v14 }
 0x104   : > { %1412 = vmatprep.mubr.bf16.mxu0 %v4264_v15 }
 0x109   : > { %1936 = vmatmul.mubr.bf16.gmra.mxu1 %v4346_v25 }
 0x10a   : > { %1945 = vmatprep.mubr.bf16.mxu1 %v6382_v42 }
 0x10b   : > { %1413 = vmatmul.mubr.bf16.gmra.mxu0 %v4266_v17 }
 0x10c   : > { %1422 = vmatprep.mubr.bf16.mxu0 %v4267_v18  ;;  %v4376_v18 = vld [vmem:[#allocation8 + $0x28] sm:$0xff]  }
 0x10d   : > { %2318 = vmatpush1.bf16.msra.mxu1 %v4376_v18  ;;  %v4383_v18 = vld [vmem:[#allocation8 + $0x8] sm:$0xff]  }
 0x10e   : > { %2319 = vmatprep.subr.bf16.mxu1 %v6382_v42 }
 0x111   : > { %1946 = vmatmul.mubr.bf16.gmra.mxu1 %v4350_v28 }
 0x112   : > { %1955 = vmatprep.mubr.bf16.mxu1 %v6382_v42 }
 0x113   : > { %1423 = vmatmul.mubr.bf16.gmra.mxu0 %v4269_v20  ;;  %v4345_v20 = vld [vmem:[%s4957_s26 + $0x288] ss:$12 sps:$4 sm:$0xff]  }
 0x114   : > { %1432 = vmatprep.mubr.bf16.mxu0 %v4272_v21 }
 0x119   : > { %1956 = vmatmul.mubr.bf16.gmra.mxu1 %v4354_v31  ;;  %v4353_v31 = vld [vmem:[%s4957_s26 + $0x2bc] ss:$12 sps:$4 sm:$0xff]  }
 0x11a   : > { %1965 = vmatprep.mubr.bf16.mxu1 %v6382_v42 }
 0x11b   : > { %1433 = vmatmul.mubr.bf16.gmra.mxu0 %v4275_v23 }
 0x11c   : > { %1442 = vmatprep.mubr.bf16.mxu0 %v4281_v24 }
 0x121   : > { %1966 = vmatmul.mubr.bf16.gmra.mxu1 %v4358_v34 }
 0x122   : > { %1975 = vmatprep.mubr.bf16.mxu1 %v6382_v42 }
 0x123   : > { %1443 = vmatmul.mubr.bf16.gmra.mxu0 %v4284_v26 }
 0x124   : > { %1452 = vmatprep.mubr.bf16.mxu0 %v4290_v27 }
 0x129   : > { %1976 = vmatmul.mubr.bf16.gmra.mxu1 %v4362_v37 }
 0x12b   : > { %1453 = vmatmul.mubr.bf16.gmra.mxu0 %v4293_v29 }
 0x12c   : > { %1462 = vmatprep.mubr.bf16.mxu0 %v4295_v30  ;;  %v4347_v30 = vld [vmem:[%s4957_s26 + $0x2a0] ss:$12 sps:$4 sm:$0xff]  }
 0x133   : > { %1463 = vmatmul.mubr.bf16.gmra.mxu0 %v4297_v32  ;;  %v4378_v32 = vld [vmem:[#allocation8 + $0x20] sm:$0xff]  }
 0x134   : > { %1472 = vmatprep.mubr.bf16.mxu0 %v4299_v33  ;;  %2320 = vmatpush1.bf16.msra.mxu1 %v4378_v32  ;;  %v4363_v32 = vld [vmem:[%s4957_s26 + $0x8] ss:$12 sps:$4 sm:$0xff]  }
 0x135   : > { %2321 = vmatprep.subr.bf16.mxu1 %v6382_v42 }
 0x13b   : > { %1473 = vmatmul.mubr.bf16.gmra.mxu0 %v4301_v35 }
 0x13c   : > { %1482 = vmatprep.mubr.bf16.mxu0 %v4303_v36 }
 0x143   : > { %1483 = vmatmul.mubr.bf16.gmra.mxu0 %v4305_v38 }
 0x144   : > { %1492 = vmatprep.mubr.bf16.mxu0 %v4307_v39  ;;  %v4351_v39 = vld [vmem:[%s4957_s26 + $0x2b8] ss:$12 sps:$4 sm:$0xff]  }
 0x14b   : > { %1493 = vmatmul.mubr.bf16.gmra.mxu0 %v4309_v40  ;;  %v4357_v40 = vld [vmem:[%s4957_s26 + $0x2d4] ss:$12 sps:$4 sm:$0xff]  }
 0x14c   : > { %1502 = vmatprep.mubr.bf16.mxu0 %v4311_v41  ;;  %v4380_v41 = vld [vmem:[#allocation8 + $0x18] sm:$0xff]  }
 0x14d   : > { %2322 = vmatpush1.bf16.msra.mxu1 %v4380_v41 }
 0x14e   : > { %2323 = vmatprep.subr.bf16.mxu1 %v6382_v42 }
 0x153   : > { %1503 = vmatmul.mubr.bf16.gmra.mxu0 %v4313_v43 }
 0x154   : > { %1512 = vmatprep.mubr.bf16.mxu0 %v4315_v44 }
 0x15b   : > { %1513 = vmatmul.mubr.bf16.gmra.mxu0 %v4317_v45 }
 0x15c   : > { %1522 = vmatprep.mubr.bf16.mxu0 %v4319_v46 }
 0x161   : > { %v5095_v55 = vpop.f32.mrf.mxu1 }
 0x163   : > { %1523 = vmatmul.mubr.bf16.gmra.mxu0 %v4321_v47  ;;  %v5099_v57 = vpop.f32.mrf.mxu1 }
 0x164   : > { %1532 = vmatprep.mubr.bf16.mxu0 %v4323_v48 }
 0x165   : > { %v5103_v59 = vpop.f32.mrf.mxu1 }
 0x167   : > { %v5108_v63 = vpop.f32.mrf.mxu1 }
 0x169   : > { %v5113_v2 = vpop.f32.mrf.mxu1 }
 0x16b   : > { %1533 = vmatmul.mubr.bf16.gmra.mxu0 %v4325_v49  ;;  %v5118_v4 = vpop.f32.mrf.mxu1  ;;  %v4355_v49 = vld [vmem:[%s4957_s26 + $0x2d0] ss:$12 sps:$4 sm:$0xff]  }
 0x16c   : > { %1542 = vmatprep.mubr.bf16.mxu0 %v4327_v50  ;;  %v4361_v50 = vld [vmem:[%s4957_s26 + $0x2ec] ss:$12 sps:$4 sm:$0xff]  }
 0x16d   : > { %v5122_v6 = vpop.f32.mrf.mxu1 }
 0x16f   : > { %v5127_v10 = vpop.f32.mrf.mxu1 }
 0x171   : > { %v5132_v13 = vpop.f32.mrf.mxu1 }
 0x173   : > { %1543 = vmatmul.mubr.bf16.gmra.mxu0 %v4329_v51  ;;  %v5137_v15 = vpop.f32.mrf.mxu1 }
 0x174   : > { %1552 = vmatprep.mubr.bf16.mxu0 %v4331_v52 }
 0x175   : > { %v5141_v17 = vpop.f32.mrf.mxu1 }
 0x177   : > { %v5146_v21 = vpop.f32.mrf.mxu1 }
 0x179   : > { %v5151_v24 = vpop.f32.mrf.mxu1 }
 0x17b   : > { %v5097_v56 = vpop.f32.mrf.mxu0  ;;  %1553 = vmatmul.mubr.bf16.gmra.mxu0 %v4333_v53  ;;  %v5156_v26 = vpop.f32.mrf.mxu1  ;;  %v4382_v53 = vld [vmem:[#allocation8 + $0x10] sm:$0xff]  }
 0x17c   : > { %1562 = vmatprep.mubr.bf16.mxu0 %v4335_v54  ;;  %2324 = vmatpush1.bf16.msra.mxu1 %v4382_v53  ;;  %v4384_v53 = vld [vmem:[#allocation8] sm:$0xff]  }
 0x17d   : > { %v5101_v58 = vpop.f32.mrf.mxu0  ;;  %v5160_v28 = vpop.f32.mrf.mxu1  ;;  %2325 = vmatprep.subr.bf16.mxu1 %v6382_v42 }
 0x17f   : > { %v5105_v61 = vpop.f32.mrf.mxu0  ;;  %v5168_v34 = vpop.f32.mrf.mxu1 }
 0x180   : > { %2326 = vmatpush1.bf16.msra.mxu1 %v4383_v18  ;;  %v4364_v18 = vld [vmem:[%s4957_s26 + $0x20] ss:$12 sps:$4 sm:$0xff]  }
 0x181   : > { %v5111_v1 = vpop.f32.mrf.mxu0  ;;  %v5175_v37 = vpop.f32.mrf.mxu1  ;;  %2327 = vmatprep.subr.bf16.mxu1 %v6382_v42 }
 0x183   : > { %v5116_v3 = vpop.f32.mrf.mxu0  ;;  %1563 = vmatmul.mubr.bf16.gmra.mxu0 %v4337_v62  ;;  %v5183_v44 = vpop.f32.mrf.mxu1 }
 0x184   : > { %1572 = vmatprep.mubr.bf16.mxu0 %v4339_v0  ;;  %2328 = vmatpush1.bf16.msra.mxu1 %v4384_v53  ;;  %v4365_v53 = vld [vmem:[%s4957_s26 + $0x38] ss:$12 sps:$4 sm:$0xff]  }
 0x185   : > { %v5120_v5 = vpop.f32.mrf.mxu0  ;;  %v5190_v47 = vpop.f32.mrf.mxu1  ;;  %2329 = vmatprep.subr.bf16.mxu1 %v6382_v42 }
 0x187   : > { %v5124_v8 = vpop.f32.mrf.mxu0  ;;  %v5198_v52 = vpop.f32.mrf.mxu1 }
 0x189   : > { %v5130_v12 = vpop.f32.mrf.mxu0  ;;  %v5204_v62 = vpop.f32.mrf.mxu1 }
 0x18b   : > { %v5135_v14 = vpop.f32.mrf.mxu0  ;;  %1573 = vmatmul.mubr.bf16.gmra.mxu0 %v4341_v9 }
 0x18c   : > { %6397 = vst [vmem:[#allocation19_spill] sm:$0xff] %v5135_v14  ;;  %1582 = vmatprep.mubr.bf16.mxu0 %v4343_v11  ;;  %v5212_v11 = vpop.f32.mrf.mxu1 }
 0x18d   : > { %v5139_v16 = vpop.f32.mrf.mxu0 }
 0x18e   : > { %6398 = vst [vmem:[#allocation20_spill] sm:$0xff] %v5139_v16 }
 0x18f   : > { %v5143_v19 = vpop.f32.mrf.mxu0 }
 0x190   : > { %6399 = vst [vmem:[#allocation21_spill] sm:$0xff] %v5143_v19 }
 0x191   : > { %v5149_v23 = vpop.f32.mrf.mxu0 }
 0x192   : > { %6400 = vst [vmem:[#allocation22_spill] sm:$0xff] %v5149_v23  ;;  %v4390_v23 = vld [vmem:[#allocation8 + $0x50] sm:$0xff]  }
 0x193   : > { %v5154_v25 = vpop.f32.mrf.mxu0  ;;  %1583 = vmatmul.mubr.bf16.gmra.mxu0 %v4345_v20 }
 0x194   : > { %6401 = vst [vmem:[#allocation23_spill] sm:$0xff] %v5154_v25  ;;  %1592 = vmatprep.mubr.bf16.mxu0 %v4349_v22 }
 0x195   : > { %v5158_v27 = vpop.f32.mrf.mxu0 }
 0x196   : > { %6402 = vst [vmem:[#allocation24_spill] sm:$0xff] %v5158_v27  ;;  %v4370_v27 = vld [vmem:[%s4957_s26 + $0xb0] ss:$12 sps:$4 sm:$0xff]  }
 0x197   : > { %v5162_v29 = vpop.f32.mrf.mxu0 }
 0x198   : > { %6403 = vst [vmem:[#allocation25_spill] sm:$0xff] %v5162_v29 }
 0x199   : > { %v5166_v33 = vpop.f32.mrf.mxu0 }
 0x19a   : > { %6404 = vst [vmem:[#allocation26_spill] sm:$0xff] %v5166_v33 }
 0x19b   : > { %v5170_v35 = vpop.f32.mrf.mxu0  ;;  %1593 = vmatmul.mubr.bf16.gmra.mxu0 %v4347_v30  ;;  %v5219_v30 = vpop.f32.mrf.mxu1 }
 0x19c   : > { %6405 = vst [vmem:[#allocation27_spill] sm:$0xff] %v5170_v35  ;;  %1602 = vmatprep.mubr.bf16.mxu0 %v4353_v31 }
 0x19d   : > { %v5173_v36 = vpop.f32.mrf.mxu0 }
 0x19e   : > { %6406 = vst [vmem:[#allocation28_spill] sm:$0xff] %v5173_v36 }
 0x19f   : > { %v5177_v38 = vpop.f32.mrf.mxu0 }
 0x1a0   : > { %6407 = vst [vmem:[#allocation29_spill] sm:$0xff] %v5177_v38 }
 0x1a1   : > { %v5181_v43 = vpop.f32.mrf.mxu0 }
 0x1a2   : > { %6408 = vst [vmem:[#allocation30_spill] sm:$0xff] %v5181_v43  ;;  %v516_v43 = vld [vmem:[#allocation7] sm:$0x3] }
 0x1a3   : > { %v5185_v45 = vpop.f32.mrf.mxu0  ;;  %1603 = vmatmul.mubr.bf16.gmra.mxu0 %v4351_v39 }
 0x1a4   : > { %6409 = vst [vmem:[#allocation31_spill] sm:$0xff] %v5185_v45  ;;  %1612 = vmatprep.mubr.bf16.mxu0 %v4357_v40  ;;  %v5227_v40 = vpop.f32.mrf.mxu1 }
 0x1a5   : > { %v5188_v46 = vpop.f32.mrf.mxu0 }
 0x1a6   : > { %6410 = vst [vmem:[#allocation32_spill] sm:$0xff] %v5188_v46 }
 0x1a7   : > { %v5192_v48 = vpop.f32.mrf.mxu0 }
 0x1a8   : > { %6411 = vst [vmem:[#allocation33_spill] sm:$0xff] %v5192_v48 }
 0x1a9   : > { %v5196_v51 = vpop.f32.mrf.mxu0 }
 0x1aa   : > { %6412 = vst [vmem:[#allocation34_spill] sm:$0xff] %v5196_v51  ;;  %v518_v51 = vlaneseq }
 0x1ab   : > { %v5200_v54 = vpop.f32.mrf.mxu0  ;;  %1613 = vmatmul.mubr.bf16.gmra.mxu0 %v4355_v49 }
 0x1ac   : > { %6413 = vst [vmem:[#allocation35_spill] sm:$0xff] %v5200_v54  ;;  %1622 = vmatprep.mubr.bf16.mxu0 %v4361_v50  ;;  %v5234_v50 = vpop.f32.mrf.mxu1  ;;  %v519_v45 = vshrl.u32 %v518_v51, 7  ;;  %v4389_v51 = vld [vmem:[#allocation8 + $0x58] sm:$0xff]  }
 0x1ad   : > { %v5202_v60 = vpop.f32.mrf.mxu0 }
 0x1ae   : > { %6414 = vst [vmem:[#allocation36_spill] sm:$0xff] %v5202_v60  ;;  %v4387_v60 = vld [vmem:[#allocation8 + $0x68] sm:$0xff]   ;;  %v524_v36 = vsub.s32 1, %v519_v45 }
 0x1af   : > { %v5207_v0 = vpop.f32.mrf.mxu0 }
 0x1b0   : > { %6415 = vst [vmem:[#allocation37_spill] sm:$0xff] %v5207_v0  ;;  %v5321_v35 = vrot.slane %v516_v43, %v524_v36 }
 0x1b1   : > { %v5210_v9 = vpop.f32.mrf.mxu0 }
 0x1b2   : > { %6416 = vst [vmem:[#allocation38_spill] sm:$0xff] %v5210_v9  ;;  %v4386_v9 = vld [vmem:[#allocation8 + $0x70] sm:$0xff]  }
 0x1b3   : > { %v5214_v20 = vpop.f32.mrf.mxu0  ;;  %1623 = vmatmul.mubr.bf16.gmra.mxu0 %v4359_v7 }
 0x1b4   : > { %6417 = vst [vmem:[#allocation39_spill] sm:$0xff] %v5214_v20  ;;  %1665 = vmatprep.mubr.bf16.mxu0 %v6382_v42 }
 0x1b5   : > { %v5217_v22 = vpop.f32.mrf.mxu0 }
 0x1b6   : > { %6418 = vst [vmem:[#allocation40_spill] sm:$0xff] %v5217_v22  ;;  %v4385_v22 = vld [vmem:[#allocation8 + $0x78] sm:$0xff]  }
 0x1b7   : > { %v5222_v31 = vpop.f32.mrf.mxu0  ;;  %2330 = vmatpush2.bf16.msra.mxu1 %v4385_v22  ;;  %v4366_v22 = vld [vmem:[%s4957_s26 + $0x50] ss:$12 sps:$4 sm:$0xff]  }
 0x1b8   : > { %6419 = vst [vmem:[#allocation41_spill] sm:$0xff] %v5222_v31  ;;  %2331 = vmatprep.subr.bf16.mxu1 %v6382_v42 }
 0x1b9   : > { %v5225_v39 = vpop.f32.mrf.mxu0 }
 0x1ba   : > { %6420 = vst [vmem:[#allocation42_spill] sm:$0xff] %v5225_v39  ;;  %v5241_v39 = vpop.f32.mrf.mxu1 }
 0x1bb   : > { %v5229_v41 = vpop.f32.mrf.mxu0  ;;  %1666 = vmatmul.mubr.bf16.vlgmr.msra.gmra.mxu0 %v4363_v32  ;;  %2332 = vmatpush2.bf16.msra.mxu1 %v4386_v9  ;;  %v4367_v9 = vld [vmem:[%s4957_s26 + $0x68] ss:$12 sps:$4 sm:$0xff]  }
 0x1bc   : > { %6421 = vst [vmem:[#allocation43_spill] sm:$0xff] %v5229_v41  ;;  %1675 = vmatprep.mubr.bf16.mxu0 %v6382_v42  ;;  %2333 = vmatprep.subr.bf16.mxu1 %v6382_v42 }
 0x1bd   : > { %v5232_v49 = vpop.f32.mrf.mxu0 }
 0x1be   : > { %6422 = vst [vmem:[#allocation44_spill] sm:$0xff] %v5232_v49  ;;  %v5249_v49 = vpop.f32.mrf.mxu1 }
 0x1bf   : > { %v5236_v7 = vpop.f32.mrf.mxu0  ;;  %2334 = vmatpush2.bf16.msra.mxu1 %v4387_v60  ;;  %v4368_v60 = vld [vmem:[%s4957_s26 + $0x80] ss:$12 sps:$4 sm:$0xff]  }
 0x1c0   : > { %6423 = vst [vmem:[#allocation45_spill] sm:$0xff] %v5236_v7  ;;  %v5256_v20 = vpop.f32.mrf.mxu1  ;;  %2335 = vmatprep.subr.bf16.mxu1 %v6382_v42 }
 0x1c1   : > { %v5239_v31 = vpop.f32.mrf.mxu0 }
 0x1c2   : > { %6424 = vst [vmem:[#allocation46_spill] sm:$0xff] %v5239_v31 }
 0x1c3   : > { %v5244_v41 = vpop.f32.mrf.mxu0  ;;  %1676 = vmatmul.mubr.bf16.gmra.mxu0 %v4364_v18 }
 0x1c4   : > { %6425 = vst [vmem:[#allocation47_spill] sm:$0xff] %v5244_v41  ;;  %1685 = vmatprep.mubr.bf16.mxu0 %v6382_v42 }
 0x1c5   : > { %v5247_v32 = vpop.f32.mrf.mxu0 }
 0x1c6   : > { %6426 = vst [vmem:[#allocation48_spill] sm:$0xff] %v5247_v32  ;;  %v5264_v32 = vpop.f32.mrf.mxu1 }
 0x1c7   : > { %v5251_v7 = vpop.f32.mrf.mxu0 }
 0x1c8   : > { %6427 = vst [vmem:[#allocation49_spill] sm:$0xff] %v5251_v7  ;;  %v5271_v0 = vpop.f32.mrf.mxu1 }
 0x1c9   : > { %v5254_v31 = vpop.f32.mrf.mxu0 }
 0x1ca   : > { %6428 = vst [vmem:[#allocation50_spill] sm:$0xff] %v5254_v31 }
 0x1cb   : > { %v5259_v41 = vpop.f32.mrf.mxu0  ;;  %1686 = vmatmul.mubr.bf16.gmra.mxu0 %v4365_v53 }
 0x1cc   : > { %6429 = vst [vmem:[#allocation51_spill] sm:$0xff] %v5259_v41  ;;  %1695 = vmatprep.mubr.bf16.mxu0 %v6382_v42 }
 0x1cd   : > { %v5262_v18 = vpop.f32.mrf.mxu0 }
 0x1ce   : > { %6430 = vst [vmem:[#allocation52_spill] sm:$0xff] %v5262_v18  ;;  %v5279_v18 = vpop.f32.mrf.mxu1 }
 0x1cf   : > { %v5266_v7 = vpop.f32.mrf.mxu0 }
 0x1d0   : > { %6431 = vst [vmem:[#allocation53_spill] sm:$0xff] %v5266_v7  ;;  %v5286_v54 = vpop.f32.mrf.mxu1 }
 0x1d1   : > { %v5269_v31 = vpop.f32.mrf.mxu0 }
 0x1d2   : > { %6432 = vst [vmem:[#allocation54_spill] sm:$0xff] %v5269_v31 }
 0x1d3   : > { %v5274_v41 = vpop.f32.mrf.mxu0  ;;  %1696 = vmatmul.mubr.bf16.gmra.mxu0 %v4366_v22 }
 0x1d4   : > { %6433 = vst [vmem:[#allocation55_spill] sm:$0xff] %v5274_v41  ;;  %1705 = vmatprep.mubr.bf16.mxu0 %v6382_v42 }
 0x1d5   : > { %v5277_v53 = vpop.f32.mrf.mxu0 }
 0x1d6   : > { %6434 = vst [vmem:[#allocation56_spill] sm:$0xff] %v5277_v53  ;;  %v5294_v53 = vpop.f32.mrf.mxu1 }
 0x1d7   : > { %v5281_v7 = vpop.f32.mrf.mxu0 }
 0x1d8   : > { %6435 = vst [vmem:[#allocation57_spill] sm:$0xff] %v5281_v7  ;;  %v4388_v7 = vld [vmem:[#allocation8 + $0x60] sm:$0xff]   ;;  %v5301_v46 = vpop.f32.mrf.mxu1 }
 0x1d9   : > { %v5284_v31 = vpop.f32.mrf.mxu0  ;;  %2336 = vmatpush2.bf16.msra.mxu1 %v4388_v7 }
 0x1da   : > { %6436 = vst [vmem:[#allocation58_spill] sm:$0xff] %v5284_v31  ;;  %2337 = vmatprep.subr.bf16.mxu1 %v6382_v42 }
 0x1db   : > { %v5289_v41 = vpop.f32.mrf.mxu0  ;;  %1706 = vmatmul.mubr.bf16.gmra.mxu0 %v4367_v9 }
 0x1dc   : > { %6437 = vst [vmem:[#allocation59_spill] sm:$0xff] %v5289_v41  ;;  %1715 = vmatprep.mubr.bf16.mxu0 %v6382_v42 }
 0x1dd   : > { %v5292_v22 = vpop.f32.mrf.mxu0  ;;  %2338 = vmatpush2.bf16.msra.mxu1 %v4389_v51 }
 0x1de   : > { %6438 = vst [vmem:[#allocation60_spill] sm:$0xff] %v5292_v22  ;;  %v5309_v22 = vpop.f32.mrf.mxu1 }
 0x1df   : > { %v5296_v48 = vpop.f32.mrf.mxu0 }
 0x1e0   : > { %6439 = vst [vmem:[#allocation61_spill] sm:$0xff] %v5296_v48  ;;  %v520_v48 = vsub.s32 0, %v519_v45 }
 0x1e1   : > { %v5299_v31 = vpop.f32.mrf.mxu0 }
 0x1e2   : > { %6440 = vst [vmem:[#allocation62_spill] sm:$0xff] %v5299_v31  ;;  %v4369_v31 = vld [vmem:[%s4957_s26 + $0x98] ss:$12 sps:$4 sm:$0xff]  }
 0x1e3   : > { %v5303_v41 = vpop.f32.mrf.mxu0  ;;  %1716 = vmatmul.mubr.bf16.gmra.mxu0 %v4368_v60  ;;  %v5318_v60 = vrot.slane %v516_v43, %v520_v48 }
 0x1e4   : > { %6441 = vst [vmem:[#allocation63_spill] sm:$0xff] %v5303_v41  ;;  %1725 = vmatprep.mubr.bf16.mxu0 %v6382_v42  ;;  %v5316_v41 = vpop.f32.mrf.mxu1 }
 0x1e5   : > { %v5307_v9 = vpop.f32.mrf.mxu0 }
 0x1e6   : > { %6442 = vst [vmem:[#allocation64_spill] sm:$0xff] %v5307_v9  ;;  %v6445_v9 = vmov 0  }
 0x1e7   : > { %v5311_v38 = vpop.f32.mrf.mxu0  ;;  %2339 = vmatprep.subr.bf16.mxu1 %v6445_v9 }
 0x1e8   : > { %6443 = vst [vmem:[#allocation65_spill] sm:$0xff] %v5311_v38  ;;  %v5325_v38 = vpop.f32.mrf.mxu1  ;;  %2340 = vmatpush2.bf16.msra.mxu1 %v4390_v23 }
 0x1e9   : > { %v5314_v7 = vpop.f32.mrf.mxu0  ;;  %2341 = vmatprep.subr.bf16.mxu1 %v6445_v9 }
 0x1ea   : > { %6444 = vst [vmem:[#allocation66_spill] sm:$0xff] %v5314_v7  ;;  %v5331_v25 = vpop.f32.mrf.mxu1 }
 0x1eb   : > { %v1454_v42 = vpop.f32.mrf.mxu0  ;;  %1726 = vmatmul.mubr.bf16.gmra.mxu0 %v4369_v31 }
 0x1ec   : > { %v1455_v33 = vadd.f32 %v1454_v42, %v5318_v60  ;;  %1735 = vmatprep.mubr.bf16.mxu0 %v6445_v9 }
 0x1ed   : > { %v1456_v45 = vpop.f32.mrf.mxu0 }
 0x1ee   : > { %v1457_v7 = vadd.f32 %v1456_v45, %v5321_v35  ;;  %v1808_v48 = vadd.f32 %v5095_v55, %v1455_v33  ;;  %v5339_v33 = vpop.f32.mrf.mxu1 }
 0x1ef   : > { %v1458_v29 = vpop.f32.mrf.mxu0 }
 0x1f0   : > { %v1459_v51 = vadd.f32 %v1458_v29, %v5318_v60  ;;  %v1810_v36 = vadd.f32 %v5099_v57, %v1457_v7  ;;  %v2042_v45 = vmax.f32 %v1808_v48, 0.0 }
 0x1f1   : > { %v1460_v31 = vpop.f32.mrf.mxu0 }
 0x1f2   : > { %v1461_v42 = vadd.f32 %v1460_v31, %v5321_v35  ;;  %v1812_v43 = vadd.f32 %v5103_v59, %v1459_v51  ;;  %v2043_v57 = vmax.f32 %v1810_v36, 0.0  ;;  %v4372_v51 = vld [vmem:[%s4957_s26 + $0xc8] ss:$12 sps:$4 sm:$0xff]  }
 0x1f3   : > { %v1464_v19 = vpop.f32.mrf.mxu0  ;;  %1736 = vmatmul.mubr.bf16.gmra.mxu0 %v4370_v27 }
 0x1f4   : > { %v2044_v16 = vmax.f32 %v1812_v43, 0.0  ;;  %v1465_v14 = vadd.f32 %v1464_v19, %v5318_v60  ;;  %v1814_v55 = vadd.f32 %v5108_v63, %v1461_v42  ;;  %1745 = vmatprep.mubr.bf16.mxu0 %v6445_v9  ;;  %v5350_v42 = vpop.f32.mrf.mxu1 }
 0x1f5   : > { %v1466_v29 = vpop.f32.mrf.mxu0 }
 0x1f6   : > { %v5342_v59 = vpack.c.bf16 %v2044_v16, %v2042_v45  ;;  %v2045_v7 = vmax.f32 %v1814_v55, 0.0  ;;  %v1467_v27 = vadd.f32 %v1466_v29, %v5321_v35  ;;  %v1818_v19 = vadd.f32 %v5113_v2, %v1465_v14  ;;  %v4391_v45 = vld [vmem:[#allocation8 + $0x48] sm:$0xff]  }
 0x1f7   : > { %v1468_v48 = vpop.f32.mrf.mxu0  ;;  %2342 = vmatpush2.bf16.msra.mxu1 %v4391_v45 }
 0x1f8   : > { %6446 = vst [vmem:[#allocation67_spill] sm:$0xff] %v5342_v59  ;;  %v1469_v63 = vadd.f32 %v1468_v48, %v5318_v60  ;;  %v5348_v31 = vpack.c.bf16 %v2045_v7, %v2043_v57  ;;  %v1820_v43 = vadd.f32 %v5118_v4, %v1467_v27  ;;  %v2046_v29 = vmax.f32 %v1818_v19, 0.0  ;;  %v5358_v7 = vpop.f32.mrf.mxu1  ;;  %2343 = vmatprep.subr.bf16.mxu1 %v6445_v9  ;;  %v4373_v19 = vld [vmem:[%s4957_s26 + $0xe0] ss:$12 sps:$4 sm:$0xff]  }
 0x1f9   : > { %v1470_v23 = vpop.f32.mrf.mxu0 }
 0x1fa   : > { %v1471_v36 = vadd.f32 %v1470_v23, %v5321_v35  ;;  %v1822_v16 = vadd.f32 %v5122_v6, %v1469_v63  ;;  %v2047_v4 = vmax.f32 %v1820_v43, 0.0 }
 0x1fb   : > { %v1474_v55 = vpop.f32.mrf.mxu0  ;;  %1746 = vmatmul.mubr.bf16.gmra.mxu0 %v4372_v51 }
 0x1fc   : > { %v2048_v59 = vmax.f32 %v1822_v16, 0.0  ;;  %v1475_v2 = vadd.f32 %v1474_v55, %v5318_v60  ;;  %v1824_v14 = vadd.f32 %v5127_v10, %v1471_v36  ;;  %1755 = vmatprep.mubr.bf16.mxu0 %v6445_v9  ;;  %v5369_v16 = vpop.f32.mrf.mxu1 }
 0x1fd   : > { %v1476_v57 = vpop.f32.mrf.mxu0 }
 0x1fe   : > { %v5361_v6 = vpack.c.bf16 %v2048_v59, %v2046_v29  ;;  %v2049_v27 = vmax.f32 %v1824_v14, 0.0  ;;  %v1477_v48 = vadd.f32 %v1476_v57, %v5321_v35  ;;  %v1828_v63 = vadd.f32 %v5132_v13, %v1475_v2  ;;  %v4392_v57 = vld [vmem:[#allocation8 + $0x40] sm:$0xff]  }
 0x1ff   : > { %v1478_v51 = vpop.f32.mrf.mxu0  ;;  %2344 = vmatpush2.bf16.msra.mxu1 %v4392_v57 }
 0x200   : > { %v1479_v10 = vadd.f32 %v1478_v51, %v5318_v60  ;;  %v5367_v23 = vpack.c.bf16 %v2049_v27, %v2047_v4  ;;  %v1830_v45 = vadd.f32 %v5137_v15, %v1477_v48  ;;  %v2050_v29 = vmax.f32 %v1828_v63, 0.0  ;;  %v5377_v27 = vpop.f32.mrf.mxu1  ;;  %v4375_v63 = vld [vmem:[%s4957_s26 + $0xf8] ss:$12 sps:$4 sm:$0xff]  }
 0x201   : > { %v1480_v36 = vpop.f32.mrf.mxu0 }
 0x202   : > { %v1481_v43 = vadd.f32 %v1480_v36, %v5321_v35  ;;  %v1832_v59 = vadd.f32 %v5141_v17, %v1479_v10  ;;  %v2051_v15 = vmax.f32 %v1830_v45, 0.0 }
 0x203   : > { %v1484_v55 = vpop.f32.mrf.mxu0  ;;  %1756 = vmatmul.mubr.bf16.gmra.mxu0 %v4373_v19 }
 0x204   : > { %v2052_v14 = vmax.f32 %v1832_v59, 0.0  ;;  %v1485_v13 = vadd.f32 %v1484_v55, %v5318_v60  ;;  %v1834_v2 = vadd.f32 %v5146_v21, %v1481_v43  ;;  %1765 = vmatprep.mubr.bf16.mxu0 %v6445_v9  ;;  %v5387_v59 = vpop.f32.mrf.mxu1 }
 0x205   : > { %v1486_v4 = vpop.f32.mrf.mxu0 }
 0x206   : > { %v5379_v48 = vpack.c.bf16 %v2052_v14, %v2050_v29  ;;  %v2053_v51 = vmax.f32 %v1834_v2, 0.0  ;;  %v1487_v17 = vadd.f32 %v1486_v4, %v5321_v35  ;;  %v1838_v10 = vadd.f32 %v5151_v24, %v1485_v13 }
 0x207   : > { %v1488_v19 = vpop.f32.mrf.mxu0 }
 0x208   : > { %v1489_v36 = vadd.f32 %v1488_v19, %v5318_v60  ;;  %v5385_v21 = vpack.c.bf16 %v2053_v51, %v2051_v15  ;;  %v1840_v55 = vadd.f32 %v5156_v26, %v1487_v17  ;;  %v2054_v2 = vmax.f32 %v1838_v10, 0.0  ;;  %v5395_v15 = vpop.f32.mrf.mxu1 }
 0x209   : > { %v1490_v43 = vpop.f32.mrf.mxu0 }
 0x20a   : > { %v1491_v45 = vadd.f32 %v1490_v43, %v5321_v35  ;;  %v1842_v29 = vadd.f32 %v5160_v28, %v1489_v36  ;;  %v2055_v51 = vmax.f32 %v1840_v55, 0.0  ;;  %v4377_v36 = vld [vmem:[%s4957_s26 + $0x110] ss:$12 sps:$4 sm:$0xff]  }
 0x20b   : > { %v1494_v14 = vpop.f32.mrf.mxu0  ;;  %1766 = vmatmul.mubr.bf16.gmra.mxu0 %v4375_v63 }
 0x20c   : > { %v2056_v57 = vmax.f32 %v1842_v29, 0.0  ;;  %v1495_v24 = vadd.f32 %v1494_v14, %v5318_v60  ;;  %v1844_v13 = vadd.f32 %v5168_v34, %v1491_v45  ;;  %1775 = vmatprep.mubr.bf16.mxu0 %v6445_v9  ;;  %v5405_v45 = vpop.f32.mrf.mxu1 }
 0x20d   : > { %v1496_v4 = vpop.f32.mrf.mxu0 }
 0x20e   : > { %v5397_v26 = vpack.c.bf16 %v2056_v57, %v2054_v2  ;;  %v2057_v17 = vmax.f32 %v1844_v13, 0.0  ;;  %v1497_v19 = vadd.f32 %v1496_v4, %v5321_v35  ;;  %v1848_v63 = vadd.f32 %v5175_v37, %v1495_v24 }
 0x20f   : > { %v1498_v28 = vpop.f32.mrf.mxu0 }
 0x210   : > { %v1499_v10 = vadd.f32 %v1498_v28, %v5318_v60  ;;  %v5403_v43 = vpack.c.bf16 %v2057_v17, %v2055_v51  ;;  %v1850_v29 = vadd.f32 %v5183_v44, %v1497_v19  ;;  %v2058_v57 = vmax.f32 %v1848_v63, 0.0  ;;  %v5413_v51 = vpop.f32.mrf.mxu1 }
 0x211   : > { %v1500_v34 = vpop.f32.mrf.mxu0 }
 0x212   : > { %v1501_v55 = vadd.f32 %v1500_v34, %v5321_v35  ;;  %v1852_v14 = vadd.f32 %v5190_v47, %v1499_v10  ;;  %v2059_v17 = vmax.f32 %v1850_v29, 0.0  ;;  %v4379_v10 = vld [vmem:[%s4957_s26 + $0x128] ss:$12 sps:$4 sm:$0xff]  }
 0x213   : > { %v1504_v2 = vpop.f32.mrf.mxu0  ;;  %1776 = vmatmul.mubr.bf16.gmra.mxu0 %v4377_v36 }
 0x214   : > { %v2060_v13 = vmax.f32 %v1852_v14, 0.0  ;;  %v1505_v37 = vadd.f32 %v1504_v2, %v5318_v60  ;;  %v1854_v24 = vadd.f32 %v5198_v52, %v1501_v55  ;;  %1785 = vmatprep.mubr.bf16.mxu0 %v6445_v9  ;;  %v5423_v55 = vpop.f32.mrf.mxu1 }
 0x215   : > { %v1506_v4 = vpop.f32.mrf.mxu0 }
 0x216   : > { %v5415_v44 = vpack.c.bf16 %v2060_v13, %v2058_v57  ;;  %v2061_v19 = vmax.f32 %v1854_v24, 0.0  ;;  %v1507_v28 = vadd.f32 %v1506_v4, %v5321_v35  ;;  %v1858_v36 = vadd.f32 %v5204_v62, %v1505_v37 }
 0x217   : > { %v1508_v47 = vpop.f32.mrf.mxu0 }
 0x218   : > { %v1509_v63 = vadd.f32 %v1508_v47, %v5318_v60  ;;  %v5421_v34 = vpack.c.bf16 %v2061_v19, %v2059_v17  ;;  %v1860_v14 = vadd.f32 %v5212_v11, %v1507_v28  ;;  %v2062_v13 = vmax.f32 %v1858_v36, 0.0  ;;  %v5431_v17 = vpop.f32.mrf.mxu1 }
 0x219   : > { %v1510_v52 = vpop.f32.mrf.mxu0 }
 0x21a   : > { %v1511_v29 = vadd.f32 %v1510_v52, %v5321_v35  ;;  %v1862_v2 = vadd.f32 %v5219_v30, %v1509_v63  ;;  %v2063_v19 = vmax.f32 %v1860_v14, 0.0  ;;  %v4381_v63 = vld [vmem:[%s4957_s26 + $0x140] ss:$12 sps:$4 sm:$0xff]   ;;  %s4660_s26 = scalar_lea.vmem %s4659_s10, 16384 }
 0x21b   : > { %v1514_v57 = vpop.f32.mrf.mxu0  ;;  %1786 = vmatmul.mubr.bf16.gmra.mxu0 %v4379_v10  ;;  %p4662_p13 = scmp.lt.s32.totalorder %s4660_s26, %s4654_s8 }
 0x21c   : > { %v2064_v24 = vmax.f32 %v1862_v2, 0.0  ;;  %v1515_v62 = vadd.f32 %v1514_v57, %v5318_v60  ;;  %v1864_v37 = vadd.f32 %v5227_v40, %v1511_v29  ;;  %1795 = vmatprep.mubr.bf16.mxu0 %v6445_v9  ;;  %v5441_v29 = vpop.f32.mrf.mxu1 }
 0x21d   : > { %v1516_v4 = vpop.f32.mrf.mxu0  ;;  %p4663_p3 = por %p4662_p13, %p4661_p9 }
 0x21e   : > { %v5433_v11 = vpack.c.bf16 %v2064_v24, %v2062_v13  ;;  %v2065_v28 = vmax.f32 %v1864_v37, 0.0  ;;  %v1517_v47 = vadd.f32 %v1516_v4, %v5321_v35  ;;  %v1868_v10 = vadd.f32 %v5234_v50, %v1515_v62  ;;  %v5448_v4 = vpop.f32.mrf.mxu1 }
 0x21f   : > { %v1518_v30 = vpop.f32.mrf.mxu0  ;;  %p4664_p1 = pnand %p4663_p3, %p4657_p7 }
 0x220   : > { %v1519_v36 = vadd.f32 %v1518_v30, %v5318_v60  ;;  %v5439_v52 = vpack.c.bf16 %v2065_v28, %v2063_v19  ;;  %v1870_v9 = vadd.f32 %v5241_v39, %v1517_v47  ;;  %v2066_v13 = vmax.f32 %v1868_v10, 0.0 }
 0x221   : > { %v1520_v40 = vpop.f32.mrf.mxu0 }
 0x222   : > { %v1521_v14 = vadd.f32 %v1520_v40, %v5321_v35  ;;  %v1872_v2 = vadd.f32 %v5249_v49, %v1519_v36  ;;  %v2067_v19 = vmax.f32 %v1870_v9, 0.0  ;;  %v5457_v40 = vpop.f32.mrf.mxu1 }
 0x223   : > { %v1524_v57 = vpop.f32.mrf.mxu0  ;;  %1796 = vmatmul.mubr.bf16.gmra.mxu0 %v4381_v63 }
 0x224   : > { %v2068_v24 = vmax.f32 %v1872_v2, 0.0  ;;  %v1525_v37 = vadd.f32 %v1524_v57, %v5318_v60  ;;  %v1874_v50 = vadd.f32 %v5256_v20, %v1521_v14 }
 0x225   : > { %v1526_v62 = vpop.f32.mrf.mxu0 }
 0x226   : > { %v5450_v28 = vpack.c.bf16 %v2068_v24, %v2066_v13  ;;  %v2069_v30 = vmax.f32 %v1874_v50, 0.0  ;;  %v1527_v39 = vadd.f32 %v1526_v62, %v5321_v35  ;;  %v1878_v49 = vadd.f32 %v5264_v32, %v1525_v37  ;;  %v5464_v50 = vpop.f32.mrf.mxu1 }
 0x227   : > { %v1528_v47 = vpop.f32.mrf.mxu0 }
 0x228   : > { %v1529_v63 = vadd.f32 %v1528_v47, %v5318_v60  ;;  %v5455_v10 = vpack.c.bf16 %v2069_v30, %v2067_v19  ;;  %v1880_v20 = vadd.f32 %v5271_v0, %v1527_v39  ;;  %v2070_v57 = vmax.f32 %v1878_v49, 0.0 }
 0x229   : > { %v1530_v36 = vpop.f32.mrf.mxu0 }
 0x22a   : > { %v1531_v14 = vadd.f32 %v1530_v36, %v5321_v35  ;;  %v1882_v9 = vadd.f32 %v5279_v18, %v1529_v63  ;;  %v2071_v62 = vmax.f32 %v1880_v20, 0.0  ;;  %v5473_v36 = vpop.f32.mrf.mxu1 }
 0x22b   : > { %v1534_v2 = vpop.f32.mrf.mxu0 }
 0x22c   : > { %v2072_v13 = vmax.f32 %v1882_v9, 0.0  ;;  %v1535_v24 = vadd.f32 %v1534_v2, %v5318_v60  ;;  %v1884_v32 = vadd.f32 %v5286_v54, %v1531_v14 }
 0x22d   : > { %v1536_v37 = vpop.f32.mrf.mxu0 }
 0x22e   : > { %v5466_v19 = vpack.c.bf16 %v2072_v13, %v2070_v57  ;;  %v2073_v30 = vmax.f32 %v1884_v32, 0.0  ;;  %v1537_v0 = vadd.f32 %v1536_v37, %v5321_v35  ;;  %v1888_v47 = vadd.f32 %v5294_v53, %v1535_v24  ;;  %v5480_v32 = vpop.f32.mrf.mxu1 }
 0x22f   : > { %v1538_v39 = vpop.f32.mrf.mxu0 }
 0x230   : > { %v1539_v18 = vadd.f32 %v1538_v39, %v5318_v60  ;;  %v5471_v49 = vpack.c.bf16 %v2073_v30, %v2071_v62  ;;  %v1890_v54 = vadd.f32 %v5301_v46, %v1537_v0  ;;  %v2074_v2 = vmax.f32 %v1888_v47, 0.0 }
 0x231   : > { %v1540_v63 = vpop.f32.mrf.mxu0 }
 0x232   : > { %v1541_v14 = vadd.f32 %v1540_v63, %v5321_v35  ;;  %v1892_v20 = vadd.f32 %v5309_v22, %v1539_v18  ;;  %v2075_v37 = vmax.f32 %v1890_v54, 0.0  ;;  %v5489_v63 = vpop.f32.mrf.mxu1 }
 0x233   : > { %v1544_v9 = vpop.f32.mrf.mxu0 }
 0x234   : > { %v2076_v57 = vmax.f32 %v1892_v20, 0.0  ;;  %v1545_v13 = vadd.f32 %v1544_v9, %v5318_v60  ;;  %v1894_v53 = vadd.f32 %v5316_v41, %v1541_v14 }
 0x235   : > { %v1546_v24 = vpop.f32.mrf.mxu0 }
 0x236   : > { %v5482_v62 = vpack.c.bf16 %v2076_v57, %v2074_v2  ;;  %v2077_v30 = vmax.f32 %v1894_v53, 0.0  ;;  %v1547_v46 = vadd.f32 %v1546_v24, %v5321_v35  ;;  %v1898_v39 = vadd.f32 %v5325_v38, %v1545_v13  ;;  %v5496_v53 = vpop.f32.mrf.mxu1 }
 0x237   : > { %v1548_v0 = vpop.f32.mrf.mxu0 }
 0x238   : > { %v1549_v22 = vadd.f32 %v1548_v0, %v5318_v60  ;;  %v5487_v47 = vpack.c.bf16 %v2077_v30, %v2075_v37  ;;  %v1900_v41 = vadd.f32 %v5331_v25, %v1547_v46  ;;  %v2078_v9 = vmax.f32 %v1898_v39, 0.0 }
 0x239   : > { %v1550_v18 = vpop.f32.mrf.mxu0 }
 0x23a   : > { %v1551_v14 = vadd.f32 %v1550_v18, %v5321_v35  ;;  %v1902_v54 = vadd.f32 %v5339_v33, %v1549_v22  ;;  %v2079_v24 = vmax.f32 %v1900_v41, 0.0  ;;  %v5505_v18 = vpop.f32.mrf.mxu1 }
 0x23b   : > { %v1554_v20 = vpop.f32.mrf.mxu0 }
 0x23c   : > { %v2080_v2 = vmax.f32 %v1902_v54, 0.0  ;;  %v1555_v57 = vadd.f32 %v1554_v20, %v5318_v60  ;;  %v1904_v38 = vadd.f32 %v5350_v42, %v1551_v14 }
 0x23d   : > { %v1556_v13 = vpop.f32.mrf.mxu0 }
 0x23e   : > { %v5498_v37 = vpack.c.bf16 %v2080_v2, %v2078_v9  ;;  %v2081_v30 = vmax.f32 %v1904_v38, 0.0  ;;  %v1557_v25 = vadd.f32 %v1556_v13, %v5321_v35  ;;  %v1908_v0 = vadd.f32 %v5358_v7, %v1555_v57  ;;  %v5512_v38 = vpop.f32.mrf.mxu1 }
 0x23f   : > { %v1558_v46 = vpop.f32.mrf.mxu0 }
 0x240   : > { %v1559_v33 = vadd.f32 %v1558_v46, %v5318_v60  ;;  %v5503_v39 = vpack.c.bf16 %v2081_v30, %v2079_v24  ;;  %v1910_v42 = vadd.f32 %v5369_v16, %v1557_v25  ;;  %v2082_v20 = vmax.f32 %v1908_v0, 0.0 }
 0x241   : > { %v1560_v22 = vpop.f32.mrf.mxu0 }
 0x242   : > { %v1561_v14 = vadd.f32 %v1560_v22, %v5321_v35  ;;  %v1912_v41 = vadd.f32 %v5377_v27, %v1559_v33  ;;  %v2083_v13 = vmax.f32 %v1910_v42, 0.0  ;;  %v5521_v22 = vpop.f32.mrf.mxu1 }
 0x243   : > { %v1564_v54 = vpop.f32.mrf.mxu0 }
 0x244   : > { %v2084_v9 = vmax.f32 %v1912_v41, 0.0  ;;  %v1565_v2 = vadd.f32 %v1564_v54, %v5318_v60  ;;  %v1914_v7 = vadd.f32 %v5387_v59, %v1561_v14 }
 0x245   : > { %v1566_v57 = vpop.f32.mrf.mxu0 }
 0x246   : > { %v5514_v24 = vpack.c.bf16 %v2084_v9, %v2082_v20  ;;  %v2085_v30 = vmax.f32 %v1914_v7, 0.0  ;;  %v1567_v16 = vadd.f32 %v1566_v57, %v5321_v35  ;;  %v1918_v46 = vadd.f32 %v5395_v15, %v1565_v2  ;;  %v5528_v7 = vpop.f32.mrf.mxu1 }
 0x247   : > { %v1568_v25 = vpop.f32.mrf.mxu0 }
 0x248   : > { %v1569_v27 = vadd.f32 %v1568_v25, %v5318_v60  ;;  %v5519_v0 = vpack.c.bf16 %v2085_v30, %v2083_v13  ;;  %v1920_v59 = vadd.f32 %v5405_v45, %v1567_v16  ;;  %v2086_v54 = vmax.f32 %v1918_v46, 0.0 }
 0x249   : > { %v1570_v33 = vpop.f32.mrf.mxu0 }
 0x24a   : > { %v1571_v14 = vadd.f32 %v1570_v33, %v5321_v35  ;;  %v1922_v42 = vadd.f32 %v5413_v51, %v1569_v27  ;;  %v2087_v57 = vmax.f32 %v1920_v59, 0.0  ;;  %v1959_v33 = vpop.f32.mrf.mxu1 }
 0x24b   : > { %v1574_v41 = vpop.f32.mrf.mxu0 }
 0x24c   : > { %v2088_v20 = vmax.f32 %v1922_v42, 0.0  ;;  %v1575_v9 = vadd.f32 %v1574_v41, %v5318_v60  ;;  %v1924_v15 = vadd.f32 %v5423_v55, %v1571_v14 }
 0x24d   : > { %v1576_v2 = vpop.f32.mrf.mxu0 }
 0x24e   : > { %v5530_v13 = vpack.c.bf16 %v2088_v20, %v2086_v54  ;;  %v2089_v30 = vmax.f32 %v1924_v15, 0.0  ;;  %v1577_v45 = vadd.f32 %v1576_v2, %v5321_v35  ;;  %v1928_v25 = vadd.f32 %v5431_v17, %v1575_v9  ;;  %v1961_v9 = vpop.f32.mrf.mxu1 }
 0x24f   : > { %v1578_v16 = vpop.f32.mrf.mxu0 }
 0x250   : > { %v1579_v51 = vadd.f32 %v1578_v16, %v5318_v60  ;;  %v5535_v46 = vpack.c.bf16 %v2089_v30, %v2087_v57  ;;  %v1930_v55 = vadd.f32 %v5441_v29, %v1577_v45  ;;  %v2090_v41 = vmax.f32 %v1928_v25, 0.0 }
 0x251   : > { %v1580_v27 = vpop.f32.mrf.mxu0 }
 0x252   : > { %v1581_v14 = vadd.f32 %v1580_v27, %v5321_v35  ;;  %v1932_v59 = vadd.f32 %v5448_v4, %v1579_v51  ;;  %v2091_v2 = vmax.f32 %v1930_v55, 0.0  ;;  %v1963_v27 = vpop.f32.mrf.mxu1 }
 0x253   : > { %v1584_v42 = vpop.f32.mrf.mxu0 }
 0x254   : > { %v2092_v54 = vmax.f32 %v1932_v59, 0.0  ;;  %v1585_v20 = vadd.f32 %v1584_v42, %v5318_v60  ;;  %v1934_v15 = vadd.f32 %v5457_v40, %v1581_v14 }
 0x255   : > { %v1586_v17 = vpop.f32.mrf.mxu0 }
 0x256   : > { %v5542_v57 = vpack.c.bf16 %v2092_v54, %v2090_v41  ;;  %v2093_v30 = vmax.f32 %v1934_v15, 0.0  ;;  %v1587_v16 = vadd.f32 %v1586_v17, %v5321_v35  ;;  %v1938_v45 = vadd.f32 %v5464_v50, %v1585_v20  ;;  %v1967_v20 = vpop.f32.mrf.mxu1 }
 0x257   : > { %v1588_v29 = vpop.f32.mrf.mxu0 }
 0x258   : > { %v1589_v4 = vadd.f32 %v1588_v29, %v5318_v60  ;;  %v5547_v51 = vpack.c.bf16 %v2093_v30, %v2091_v2  ;;  %v1940_v59 = vadd.f32 %v5473_v36, %v1587_v16  ;;  %v2094_v42 = vmax.f32 %v1938_v45, 0.0 }
 0x259   : > { %v1590_v25 = vpop.f32.mrf.mxu0 }
 0x25a   : > { %v1591_v40 = vadd.f32 %v1590_v25, %v5321_v35  ;;  %v1942_v55 = vadd.f32 %v5480_v32, %v1589_v4  ;;  %v2095_v17 = vmax.f32 %v1940_v59, 0.0  ;;  %v1969_v25 = vpop.f32.mrf.mxu1 }
 0x25b   : > { %v1594_v14 = vpop.f32.mrf.mxu0 }
 0x25c   : > { %v2096_v41 = vmax.f32 %v1942_v55, 0.0  ;;  %v1595_v54 = vadd.f32 %v1594_v14, %v5318_v60  ;;  %v1944_v15 = vadd.f32 %v5489_v63, %v1591_v40 }
 0x25d   : > { %v1596_v50 = vpop.f32.mrf.mxu0 }
 0x25e   : > { %v5554_v2 = vpack.c.bf16 %v2096_v41, %v2094_v42  ;;  %v2097_v30 = vmax.f32 %v1944_v15, 0.0  ;;  %v1597_v29 = vadd.f32 %v1596_v50, %v5321_v35  ;;  %v1948_v16 = vadd.f32 %v5496_v53, %v1595_v54  ;;  %v1971_v54 = vpop.f32.mrf.mxu1 }
 0x25f   : > { %v1598_v36 = vpop.f32.mrf.mxu0 }
 0x260   : > { %6447 = vst [vmem:[#allocation68_spill] sm:$0xff] %v5554_v2  ;;  %v1599_v32 = vadd.f32 %v1598_v36, %v5318_v60  ;;  %v5559_v4 = vpack.c.bf16 %v2097_v30, %v2095_v17  ;;  %v1950_v55 = vadd.f32 %v5505_v18, %v1597_v29  ;;  %v2098_v14 = vmax.f32 %v1948_v16, 0.0 }
 0x261   : > { %v1600_v45 = vpop.f32.mrf.mxu0 }
 0x262   : > { %v1601_v63 = vadd.f32 %v1600_v45, %v5321_v35  ;;  %v1952_v59 = vadd.f32 %v5512_v38, %v1599_v32  ;;  %v2099_v50 = vmax.f32 %v1950_v55, 0.0  ;;  %v1973_v45 = vpop.f32.mrf.mxu1 }
 0x263   : > { %v1604_v40 = vpop.f32.mrf.mxu0 }
 0x264   : > { %v2100_v42 = vmax.f32 %v1952_v59, 0.0  ;;  %v1605_v41 = vadd.f32 %v1604_v40, %v5318_v60  ;;  %v1954_v15 = vadd.f32 %v5521_v22, %v1601_v63 }
 0x265   : > { %v1606_v53 = vpop.f32.mrf.mxu0 }
 0x266   : > { %v5566_v17 = vpack.c.bf16 %v2100_v42, %v2098_v14  ;;  %v2101_v30 = vmax.f32 %v1954_v15, 0.0  ;;  %v1607_v36 = vadd.f32 %v1606_v53, %v5321_v35  ;;  %v1958_v29 = vadd.f32 %v5528_v7, %v1605_v41 }
 0x267   : > { %v1608_v18 = vpop.f32.mrf.mxu0 }
 0x268   : > { %6448 = vst [vmem:[#allocation69_spill] sm:$0xff] %v5566_v17  ;;  %v1609_v38 = vadd.f32 %v1608_v18, %v5318_v60  ;;  %v5571_v32 = vpack.c.bf16 %v2101_v30, %v2099_v50  ;;  %v1960_v59 = vadd.f32 %v1959_v33, %v1607_v36  ;;  %v2102_v55 = vmax.f32 %v1958_v29, 0.0  ;;  %v1977_v17 = vpop.f32.mrf.mxu1 }
 0x269   : > { %v1610_v16 = vpop.f32.mrf.mxu0 }
 0x26a   : > { %v1611_v22 = vadd.f32 %v1610_v16, %v5321_v35  ;;  %v1962_v63 = vadd.f32 %v1961_v9, %v1609_v38  ;;  %v2103_v2 = vmax.f32 %v1960_v59, 0.0  ;;  %v1979_v29 = vpop.f32.mrf.mxu1 }
 0x26b   : > { %v1614_v40 = vpop.f32.mrf.mxu0 }
 0x26c   : > { %v2104_v14 = vmax.f32 %v1962_v63, 0.0  ;;  %v1615_v42 = vadd.f32 %v1614_v40, %v5318_v60  ;;  %v1964_v15 = vadd.f32 %v1963_v27, %v1611_v22 }
 0x26d   : > { %v1616_v53 = vpop.f32.mrf.mxu0 }
 0x26e   : > { %v5575_v7 = vpack.c.bf16 %v2104_v14, %v2102_v55  ;;  %v2105_v41 = vmax.f32 %v1964_v15, 0.0  ;;  %v1617_v50 = vadd.f32 %v1616_v53, %v5321_v35  ;;  %v1968_v18 = vadd.f32 %v1967_v20, %v1615_v42  ;;  %v1981_v15 = vpop.f32.mrf.mxu1 }
 0x26f   : > { %v1618_v30 = vpop.f32.mrf.mxu0 }
 0x270   : > { %v1619_v33 = vadd.f32 %v1618_v30, %v5318_v60  ;;  %v5579_v36 = vpack.c.bf16 %v2105_v41, %v2103_v2  ;;  %v1970_v38 = vadd.f32 %v1969_v25, %v1617_v50  ;;  %v2106_v63 = vmax.f32 %v1968_v18, 0.0  ;;  %v1983_v18 = vpop.f32.mrf.mxu1 }
 0x271   : > { %v1620_v9 = vpop.f32.mrf.mxu0 }
 0x272   : > { %v1621_v16 = vadd.f32 %v1620_v9, %v5321_v35  ;;  %v1972_v27 = vadd.f32 %v1971_v54, %v1619_v33  ;;  %v2107_v53 = vmax.f32 %v1970_v38, 0.0  ;;  %v1315_v38 = vadd.f32 %v5097_v56, %v5318_v60 }
 0x273   : > { %v1624_v22 = vpop.f32.mrf.mxu0 }
 0x274   : > { %v2108_v59 = vmax.f32 %v1972_v27, 0.0  ;;  %v1625_v40 = vadd.f32 %v1624_v22, %v5318_v60  ;;  %v1974_v55 = vadd.f32 %v1973_v45, %v1621_v16 }
 0x275   : > { %v1626_v14 = vpop.f32.mrf.mxu0 }
 0x276   : > { %v5583_v20 = vpack.c.bf16 %v2108_v59, %v2106_v63  ;;  %v2109_v42 = vmax.f32 %v1974_v55, 0.0  ;;  %v1627_v2 = vadd.f32 %v1626_v14, %v5321_v35  ;;  %v1978_v30 = vadd.f32 %v1977_v17, %v1625_v40 }
 0x277   : > { %v1628_v41 = vpop.f32.mrf.mxu0  ;;  %v1317_v17 = vadd.f32 %v5101_v58, %v5321_v35  ;;  %v1319_v59 = vadd.f32 %v5105_v61, %v5318_v60  ;;  %v1325_v61 = vadd.f32 %v5116_v3, %v5318_v60 }
 0x278   : > { %v1629_v25 = vadd.f32 %v1628_v41, %v5318_v60  ;;  %v5587_v50 = vpack.c.bf16 %v2109_v42, %v2107_v53  ;;  %v1980_v33 = vadd.f32 %v1979_v29, %v1627_v2  ;;  %v2110_v27 = vmax.f32 %v1978_v30, 0.0 }
 0x279   : > { %v1630_v54 = vpop.f32.mrf.mxu0  ;;  %v1321_v42 = vadd.f32 %v5111_v1, %v5321_v35  ;;  %v1329_v1 = vadd.f32 %v5124_v8, %v5318_v60 }
 0x27a   : > { %v1631_v9 = vadd.f32 %v1630_v54, %v5321_v35  ;;  %v1982_v45 = vadd.f32 %v1981_v15, %v1629_v25  ;;  %v2111_v55 = vmax.f32 %v1980_v33, 0.0 }
 0x27b   : > { %v1667_v16 = vpop.f32.mrf.mxu0 }
 0x27c   : > { %v2112_v22 = vmax.f32 %v1982_v45, 0.0  ;;  %v1984_v63 = vadd.f32 %v1983_v18, %v1631_v9  ;;  %v1668_v29 = vadd.f32 %v1667_v16, %v1315_v38  ;;  %v1327_v38 = vadd.f32 %v5120_v5, %v5321_v35  ;;  %v6449_v5 = vld [vmem:[#allocation19_spill] sm:$0xff] }
 0x27d   : > { %v1669_v40 = vpop.f32.mrf.mxu0 }
 0x27e   : > { %v5596_v14 = vpack.c.bf16 %v2112_v22, %v2110_v27  ;;  %v2113_v53 = vmax.f32 %v1984_v63, 0.0  ;;  %v1670_v56 = vadd.f32 %v1669_v40, %v1317_v17  ;;  %v1986_v25 = vmax.f32 %v1668_v29, 0.0 }
 0x27f   : > { %v1671_v15 = vpop.f32.mrf.mxu0  ;;  %v1331_v17 = vadd.f32 %v5130_v12, %v5321_v35  ;;  %v6451_v12 = vld [vmem:[#allocation21_spill] sm:$0xff] }
 0x280   : > { %v1672_v2 = vadd.f32 %v1671_v15, %v1319_v59  ;;  %v5600_v41 = vpack.c.bf16 %v2113_v53, %v2111_v55  ;;  %v1987_v33 = vmax.f32 %v1670_v56, 0.0 }
 0x281   : > { %v1673_v30 = vpop.f32.mrf.mxu0 }
 0x282   : > { %v1988_v58 = vmax.f32 %v1672_v2, 0.0  ;;  %v1674_v54 = vadd.f32 %v1673_v30, %v1321_v42  ;;  %v1335_v42 = vadd.f32 %v6449_v5, %v5318_v60 }
 0x283   : > { %v1677_v18 = vpop.f32.mrf.mxu0 }
 0x284   : > { %v2114_v9 = vpack.c.bf16 %v1988_v58, %v1986_v25  ;;  %v1989_v45 = vmax.f32 %v1674_v54, 0.0  ;;  %v1678_v22 = vadd.f32 %v1677_v18, %v1325_v61  ;;  %v6450_v25 = vld [vmem:[#allocation20_spill] sm:$0xff]  ;;  %v1339_v54 = vadd.f32 %v6451_v12, %v5318_v60 }
 0x285   : > { %v1679_v16 = vpop.f32.mrf.mxu0  ;;  %v1337_v58 = vadd.f32 %v6450_v25, %v5321_v35  ;;  %v6456_v25 = vld [vmem:[#allocation26_spill] sm:$0xff] }
 0x286   : > { %v2115_v27 = vpack.c.bf16 %v1989_v45, %v1987_v33  ;;  %v1680_v59 = vadd.f32 %v1679_v16, %v1327_v38  ;;  %v1990_v55 = vmax.f32 %v1678_v22, 0.0 }
 0x287   : > { %v1681_v63 = vpop.f32.mrf.mxu0 }
 0x288   : > { %v1682_v40 = vadd.f32 %v1681_v63, %v1329_v1  ;;  %2345 = vmatprep.mubr.bf16.mxu1 %v2115_v27  ;;  %v1991_v56 = vmax.f32 %v1680_v59, 0.0  ;;  %v6453_v59 = vld [vmem:[#allocation23_spill] sm:$0xff] }
 0x289   : > { %v1683_v3 = vpop.f32.mrf.mxu0  ;;  %2346 = vmatmul.mubr.bf16.vlgmr.msra.gmra.mxu1 %v2114_v9  ;;  %v6452_v9 = vld [vmem:[#allocation22_spill] sm:$0xff] }
 0x28a   : > { %v1992_v29 = vmax.f32 %v1682_v40, 0.0  ;;  %v1684_v53 = vadd.f32 %v1683_v3, %v1331_v17  ;;  %v1341_v45 = vadd.f32 %v6452_v9, %v5321_v35  ;;  %v1345_v40 = vadd.f32 %v6453_v59, %v5318_v60 }
 0x28b   : > { %v1687_v15 = vpop.f32.mrf.mxu0 }
 0x28c   : > { %v2116_v8 = vpack.c.bf16 %v1992_v29, %v1990_v55  ;;  %v1993_v2 = vmax.f32 %v1684_v53, 0.0  ;;  %v1688_v61 = vadd.f32 %v1687_v15, %v1335_v42  ;;  %v6454_v15 = vld [vmem:[#allocation24_spill] sm:$0xff]  ;;  %v6455_v42 = vld [vmem:[#allocation25_spill] sm:$0xff] }
 0x28d   : > { %v1689_v30 = vpop.f32.mrf.mxu0  ;;  %v1347_v5 = vadd.f32 %v6454_v15, %v5321_v35  ;;  %v6460_v15 = vld [vmem:[#allocation30_spill] sm:$0xff] }
 0x28e   : > { %v2117_v18 = vpack.c.bf16 %v1993_v2, %v1991_v56  ;;  %v1690_v16 = vadd.f32 %v1689_v30, %v1337_v58  ;;  %v1994_v27 = vmax.f32 %v1688_v61, 0.0  ;;  %v1349_v56 = vadd.f32 %v6455_v42, %v5318_v60 }
 0x28f   : > { %v1691_v33 = vpop.f32.mrf.mxu0  ;;  %v1351_v58 = vadd.f32 %v6456_v25, %v5321_v35 }
 0x290   : > { %v1692_v38 = vadd.f32 %v1691_v33, %v1339_v54  ;;  %2353 = vmatprep.mubr.bf16.mxu1 %v2117_v18  ;;  %v1995_v3 = vmax.f32 %v1690_v16, 0.0  ;;  %v6457_v16 = vld [vmem:[#allocation27_spill] sm:$0xff] }
 0x291   : > { %v1693_v1 = vpop.f32.mrf.mxu0  ;;  %2354 = vmatmul.mubr.bf16.gmra.mxu1 %v2116_v8 }
 0x292   : > { %v1996_v22 = vmax.f32 %v1692_v38, 0.0  ;;  %v1694_v63 = vadd.f32 %v1693_v1, %v1341_v45  ;;  %v1355_v38 = vadd.f32 %v6457_v16, %v5318_v60 }
 0x293   : > { %v1697_v17 = vpop.f32.mrf.mxu0 }
 0x294   : > { %v2118_v55 = vpack.c.bf16 %v1996_v22, %v1994_v27  ;;  %v1997_v29 = vmax.f32 %v1694_v63, 0.0  ;;  %v1698_v30 = vadd.f32 %v1697_v17, %v1345_v40  ;;  %v6458_v17 = vld [vmem:[#allocation28_spill] sm:$0xff]  ;;  %v6459_v40 = vld [vmem:[#allocation29_spill] sm:$0xff] }
 0x295   : > { %v1699_v53 = vpop.f32.mrf.mxu0  ;;  %v1357_v59 = vadd.f32 %v6458_v17, %v5321_v35  ;;  %v6464_v17 = vld [vmem:[#allocation34_spill] sm:$0xff] }
 0x296   : > { %v2119_v2 = vpack.c.bf16 %v1997_v29, %v1995_v3  ;;  %v1700_v12 = vadd.f32 %v1699_v53, %v1347_v5  ;;  %v1998_v61 = vmax.f32 %v1698_v30, 0.0  ;;  %v1359_v3 = vadd.f32 %v6459_v40, %v5318_v60 }
 0x297   : > { %v1701_v8 = vpop.f32.mrf.mxu0  ;;  %v1361_v5 = vadd.f32 %v6460_v15, %v5321_v35 }
 0x298   : > { %v1702_v54 = vadd.f32 %v1701_v8, %v1349_v56  ;;  %2361 = vmatprep.mubr.bf16.mxu1 %v2119_v2  ;;  %v1999_v1 = vmax.f32 %v1700_v12, 0.0  ;;  %v6461_v12 = vld [vmem:[#allocation31_spill] sm:$0xff] }
 0x299   : > { %v1703_v18 = vpop.f32.mrf.mxu0  ;;  %2362 = vmatmul.mubr.bf16.gmra.mxu1 %v2118_v55 }
 0x29a   : > { %v2000_v33 = vmax.f32 %v1702_v54, 0.0  ;;  %v1704_v9 = vadd.f32 %v1703_v18, %v1351_v58  ;;  %v1365_v54 = vadd.f32 %v6461_v12, %v5318_v60 }
 0x29b   : > { %v1707_v45 = vpop.f32.mrf.mxu0 }
 0x29c   : > { %v2120_v27 = vpack.c.bf16 %v2000_v33, %v1998_v61  ;;  %v2001_v22 = vmax.f32 %v1704_v9, 0.0  ;;  %v1708_v53 = vadd.f32 %v1707_v45, %v1355_v38  ;;  %v6462_v45 = vld [vmem:[#allocation32_spill] sm:$0xff]  ;;  %v6463_v38 = vld [vmem:[#allocation33_spill] sm:$0xff] }
 0x29d   : > { %v1709_v63 = vpop.f32.mrf.mxu0  ;;  %v1367_v16 = vadd.f32 %v6462_v45, %v5321_v35  ;;  %v6468_v45 = vld [vmem:[#allocation38_spill] sm:$0xff] }
 0x29e   : > { %v2121_v29 = vpack.c.bf16 %v2001_v22, %v1999_v1  ;;  %v1710_v42 = vadd.f32 %v1709_v63, %v1357_v59  ;;  %v2002_v30 = vmax.f32 %v1708_v53, 0.0  ;;  %v1369_v1 = vadd.f32 %v6463_v38, %v5318_v60 }
 0x29f   : > { %v1711_v55 = vpop.f32.mrf.mxu0  ;;  %v1371_v59 = vadd.f32 %v6464_v17, %v5321_v35 }
 0x2a0   : > { %v1712_v56 = vadd.f32 %v1711_v55, %v1359_v3  ;;  %2369 = vmatprep.mubr.bf16.mxu1 %v2121_v29  ;;  %v2003_v18 = vmax.f32 %v1710_v42, 0.0  ;;  %v6465_v42 = vld [vmem:[#allocation35_spill] sm:$0xff] }
 0x2a1   : > { %v1713_v2 = vpop.f32.mrf.mxu0  ;;  %2370 = vmatmul.mubr.bf16.gmra.mxu1 %v2120_v27 }
 0x2a2   : > { %v2004_v8 = vmax.f32 %v1712_v56, 0.0  ;;  %v1714_v25 = vadd.f32 %v1713_v2, %v1361_v5  ;;  %v1375_v56 = vadd.f32 %v6465_v42, %v5318_v60 }
 0x2a3   : > { %v1717_v58 = vpop.f32.mrf.mxu0 }
 0x2a4   : > { %v2122_v61 = vpack.c.bf16 %v2004_v8, %v2002_v30  ;;  %v2005_v33 = vmax.f32 %v1714_v25, 0.0  ;;  %v1718_v63 = vadd.f32 %v1717_v58, %v1365_v54  ;;  %v6466_v58 = vld [vmem:[#allocation36_spill] sm:$0xff]  ;;  %v6467_v54 = vld [vmem:[#allocation37_spill] sm:$0xff] }
 0x2a5   : > { %v1719_v9 = vpop.f32.mrf.mxu0  ;;  %v1377_v12 = vadd.f32 %v6466_v58, %v5321_v35  ;;  %v6472_v58 = vld [vmem:[#allocation42_spill] sm:$0xff] }
 0x2a6   : > { %v2123_v22 = vpack.c.bf16 %v2005_v33, %v2003_v18  ;;  %v1720_v40 = vadd.f32 %v1719_v9, %v1367_v16  ;;  %v2006_v53 = vmax.f32 %v1718_v63, 0.0  ;;  %v1379_v18 = vadd.f32 %v6467_v54, %v5318_v60 }
 0x2a7   : > { %v1721_v27 = vpop.f32.mrf.mxu0  ;;  %v1381_v16 = vadd.f32 %v6468_v45, %v5321_v35 }
 0x2a8   : > { %v1722_v3 = vadd.f32 %v1721_v27, %v1369_v1  ;;  %2377 = vmatprep.mubr.bf16.mxu1 %v2123_v22  ;;  %v2007_v2 = vmax.f32 %v1720_v40, 0.0  ;;  %v6469_v40 = vld [vmem:[#allocation39_spill] sm:$0xff] }
 0x2a9   : > { %v1723_v29 = vpop.f32.mrf.mxu0  ;;  %2378 = vmatmul.mubr.bf16.gmra.mxu1 %v2122_v61 }
 0x2aa   : > { %v2008_v55 = vmax.f32 %v1722_v3, 0.0  ;;  %v1724_v15 = vadd.f32 %v1723_v29, %v1371_v59  ;;  %v1385_v3 = vadd.f32 %v6469_v40, %v5318_v60 }
 0x2ab   : > { %v1727_v5 = vpop.f32.mrf.mxu0 }
 0x2ac   : > { %v2124_v30 = vpack.c.bf16 %v2008_v55, %v2006_v53  ;;  %v2009_v8 = vmax.f32 %v1724_v15, 0.0  ;;  %v1728_v9 = vadd.f32 %v1727_v5, %v1375_v56  ;;  %v6470_v5 = vld [vmem:[#allocation40_spill] sm:$0xff]  ;;  %v6471_v56 = vld [vmem:[#allocation41_spill] sm:$0xff] }
 0x2ad   : > { %v1729_v25 = vpop.f32.mrf.mxu0  ;;  %v1387_v42 = vadd.f32 %v6470_v5, %v5321_v35  ;;  %v6476_v5 = vld [vmem:[#allocation46_spill] sm:$0xff] }
 0x2ae   : > { %v2125_v33 = vpack.c.bf16 %v2009_v8, %v2007_v2  ;;  %v1730_v38 = vadd.f32 %v1729_v25, %v1377_v12  ;;  %v2010_v63 = vmax.f32 %v1728_v9, 0.0  ;;  %v1389_v2 = vadd.f32 %v6471_v56, %v5318_v60 }
 0x2af   : > { %v1731_v61 = vpop.f32.mrf.mxu0  ;;  %v1391_v12 = vadd.f32 %v6472_v58, %v5321_v35 }
 0x2b0   : > { %v1732_v1 = vadd.f32 %v1731_v61, %v1379_v18  ;;  %2385 = vmatprep.mubr.bf16.mxu1 %v2125_v33  ;;  %v2011_v29 = vmax.f32 %v1730_v38, 0.0  ;;  %v6473_v38 = vld [vmem:[#allocation43_spill] sm:$0xff] }
 0x2b1   : > { %v1733_v22 = vpop.f32.mrf.mxu0  ;;  %2386 = vmatmul.mubr.bf16.gmra.mxu1 %v2124_v30 }
 0x2b2   : > { %v2012_v27 = vmax.f32 %v1732_v1, 0.0  ;;  %v1734_v17 = vadd.f32 %v1733_v22, %v1381_v16  ;;  %v1395_v1 = vadd.f32 %v6473_v38, %v5318_v60 }
 0x2b3   : > { %v1737_v59 = vpop.f32.mrf.mxu0 }
 0x2b4   : > { %v2126_v53 = vpack.c.bf16 %v2012_v27, %v2010_v63  ;;  %v2013_v55 = vmax.f32 %v1734_v17, 0.0  ;;  %v1738_v25 = vadd.f32 %v1737_v59, %v1385_v3  ;;  %v6474_v59 = vld [vmem:[#allocation44_spill] sm:$0xff]  ;;  %v6475_v3 = vld [vmem:[#allocation45_spill] sm:$0xff] }
 0x2b5   : > { %v1739_v15 = vpop.f32.mrf.mxu0  ;;  %v1397_v40 = vadd.f32 %v6474_v59, %v5321_v35  ;;  %v6480_v59 = vld [vmem:[#allocation50_spill] sm:$0xff] }
 0x2b6   : > { %v2127_v8 = vpack.c.bf16 %v2013_v55, %v2011_v29  ;;  %v1740_v54 = vadd.f32 %v1739_v15, %v1387_v42  ;;  %v2014_v9 = vmax.f32 %v1738_v25, 0.0  ;;  %v1399_v29 = vadd.f32 %v6475_v3, %v5318_v60 }
 0x2b7   : > { %v1741_v30 = vpop.f32.mrf.mxu0  ;;  %v1401_v42 = vadd.f32 %v6476_v5, %v5321_v35 }
 0x2b8   : > { %v1742_v18 = vadd.f32 %v1741_v30, %v1389_v2  ;;  %2393 = vmatprep.mubr.bf16.mxu1 %v2127_v8  ;;  %v2015_v22 = vmax.f32 %v1740_v54, 0.0  ;;  %v6477_v54 = vld [vmem:[#allocation47_spill] sm:$0xff] }
 0x2b9   : > { %v1743_v33 = vpop.f32.mrf.mxu0  ;;  %2394 = vmatmul.mubr.bf16.gmra.mxu1 %v2126_v53 }
 0x2ba   : > { %v2016_v61 = vmax.f32 %v1742_v18, 0.0  ;;  %v1744_v45 = vadd.f32 %v1743_v33, %v1391_v12  ;;  %v1405_v18 = vadd.f32 %v6477_v54, %v5318_v60 }
 0x2bb   : > { %v1747_v16 = vpop.f32.mrf.mxu0 }
 0x2bc   : > { %v2128_v63 = vpack.c.bf16 %v2016_v61, %v2014_v9  ;;  %v2017_v27 = vmax.f32 %v1744_v45, 0.0  ;;  %v1748_v15 = vadd.f32 %v1747_v16, %v1395_v1  ;;  %v6478_v16 = vld [vmem:[#allocation48_spill] sm:$0xff]  ;;  %v6479_v1 = vld [vmem:[#allocation49_spill] sm:$0xff] }
 0x2bd   : > { %v1749_v17 = vpop.f32.mrf.mxu0  ;;  %v1407_v38 = vadd.f32 %v6478_v16, %v5321_v35  ;;  %v6484_v16 = vld [vmem:[#allocation54_spill] sm:$0xff] }
 0x2be   : > { %v2129_v55 = vpack.c.bf16 %v2017_v27, %v2015_v22  ;;  %v1750_v56 = vadd.f32 %v1749_v17, %v1397_v40  ;;  %v2018_v25 = vmax.f32 %v1748_v15, 0.0  ;;  %v1409_v22 = vadd.f32 %v6479_v1, %v5318_v60 }
 0x2bf   : > { %v1751_v53 = vpop.f32.mrf.mxu0  ;;  %v1411_v40 = vadd.f32 %v6480_v59, %v5321_v35 }
 0x2c0   : > { %v1752_v2 = vadd.f32 %v1751_v53, %v1399_v29  ;;  %2401 = vmatprep.mubr.bf16.mxu1 %v2129_v55  ;;  %v2019_v33 = vmax.f32 %v1750_v56, 0.0  ;;  %v6481_v56 = vld [vmem:[#allocation51_spill] sm:$0xff] }
 0x2c1   : > { %v1753_v8 = vpop.f32.mrf.mxu0  ;;  %2402 = vmatmul.mubr.bf16.gmra.mxu1 %v2128_v63 }
 0x2c2   : > { %v2020_v30 = vmax.f32 %v1752_v2, 0.0  ;;  %v1754_v58 = vadd.f32 %v1753_v8, %v1401_v42  ;;  %v1415_v2 = vadd.f32 %v6481_v56, %v5318_v60 }
 0x2c3   : > { %v1757_v12 = vpop.f32.mrf.mxu0 }
 0x2c4   : > { %v2130_v9 = vpack.c.bf16 %v2020_v30, %v2018_v25  ;;  %v2021_v61 = vmax.f32 %v1754_v58, 0.0  ;;  %v1758_v17 = vadd.f32 %v1757_v12, %v1405_v18  ;;  %v6482_v12 = vld [vmem:[#allocation52_spill] sm:$0xff]  ;;  %v6483_v18 = vld [vmem:[#allocation53_spill] sm:$0xff] }
 0x2c5   : > { %v1759_v45 = vpop.f32.mrf.mxu0  ;;  %v1417_v54 = vadd.f32 %v6482_v12, %v5321_v35  ;;  %v6488_v12 = vld [vmem:[#allocation58_spill] sm:$0xff] }
 0x2c6   : > { %v2131_v27 = vpack.c.bf16 %v2021_v61, %v2019_v33  ;;  %v1760_v3 = vadd.f32 %v1759_v45, %v1407_v38  ;;  %v2022_v15 = vmax.f32 %v1758_v17, 0.0  ;;  %v1419_v33 = vadd.f32 %v6483_v18, %v5318_v60 }
 0x2c7   : > { %v1761_v63 = vpop.f32.mrf.mxu0  ;;  %v1421_v38 = vadd.f32 %v6484_v16, %v5321_v35 }
 0x2c8   : > { %v1762_v29 = vadd.f32 %v1761_v63, %v1409_v22  ;;  %2409 = vmatprep.mubr.bf16.mxu1 %v2131_v27  ;;  %v2023_v8 = vmax.f32 %v1760_v3, 0.0  ;;  %v6485_v3 = vld [vmem:[#allocation55_spill] sm:$0xff] }
 0x2c9   : > { %v1763_v55 = vpop.f32.mrf.mxu0  ;;  %2410 = vmatmul.mubr.bf16.gmra.mxu1 %v2130_v9 }
 0x2ca   : > { %v2024_v53 = vmax.f32 %v1762_v29, 0.0  ;;  %v1764_v5 = vadd.f32 %v1763_v55, %v1411_v40  ;;  %v1425_v29 = vadd.f32 %v6485_v3, %v5318_v60 }
 0x2cb   : > { %v1767_v42 = vpop.f32.mrf.mxu0 }
 0x2cc   : > { %v2132_v25 = vpack.c.bf16 %v2024_v53, %v2022_v15  ;;  %v2025_v30 = vmax.f32 %v1764_v5, 0.0  ;;  %v1768_v45 = vadd.f32 %v1767_v42, %v1415_v2  ;;  %v6486_v42 = vld [vmem:[#allocation56_spill] sm:$0xff]  ;;  %v6487_v2 = vld [vmem:[#allocation57_spill] sm:$0xff] }
 0x2cd   : > { %v1769_v58 = vpop.f32.mrf.mxu0  ;;  %v1427_v56 = vadd.f32 %v6486_v42, %v5321_v35  ;;  %v6492_v42 = vld [vmem:[#allocation62_spill] sm:$0xff] }
 0x2ce   : > { %v2133_v61 = vpack.c.bf16 %v2025_v30, %v2023_v8  ;;  %v1770_v1 = vadd.f32 %v1769_v58, %v1417_v54  ;;  %v2026_v17 = vmax.f32 %v1768_v45, 0.0  ;;  %v1429_v8 = vadd.f32 %v6487_v2, %v5318_v60 }
 0x2cf   : > { %v1771_v9 = vpop.f32.mrf.mxu0  ;;  %v1431_v54 = vadd.f32 %v6488_v12, %v5321_v35 }
 0x2d0   : > { %v1772_v22 = vadd.f32 %v1771_v9, %v1419_v33  ;;  %2417 = vmatprep.mubr.bf16.mxu1 %v2133_v61  ;;  %v2027_v55 = vmax.f32 %v1770_v1, 0.0  ;;  %v6489_v1 = vld [vmem:[#allocation59_spill] sm:$0xff] }
 0x2d1   : > { %v1773_v27 = vpop.f32.mrf.mxu0  ;;  %2418 = vmatmul.mubr.bf16.gmra.mxu1 %v2132_v25 }
 0x2d2   : > { %v2028_v63 = vmax.f32 %v1772_v22, 0.0  ;;  %v1774_v59 = vadd.f32 %v1773_v27, %v1421_v38  ;;  %v1435_v22 = vadd.f32 %v6489_v1, %v5318_v60 }
 0x2d3   : > { %v1777_v40 = vpop.f32.mrf.mxu0 }
 0x2d4   : > { %v2134_v15 = vpack.c.bf16 %v2028_v63, %v2026_v17  ;;  %v2029_v53 = vmax.f32 %v1774_v59, 0.0  ;;  %v1778_v58 = vadd.f32 %v1777_v40, %v1425_v29  ;;  %v6490_v40 = vld [vmem:[#allocation60_spill] sm:$0xff]  ;;  %v6491_v29 = vld [vmem:[#allocation61_spill] sm:$0xff] }
 0x2d5   : > { %v1779_v5 = vpop.f32.mrf.mxu0  ;;  %v1437_v3 = vadd.f32 %v6490_v40, %v5321_v35  ;;  %v6496_v40 = vld [vmem:[#allocation66_spill] sm:$0xff] }
 0x2d6   : > { %v2135_v30 = vpack.c.bf16 %v2029_v53, %v2027_v55  ;;  %v1780_v18 = vadd.f32 %v1779_v5, %v1427_v56  ;;  %v2030_v45 = vmax.f32 %v1778_v58, 0.0  ;;  %v1439_v55 = vadd.f32 %v6491_v29, %v5318_v60 }
 0x2d7   : > { %v1781_v25 = vpop.f32.mrf.mxu0  ;;  %v1441_v56 = vadd.f32 %v6492_v42, %v5321_v35 }
 0x2d8   : > { %v1782_v33 = vadd.f32 %v1781_v25, %v1429_v8  ;;  %2425 = vmatprep.mubr.bf16.mxu1 %v2135_v30  ;;  %v2031_v27 = vmax.f32 %v1780_v18, 0.0  ;;  %v6493_v18 = vld [vmem:[#allocation63_spill] sm:$0xff] }
 0x2d9   : > { %v1783_v61 = vpop.f32.mrf.mxu0  ;;  %2426 = vmatmul.mubr.bf16.gmra.mxu1 %v2134_v15 }
 0x2da   : > { %v2032_v9 = vmax.f32 %v1782_v33, 0.0  ;;  %v1784_v16 = vadd.f32 %v1783_v61, %v1431_v54  ;;  %v1445_v33 = vadd.f32 %v6493_v18, %v5318_v60 }
 0x2db   : > { %v1787_v38 = vpop.f32.mrf.mxu0 }
 0x2dc   : > { %v2136_v17 = vpack.c.bf16 %v2032_v9, %v2030_v45  ;;  %v2033_v63 = vmax.f32 %v1784_v16, 0.0  ;;  %v1788_v5 = vadd.f32 %v1787_v38, %v1435_v22  ;;  %v6494_v38 = vld [vmem:[#allocation64_spill] sm:$0xff]  ;;  %v6495_v22 = vld [vmem:[#allocation65_spill] sm:$0xff] }
 0x2dd   : > { %v1789_v59 = vpop.f32.mrf.mxu0  ;;  %v1447_v1 = vadd.f32 %v6494_v38, %v5321_v35 }
 0x2de   : > { %v2137_v53 = vpack.c.bf16 %v2033_v63, %v2031_v27  ;;  %v1790_v2 = vadd.f32 %v1789_v59, %v1437_v3  ;;  %v2034_v58 = vmax.f32 %v1788_v5, 0.0  ;;  %v1449_v27 = vadd.f32 %v6495_v22, %v5318_v60  ;;  %v6497_v60 = vld [vmem:[#allocation67_spill] sm:$0xff] }
 0x2df   : > { %v1791_v15 = vpop.f32.mrf.mxu0  ;;  %v1451_v3 = vadd.f32 %v6496_v40, %v5321_v35  ;;  %v5728_v35 = vld [vmem:[#allocation10] ss:$0 sm:$0xff] }
 0x2e0   : > { %v1792_v8 = vadd.f32 %v1791_v15, %v1439_v55  ;;  %2433 = vmatprep.mubr.bf16.mxu1 %v2137_v53  ;;  %v2035_v61 = vmax.f32 %v1790_v2, 0.0 }
 0x2e1   : > { %v1793_v30 = vpop.f32.mrf.mxu0  ;;  %2434 = vmatmul.mubr.bf16.gmra.mxu1 %v2136_v17 }
 0x2e2   : > { %v2036_v25 = vmax.f32 %v1792_v8, 0.0  ;;  %v1794_v12 = vadd.f32 %v1793_v30, %v1441_v56 }
 0x2e3   : > { %v1797_v54 = vpop.f32.mrf.mxu0 }
 0x2e4   : > { %v2138_v45 = vpack.c.bf16 %v2036_v25, %v2034_v58  ;;  %v2037_v9 = vmax.f32 %v1794_v12, 0.0  ;;  %v1798_v59 = vadd.f32 %v1797_v54, %v1445_v33 }
 0x2e5   : > { %v1799_v16 = vpop.f32.mrf.mxu0 }
 0x2e6   : > { %v2139_v63 = vpack.c.bf16 %v2037_v9, %v2035_v61  ;;  %v1800_v29 = vadd.f32 %v1799_v16, %v1447_v1  ;;  %v2038_v5 = vmax.f32 %v1798_v59, 0.0 }
 0x2e7   : > { %v1801_v17 = vpop.f32.mrf.mxu0 }
 0x2e8   : > { %v1802_v55 = vadd.f32 %v1801_v17, %v1449_v27  ;;  %2441 = vmatprep.mubr.bf16.mxu1 %v2139_v63  ;;  %v2039_v56 = vmax.f32 %v1800_v29, 0.0 }
 0x2e9   : > { %v1803_v53 = vpop.f32.mrf.mxu0  ;;  %2442 = vmatmul.mubr.bf16.gmra.mxu1 %v2138_v45  ;;  %v6499_v45 = vld [vmem:[#allocation69_spill] sm:$0xff] }
 0x2ea   : > { %v2040_v15 = vmax.f32 %v1802_v55, 0.0  ;;  %v1804_v42 = vadd.f32 %v1803_v53, %v1451_v3 }
 0x2ec   : > { %v2140_v2 = vpack.c.bf16 %v2040_v15, %v2038_v5  ;;  %v2041_v8 = vmax.f32 %v1804_v42, 0.0 }
 0x2ee   : > { %v2141_v30 = vpack.c.bf16 %v2041_v8, %v2039_v56 }
 0x2f0   : > { %2449 = vmatprep.mubr.bf16.mxu1 %v2141_v30 }
 0x2f1   : > { %2450 = vmatmul.mubr.bf16.gmra.mxu1 %v2140_v2 }
 0x2f2   : > { %2457 = vmatprep.mubr.bf16.mxu1 %v5348_v31 }
 0x2f9   : > { %2458 = vmatmul.mubr.bf16.gmra.mxu1 %v6497_v60 }
 0x2fa   : > { %2465 = vmatprep.mubr.bf16.mxu1 %v5367_v23 }
 0x301   : > { %2466 = vmatmul.mubr.bf16.gmra.mxu1 %v5361_v6 }
 0x302   : > { %2473 = vmatprep.mubr.bf16.mxu1 %v5385_v21 }
 0x309   : > { %2474 = vmatmul.mubr.bf16.gmra.mxu1 %v5379_v48 }
 0x30a   : > { %2481 = vmatprep.mubr.bf16.mxu1 %v5403_v43 }
 0x311   : > { %2482 = vmatmul.mubr.bf16.gmra.mxu1 %v5397_v26 }
 0x312   : > { %2489 = vmatprep.mubr.bf16.mxu1 %v5421_v34 }
 0x319   : > { %2490 = vmatmul.mubr.bf16.gmra.mxu1 %v5415_v44 }
 0x31a   : > { %2497 = vmatprep.mubr.bf16.mxu1 %v5439_v52 }
 0x321   : > { %2498 = vmatmul.mubr.bf16.gmra.mxu1 %v5433_v11 }
 0x322   : > { %2505 = vmatprep.mubr.bf16.mxu1 %v5455_v10 }
 0x329   : > { %2506 = vmatmul.mubr.bf16.gmra.mxu1 %v5450_v28 }
 0x32a   : > { %2513 = vmatprep.mubr.bf16.mxu1 %v5471_v49 }
 0x331   : > { %2514 = vmatmul.mubr.bf16.gmra.mxu1 %v5466_v19 }
 0x332   : > { %2521 = vmatprep.mubr.bf16.mxu1 %v5487_v47 }
 0x339   : > { %2522 = vmatmul.mubr.bf16.gmra.mxu1 %v5482_v62 }
 0x33a   : > { %2529 = vmatprep.mubr.bf16.mxu1 %v5503_v39 }
 0x341   : > { %2530 = vmatmul.mubr.bf16.gmra.mxu1 %v5498_v37 }
 0x342   : > { %2537 = vmatprep.mubr.bf16.mxu1 %v5519_v0 }
 0x349   : > { %v2347_v31 = vpop.f32.mrf.mxu1  ;;  %2538 = vmatmul.mubr.bf16.gmra.mxu1 %v5514_v24 }
 0x34a   : > { %v5732_v6 = vadd.f32 %v5728_v35, %v2347_v31  ;;  %2545 = vmatprep.mubr.bf16.mxu1 %v5535_v46 }
 0x34b   : > { %v2349_v23 = vpop.f32.mrf.mxu1 }
 0x34c   : > { %2602 = vst [vmem:[%s5735_s29] sm:$0xff] %v5732_v6  ;;  %v2666_v48 = vmul.f32 %v5732_v6, %v5732_v6 }
 0x34d   : > { %v2350_v21 = vpop.f32.mrf.mxu1 }
 0x34e   : > { %v5742_v26 = vadd.f32 %v5728_v35, %v2350_v21  ;;  %2730 = vadd.xlane.f32.xlu0 %v2666_v48 }
 0x34f   : > { %v2352_v43 = vpop.f32.mrf.mxu1 }
 0x350   : > { %2603 = vst [vmem:[%s5735_s29 + $0x8] sm:$0xff] %v5742_v26  ;;  %v2667_v44 = vmul.f32 %v5742_v26, %v5742_v26 }
 0x351   : > { %v2355_v34 = vpop.f32.mrf.mxu1  ;;  %2546 = vmatmul.mubr.bf16.gmra.mxu1 %v5530_v13 }
 0x352   : > { %v5750_v11 = vadd.f32 %v5728_v35, %v2355_v34  ;;  %2553 = vmatprep.mubr.bf16.mxu1 %v5547_v51  ;;  %2732 = vadd.xlane.f32.xlu0 %v2667_v44 }
 0x353   : > { %v2357_v52 = vpop.f32.mrf.mxu1 }
 0x354   : > { %2604 = vst [vmem:[%s5735_s29 + $0x10] sm:$0xff] %v5750_v11  ;;  %v2668_v28 = vmul.f32 %v5750_v11, %v5750_v11 }
 0x355   : > { %v2358_v10 = vpop.f32.mrf.mxu1 }
 0x356   : > { %v5758_v19 = vadd.f32 %v5728_v35, %v2358_v10  ;;  %2734 = vadd.xlane.f32.xlu1 %v2668_v28 }
 0x357   : > { %v2360_v49 = vpop.f32.mrf.mxu1 }
 0x358   : > { %2605 = vst [vmem:[%s5735_s29 + $0x18] sm:$0xff] %v5758_v19  ;;  %v2669_v62 = vmul.f32 %v5758_v19, %v5758_v19 }
 0x359   : > { %v2363_v47 = vpop.f32.mrf.mxu1  ;;  %2554 = vmatmul.mubr.bf16.gmra.mxu1 %v5542_v57 }
 0x35a   : > { %v5766_v37 = vadd.f32 %v5728_v35, %v2363_v47  ;;  %2561 = vmatprep.mubr.bf16.mxu1 %v5559_v4  ;;  %2736 = vadd.xlane.f32.xlu1 %v2669_v62  ;;  %v6498_v4 = vld [vmem:[#allocation68_spill] sm:$0xff] }
 0x35b   : > { %v2365_v39 = vpop.f32.mrf.mxu1 }
 0x35c   : > { %2606 = vst [vmem:[%s5735_s29 + $0x20] sm:$0xff] %v5766_v37  ;;  %v2670_v24 = vmul.f32 %v5766_v37, %v5766_v37 }
 0x35d   : > { %v2366_v0 = vpop.f32.mrf.mxu1 }
 0x35e   : > { %v5774_v13 = vadd.f32 %v5728_v35, %v2366_v0  ;;  %2738 = vadd.xlane.f32.xlu0 %v2670_v24 }
 0x35f   : > { %v2368_v46 = vpop.f32.mrf.mxu1 }
 0x360   : > { %2607 = vst [vmem:[%s5735_s29 + $0x28] sm:$0xff] %v5774_v13  ;;  %v2671_v57 = vmul.f32 %v5774_v13, %v5774_v13 }
 0x361   : > { %v2371_v51 = vpop.f32.mrf.mxu1  ;;  %2562 = vmatmul.mubr.bf16.gmra.mxu1 %v6498_v4 }
 0x362   : > { %v5782_v58 = vadd.f32 %v5728_v35, %v2371_v51  ;;  %2569 = vmatprep.mubr.bf16.mxu1 %v5571_v32  ;;  %2740 = vadd.xlane.f32.xlu1 %v2671_v57 }
 0x363   : > { %v2373_v25 = vpop.f32.mrf.mxu1 }
 0x364   : > { %2608 = vst [vmem:[%s5735_s29 + $0x30] sm:$0xff] %v5782_v58  ;;  %v2672_v12 = vmul.f32 %v5782_v58, %v5782_v58 }
 0x365   : > { %v2374_v54 = vpop.f32.mrf.mxu1 }
 0x366   : > { %v5790_v18 = vadd.f32 %v5728_v35, %v2374_v54  ;;  %2742 = vadd.xlane.f32.xlu0 %v2672_v12 }
 0x367   : > { %v2376_v33 = vpop.f32.mrf.mxu1 }
 0x368   : > { %2609 = vst [vmem:[%s5735_s29 + $0x38] sm:$0xff] %v5790_v18  ;;  %v2673_v32 = vmul.f32 %v5790_v18, %v5790_v18 }
 0x369   : > { %v2379_v61 = vpop.f32.mrf.mxu1  ;;  %2570 = vmatmul.mubr.bf16.gmra.mxu1 %v6499_v45 }
 0x36a   : > { %v5798_v9 = vadd.f32 %v5728_v35, %v2379_v61  ;;  %2577 = vmatprep.mubr.bf16.mxu1 %v5579_v36  ;;  %2744 = vadd.xlane.f32.xlu1 %v2673_v32 }
 0x36b   : > { %v2381_v16 = vpop.f32.mrf.mxu1 }
 0x36c   : > { %2610 = vst [vmem:[%s5735_s29 + $0x40] sm:$0xff] %v5798_v9  ;;  %v2674_v38 = vmul.f32 %v5798_v9, %v5798_v9 }
 0x36d   : > { %v2382_v1 = vpop.f32.mrf.mxu1 }
 0x36e   : > { %v5806_v22 = vadd.f32 %v5728_v35, %v2382_v1  ;;  %2746 = vadd.xlane.f32.xlu0 %v2674_v38 }
 0x36f   : > { %v2384_v27 = vpop.f32.mrf.mxu1 }
 0x370   : > { %2611 = vst [vmem:[%s5735_s29 + $0x48] sm:$0xff] %v5806_v22  ;;  %v2675_v36 = vmul.f32 %v5806_v22, %v5806_v22 }
 0x371   : > { %v2387_v63 = vpop.f32.mrf.mxu1  ;;  %2578 = vmatmul.mubr.bf16.gmra.mxu1 %v5575_v7 }
 0x372   : > { %v5814_v59 = vadd.f32 %v5728_v35, %v2387_v63  ;;  %2585 = vmatprep.mubr.bf16.mxu1 %v5587_v50  ;;  %2748 = vadd.xlane.f32.xlu1 %v2675_v36 }
 0x373   : > { %v2389_v17 = vpop.f32.mrf.mxu1 }
 0x374   : > { %2612 = vst [vmem:[%s5735_s29 + $0x50] sm:$0xff] %v5814_v59  ;;  %v2676_v40 = vmul.f32 %v5814_v59, %v5814_v59 }
 0x375   : > { %v2390_v3 = vpop.f32.mrf.mxu1 }
 0x376   : > { %v5822_v29 = vadd.f32 %v5728_v35, %v2390_v3  ;;  %2750 = vadd.xlane.f32.xlu0 %v2676_v40 }
 0x377   : > { %v2392_v7 = vpop.f32.mrf.mxu1 }
 0x378   : > { %2613 = vst [vmem:[%s5735_s29 + $0x58] sm:$0xff] %v5822_v29  ;;  %v2677_v50 = vmul.f32 %v5822_v29, %v5822_v29 }
 0x379   : > { %v2395_v55 = vpop.f32.mrf.mxu1  ;;  %2586 = vmatmul.mubr.bf16.gmra.mxu1 %v5583_v20 }
 0x37a   : > { %v5830_v53 = vadd.f32 %v5728_v35, %v2395_v55  ;;  %2593 = vmatprep.mubr.bf16.mxu1 %v5600_v41  ;;  %2752 = vadd.xlane.f32.xlu1 %v2677_v50 }
 0x37b   : > { %v2397_v5 = vpop.f32.mrf.mxu1 }
 0x37c   : > { %2614 = vst [vmem:[%s5735_s29 + $0x60] sm:$0xff] %v5830_v53  ;;  %v2678_v15 = vmul.f32 %v5830_v53, %v5830_v53 }
 0x37d   : > { %v2398_v42 = vpop.f32.mrf.mxu1 }
 0x37e   : > { %v5838_v56 = vadd.f32 %v5728_v35, %v2398_v42  ;;  %2754 = vadd.xlane.f32.xlu0 %v2678_v15 }
 0x37f   : > { %v2400_v20 = vpop.f32.mrf.mxu1 }
 0x380   : > { %2615 = vst [vmem:[%s5735_s29 + $0x68] sm:$0xff] %v5838_v56  ;;  %v2679_v41 = vmul.f32 %v5838_v56, %v5838_v56 }
 0x381   : > { %v2403_v2 = vpop.f32.mrf.mxu1  ;;  %2594 = vmatmul.mubr.bf16.gmra.mxu1 %v5596_v14 }
 0x382   : > { %v5846_v8 = vadd.f32 %v5728_v35, %v2403_v2  ;;  %2756 = vadd.xlane.f32.xlu1 %v2679_v41 }
 0x383   : > { %v2405_v30 = vpop.f32.mrf.mxu1 }
 0x384   : > { %2616 = vst [vmem:[%s5735_s29 + $0x70] sm:$0xff] %v5846_v8  ;;  %v2680_v60 = vmul.f32 %v5846_v8, %v5846_v8 }
 0x385   : > { %v2406_v31 = vpop.f32.mrf.mxu1 }
 0x386   : > { %v5853_v23 = vadd.f32 %v5728_v35, %v2406_v31  ;;  %2758 = vadd.xlane.f32.xlu0 %v2680_v60 }
 0x387   : > { %v2408_v48 = vpop.f32.mrf.mxu1 }
 0x388   : > { %2617 = vst [vmem:[%s5735_s29 + $0x78] sm:$0xff] %v5853_v23  ;;  %v2681_v14 = vmul.f32 %v5853_v23, %v5853_v23 }
 0x389   : > { %v2411_v21 = vpop.f32.mrf.mxu1 }
 0x38a   : > { %v5860_v43 = vadd.f32 %v5728_v35, %v2411_v21  ;;  %2760 = vadd.xlane.f32.xlu1 %v2681_v14 }
 0x38b   : > { %v2413_v44 = vpop.f32.mrf.mxu1 }
 0x38c   : > { %2618 = vst [vmem:[%s5735_s29 + $0x80] sm:$0xff] %v5860_v43  ;;  %v2682_v34 = vmul.f32 %v5860_v43, %v5860_v43 }
 0x38d   : > { %v2414_v52 = vpop.f32.mrf.mxu1 }
 0x38e   : > { %v5867_v28 = vadd.f32 %v5728_v35, %v2414_v52  ;;  %2762 = vadd.xlane.f32.xlu0 %v2682_v34 }
 0x38f   : > { %v2416_v10 = vpop.f32.mrf.mxu1 }
 0x390   : > { %2619 = vst [vmem:[%s5735_s29 + $0x88] sm:$0xff] %v5867_v28  ;;  %v2683_v49 = vmul.f32 %v5867_v28, %v5867_v28 }
 0x391   : > { %v2419_v62 = vpop.f32.mrf.mxu1 }
 0x392   : > { %v5874_v47 = vadd.f32 %v5728_v35, %v2419_v62  ;;  %2764 = vadd.xlane.f32.xlu1 %v2683_v49 }
 0x393   : > { %v2421_v39 = vpop.f32.mrf.mxu1 }
 0x394   : > { %2620 = vst [vmem:[%s5735_s29 + $0x90] sm:$0xff] %v5874_v47  ;;  %v2684_v24 = vmul.f32 %v5874_v47, %v5874_v47 }
 0x395   : > { %v2422_v0 = vpop.f32.mrf.mxu1 }
 0x396   : > { %v5881_v46 = vadd.f32 %v5728_v35, %v2422_v0  ;;  %2766 = vadd.xlane.f32.xlu0 %v2684_v24 }
 0x397   : > { %v2424_v57 = vpop.f32.mrf.mxu1 }
 0x398   : > { %2621 = vst [vmem:[%s5735_s29 + $0x98] sm:$0xff] %v5881_v46  ;;  %v2685_v51 = vmul.f32 %v5881_v46, %v5881_v46 }
 0x399   : > { %v2427_v4 = vpop.f32.mrf.mxu1 }
 0x39a   : > { %v5888_v25 = vadd.f32 %v5728_v35, %v2427_v4  ;;  %2768 = vadd.xlane.f32.xlu1 %v2685_v51 }
 0x39b   : > { %v2429_v12 = vpop.f32.mrf.mxu1 }
 0x39c   : > { %2622 = vst [vmem:[%s5735_s29 + $0xa0] sm:$0xff] %v5888_v25  ;;  %v2686_v54 = vmul.f32 %v5888_v25, %v5888_v25 }
 0x39d   : > { %v2430_v33 = vpop.f32.mrf.mxu1 }
 0x39e   : > { %v5895_v32 = vadd.f32 %v5728_v35, %v2430_v33  ;;  %2770 = vadd.xlane.f32.xlu0 %v2686_v54 }
 0x39f   : > { %v2432_v61 = vpop.f32.mrf.mxu1 }
 0x3a0   : > { %2623 = vst [vmem:[%s5735_s29 + $0xa8] sm:$0xff] %v5895_v32  ;;  %v2687_v45 = vmul.f32 %v5895_v32, %v5895_v32 }
 0x3a1   : > { %v2435_v16 = vpop.f32.mrf.mxu1 }
 0x3a2   : > { %v5902_v38 = vadd.f32 %v5728_v35, %v2435_v16  ;;  %2772 = vadd.xlane.f32.xlu1 %v2687_v45 }
 0x3a3   : > { %v2437_v1 = vpop.f32.mrf.mxu1 }
 0x3a4   : > { %2624 = vst [vmem:[%s5735_s29 + $0xb0] sm:$0xff] %v5902_v38  ;;  %v2688_v27 = vmul.f32 %v5902_v38, %v5902_v38 }
 0x3a5   : > { %v2438_v36 = vpop.f32.mrf.mxu1 }
 0x3a6   : > { %v5909_v63 = vadd.f32 %v5728_v35, %v2438_v36  ;;  %2774 = vadd.xlane.f32.xlu0 %v2688_v27 }
 0x3a7   : > { %v2440_v17 = vpop.f32.mrf.mxu1 }
 0x3a8   : > { %2625 = vst [vmem:[%s5735_s29 + $0xb8] sm:$0xff] %v5909_v63  ;;  %v2689_v40 = vmul.f32 %v5909_v63, %v5909_v63 }
 0x3a9   : > { %v2443_v3 = vpop.f32.mrf.mxu1 }
 0x3aa   : > { %v5916_v7 = vadd.f32 %v5728_v35, %v2443_v3  ;;  %2776 = vadd.xlane.f32.xlu1 %v2689_v40 }
 0x3ab   : > { %v2445_v50 = vpop.f32.mrf.mxu1 }
 0x3ac   : > { %2626 = vst [vmem:[%s5735_s29 + $0xc0] sm:$0xff] %v5916_v7  ;;  %v2690_v55 = vmul.f32 %v5916_v7, %v5916_v7 }
 0x3ad   : > { %v2446_v5 = vpop.f32.mrf.mxu1 }
 0x3ae   : > { %v5923_v15 = vadd.f32 %v5728_v35, %v2446_v5  ;;  %2778 = vadd.xlane.f32.xlu0 %v2690_v55 }
 0x3af   : > { %v2448_v42 = vpop.f32.mrf.mxu1 }
 0x3b0   : > { %2627 = vst [vmem:[%s5735_s29 + $0xc8] sm:$0xff] %v5923_v15  ;;  %v2691_v20 = vmul.f32 %v5923_v15, %v5923_v15 }
 0x3b1   : > { %v2451_v41 = vpop.f32.mrf.mxu1 }
 0x3b2   : > { %v5930_v2 = vadd.f32 %v5728_v35, %v2451_v41  ;;  %2780 = vadd.xlane.f32.xlu1 %v2691_v20 }
 0x3b3   : > { %v2453_v30 = vpop.f32.mrf.mxu1 }
 0x3b4   : > { %2628 = vst [vmem:[%s5735_s29 + $0xd0] sm:$0xff] %v5930_v2  ;;  %v2692_v60 = vmul.f32 %v5930_v2, %v5930_v2 }
 0x3b5   : > { %v2454_v31 = vpop.f32.mrf.mxu1 }
 0x3b6   : > { %v5937_v48 = vadd.f32 %v5728_v35, %v2454_v31  ;;  %2782 = vadd.xlane.f32.xlu0 %v2692_v60 }
 0x3b7   : > { %v2456_v14 = vpop.f32.mrf.mxu1 }
 0x3b8   : > { %2629 = vst [vmem:[%s5735_s29 + $0xd8] sm:$0xff] %v5937_v48  ;;  %v2693_v21 = vmul.f32 %v5937_v48, %v5937_v48 }
 0x3b9   : > { %v2459_v44 = vpop.f32.mrf.mxu1 }
 0x3ba   : > { %v5944_v34 = vadd.f32 %v5728_v35, %v2459_v44  ;;  %2784 = vadd.xlane.f32.xlu1 %v2693_v21 }
 0x3bb   : > { %v2461_v52 = vpop.f32.mrf.mxu1 }
 0x3bc   : > { %2630 = vst [vmem:[%s5735_s29 + $0xe0] sm:$0xff] %v5944_v34  ;;  %v2694_v10 = vmul.f32 %v5944_v34, %v5944_v34 }
 0x3bd   : > { %v2462_v49 = vpop.f32.mrf.mxu1 }
 0x3be   : > { %v5951_v62 = vadd.f32 %v5728_v35, %v2462_v49  ;;  %2786 = vadd.xlane.f32.xlu0 %v2694_v10 }
 0x3bf   : > { %v2464_v39 = vpop.f32.mrf.mxu1 }
 0x3c0   : > { %2631 = vst [vmem:[%s5735_s29 + $0xe8] sm:$0xff] %v5951_v62  ;;  %v2695_v24 = vmul.f32 %v5951_v62, %v5951_v62 }
 0x3c1   : > { %v2467_v0 = vpop.f32.mrf.mxu1 }
 0x3c2   : > { %v5958_v57 = vadd.f32 %v5728_v35, %v2467_v0  ;;  %2788 = vadd.xlane.f32.xlu1 %v2695_v24 }
 0x3c3   : > { %v2469_v51 = vpop.f32.mrf.mxu1 }
 0x3c4   : > { %2632 = vst [vmem:[%s5735_s29 + $0xf0] sm:$0xff] %v5958_v57  ;;  %v2696_v4 = vmul.f32 %v5958_v57, %v5958_v57 }
 0x3c5   : > { %v2470_v12 = vpop.f32.mrf.mxu1 }
 0x3c6   : > { %v5965_v54 = vadd.f32 %v5728_v35, %v2470_v12  ;;  %2790 = vadd.xlane.f32.xlu0 %v2696_v4 }
 0x3c7   : > { %v2472_v33 = vpop.f32.mrf.mxu1 }
 0x3c8   : > { %2633 = vst [vmem:[%s5735_s29 + $0xf8] sm:$0xff] %v5965_v54  ;;  %v2697_v61 = vmul.f32 %v5965_v54, %v5965_v54 }
 0x3c9   : > { %v2475_v45 = vpop.f32.mrf.mxu1 }
 0x3ca   : > { %v5972_v16 = vadd.f32 %v5728_v35, %v2475_v45  ;;  %2792 = vadd.xlane.f32.xlu1 %v2697_v61 }
 0x3cb   : > { %v2477_v1 = vpop.f32.mrf.mxu1 }
 0x3cc   : > { %2634 = vst [vmem:[%s5735_s29 + $0x100] sm:$0xff] %v5972_v16  ;;  %v2698_v27 = vmul.f32 %v5972_v16, %v5972_v16 }
 0x3cd   : > { %v2478_v36 = vpop.f32.mrf.mxu1 }
 0x3ce   : > { %v5979_v17 = vadd.f32 %v5728_v35, %v2478_v36  ;;  %2794 = vadd.xlane.f32.xlu0 %v2698_v27 }
 0x3cf   : > { %v2480_v40 = vpop.f32.mrf.mxu1 }
 0x3d0   : > { %2635 = vst [vmem:[%s5735_s29 + $0x108] sm:$0xff] %v5979_v17  ;;  %v2699_v3 = vmul.f32 %v5979_v17, %v5979_v17 }
 0x3d1   : > { %v2483_v50 = vpop.f32.mrf.mxu1 }
 0x3d2   : > { %v5986_v55 = vadd.f32 %v5728_v35, %v2483_v50  ;;  %2796 = vadd.xlane.f32.xlu1 %v2699_v3 }
 0x3d3   : > { %v2485_v5 = vpop.f32.mrf.mxu1 }
 0x3d4   : > { %2636 = vst [vmem:[%s5735_s29 + $0x110] sm:$0xff] %v5986_v55  ;;  %v2700_v42 = vmul.f32 %v5986_v55, %v5986_v55 }
 0x3d5   : > { %v2486_v20 = vpop.f32.mrf.mxu1 }
 0x3d6   : > { %v5993_v41 = vadd.f32 %v5728_v35, %v2486_v20  ;;  %2798 = vadd.xlane.f32.xlu0 %v2700_v42 }
 0x3d7   : > { %v2488_v30 = vpop.f32.mrf.mxu1  ;;  %v2731_v60 = vpop.xlane.xlu0 %2730 }
 0x3d8   : > { %2637 = vst [vmem:[%s5735_s29 + $0x118] sm:$0xff] %v5993_v41  ;;  %v2858_v31 = vmax.f32 %v2731_v60, 1e-24  ;;  %v2701_v14 = vmul.f32 %v5993_v41, %v5993_v41 }
 0x3d9   : > { %v2491_v21 = vpop.f32.mrf.mxu1 }
 0x3da   : > { %v6000_v44 = vadd.f32 %v5728_v35, %v2491_v21  ;;  %2800 = vadd.xlane.f32.xlu1 %v2701_v14  ;;  %4393 = vrsqrt.f32 %v2858_v31 }
 0x3db   : > { %v2493_v52 = vpop.f32.mrf.mxu1  ;;  %v2733_v10 = vpop.xlane.xlu0 %2732 }
 0x3dc   : > { %2638 = vst [vmem:[%s5735_s29 + $0x120] sm:$0xff] %v6000_v44  ;;  %v2859_v49 = vmax.f32 %v2733_v10, 1e-24  ;;  %v2702_v39 = vmul.f32 %v6000_v44, %v6000_v44 }
 0x3dd   : > { %v2494_v24 = vpop.f32.mrf.mxu1 }
 0x3de   : > { %4395 = vrsqrt.f32 %v2859_v49  ;;  %v6007_v0 = vadd.f32 %v5728_v35, %v2494_v24  ;;  %2802 = vadd.xlane.f32.xlu0 %v2702_v39 }
 0x3df   : > { %v2496_v51 = vpop.f32.mrf.mxu1  ;;  %v2735_v4 = vpop.xlane.xlu1 %2734 }
 0x3e0   : > { %2639 = vst [vmem:[%s5735_s29 + $0x128] sm:$0xff] %v6007_v0  ;;  %v2860_v12 = vmax.f32 %v2735_v4, 1e-24  ;;  %v2703_v33 = vmul.f32 %v6007_v0, %v6007_v0 }
 0x3e1   : > { %v2499_v61 = vpop.f32.mrf.mxu1 }
 0x3e2   : > { %v6014_v45 = vadd.f32 %v5728_v35, %v2499_v61  ;;  %2804 = vadd.xlane.f32.xlu1 %v2703_v33  ;;  %4397 = vrsqrt.f32 %v2860_v12 }
 0x3e3   : > { %v2501_v1 = vpop.f32.mrf.mxu1  ;;  %v2737_v27 = vpop.xlane.xlu1 %2736 }
 0x3e4   : > { %2640 = vst [vmem:[%s5735_s29 + $0x130] sm:$0xff] %v6014_v45  ;;  %v2861_v36 = vmax.f32 %v2737_v27, 1e-24  ;;  %v2704_v40 = vmul.f32 %v6014_v45, %v6014_v45 }
 0x3e5   : > { %v2502_v3 = vpop.f32.mrf.mxu1 }
 0x3e6   : > { %4399 = vrsqrt.f32 %v2861_v36  ;;  %v6021_v50 = vadd.f32 %v5728_v35, %v2502_v3  ;;  %2806 = vadd.xlane.f32.xlu0 %v2704_v40 }
 0x3e7   : > { %v2504_v5 = vpop.f32.mrf.mxu1  ;;  %v2739_v42 = vpop.xlane.xlu0 %2738 }
 0x3e8   : > { %2641 = vst [vmem:[%s5735_s29 + $0x138] sm:$0xff] %v6021_v50  ;;  %v2862_v20 = vmax.f32 %v2739_v42, 1e-24  ;;  %v2705_v30 = vmul.f32 %v6021_v50, %v6021_v50  ;;  %v4394_v60 = vpop.eup %4393 }
 0x3e9   : > { %v2507_v31 = vpop.f32.mrf.mxu1  ;;  %v2986_v49 = vmul.f32 %v4394_v60, %v5732_v6 }
 0x3ea   : > { %v6029_v14 = vadd.f32 %v5728_v35, %v2507_v31  ;;  %2808 = vadd.xlane.f32.xlu1 %v2705_v30  ;;  %4401 = vrsqrt.f32 %v2862_v20 }
 0x3eb   : > { %v4396_v21 = vpop.eup %4395  ;;  %v2509_v52 = vpop.f32.mrf.mxu1 }
 0x3ec   : > { %v2741_v10 = vpop.xlane.xlu1 %2740  ;;  %v2987_v39 = vmul.f32 %v4396_v21, %v5742_v26  ;;  %2642 = vst [vmem:[%s5735_s29 + $0x140] sm:$0xff] %v6029_v14  ;;  %v2706_v51 = vmul.f32 %v6029_v14, %v6029_v14 }
 0x3ed   : > { %v2863_v24 = vmax.f32 %v2741_v10, 1e-24  ;;  %v2510_v4 = vpop.f32.mrf.mxu1 }
 0x3ee   : > { %v3867_v12 = vpack.c.bf16 %v2987_v39, %v2986_v49  ;;  %v6038_v33 = vadd.f32 %v5728_v35, %v2510_v4  ;;  %2810 = vadd.xlane.f32.xlu0 %v2706_v51 }
 0x3ef   : > { %4403 = vrsqrt.f32 %v2863_v24  ;;  %v2512_v61 = vpop.f32.mrf.mxu1  ;;  %v2743_v1 = vpop.xlane.xlu0 %2742 }
 0x3f0   : > { %3868 = vst [vmem:[%s6040_s12] sm:$0xff] %v3867_v12   ;;  %2643 = vst [vmem:[%s5735_s29 + $0x148] sm:$0xff] %v6038_v33  ;;  %v2864_v6 = vmax.f32 %v2743_v1, 1e-24  ;;  %v2707_v26 = vmul.f32 %v6038_v33, %v6038_v33  ;;  %v4398_v27 = vpop.eup %4397 }
 0x3f1   : > { %v2515_v36 = vpop.f32.mrf.mxu1  ;;  %v2988_v20 = vmul.f32 %v4398_v27, %v5750_v11 }
 0x3f2   : > { %v6048_v40 = vadd.f32 %v5728_v35, %v2515_v36  ;;  %2812 = vadd.xlane.f32.xlu1 %v2707_v26  ;;  %4405 = vrsqrt.f32 %v2864_v6 }
 0x3f3   : > { %v4400_v3 = vpop.eup %4399  ;;  %v2517_v5 = vpop.f32.mrf.mxu1 }
 0x3f4   : > { %v2745_v42 = vpop.xlane.xlu1 %2744  ;;  %v2989_v30 = vmul.f32 %v4400_v3, %v5758_v19  ;;  %2644 = vst [vmem:[%s5735_s29 + $0x150] sm:$0xff] %v6048_v40  ;;  %v2708_v31 = vmul.f32 %v6048_v40, %v6048_v40 }
 0x3f5   : > { %v2865_v60 = vmax.f32 %v2745_v42, 1e-24  ;;  %v2518_v21 = vpop.f32.mrf.mxu1 }
 0x3f6   : > { %v3872_v52 = vpack.c.bf16 %v2989_v30, %v2988_v20  ;;  %v6057_v10 = vadd.f32 %v5728_v35, %v2518_v21  ;;  %2814 = vadd.xlane.f32.xlu0 %v2708_v31 }
 0x3f7   : > { %4407 = vrsqrt.f32 %v2865_v60  ;;  %v2520_v49 = vpop.f32.mrf.mxu1  ;;  %v2747_v39 = vpop.xlane.xlu0 %2746 }
 0x3f8   : > { %v4402_v24 = vpop.eup %4401  ;;  %4024 = vst [vmem:[%s6040_s12 + $0x8] sm:$0xff] %v3872_v52   ;;  %2645 = vst [vmem:[%s5735_s29 + $0x158] sm:$0xff] %v6057_v10  ;;  %v2866_v11 = vmax.f32 %v2747_v39, 1e-24  ;;  %v2709_v19 = vmul.f32 %v6057_v10, %v6057_v10 }
 0x3f9   : > { %v2523_v51 = vpop.f32.mrf.mxu1  ;;  %v2990_v61 = vmul.f32 %v4402_v24, %v5766_v37 }
 0x3fa   : > { %v6065_v4 = vadd.f32 %v5728_v35, %v2523_v51  ;;  %2816 = vadd.xlane.f32.xlu1 %v2709_v19  ;;  %4409 = vrsqrt.f32 %v2866_v11 }
 0x3fb   : > { %v2525_v1 = vpop.f32.mrf.mxu1  ;;  %v2749_v6 = vpop.xlane.xlu1 %2748 }
 0x3fc   : > { %v4404_v12 = vpop.eup %4403  ;;  %2646 = vst [vmem:[%s5735_s29 + $0x160] sm:$0xff] %v6065_v4  ;;  %v2867_v27 = vmax.f32 %v2749_v6, 1e-24  ;;  %v2710_v36 = vmul.f32 %v6065_v4, %v6065_v4 }
 0x3fd   : > { %v2991_v26 = vmul.f32 %v4404_v12, %v5774_v13  ;;  %v2526_v3 = vpop.f32.mrf.mxu1 }
 0x3fe   : > { %4411 = vrsqrt.f32 %v2867_v27  ;;  %v6074_v42 = vadd.f32 %v5728_v35, %v2526_v3  ;;  %2818 = vadd.xlane.f32.xlu0 %v2710_v36 }
 0x3ff   : > { %v3877_v5 = vpack.c.bf16 %v2991_v26, %v2990_v61  ;;  %v2528_v37 = vpop.f32.mrf.mxu1  ;;  %v2751_v20 = vpop.xlane.xlu0 %2750 }
 0x400   : > { %v4406_v30 = vpop.eup %4405  ;;  %2647 = vst [vmem:[%s5735_s29 + $0x168] sm:$0xff] %v6074_v42  ;;  %v2868_v13 = vmax.f32 %v2751_v20, 1e-24  ;;  %v2711_v60 = vmul.f32 %v6074_v42, %v6074_v42 }
 0x401   : > { %4025 = vst [vmem:[%s6040_s12 + $0x10] sm:$0xff] %v3877_v5   ;;  %v2531_v31 = vpop.f32.mrf.mxu1  ;;  %v2992_v49 = vmul.f32 %v4406_v30, %v5782_v58 }
 0x402   : > { %v6082_v21 = vadd.f32 %v5728_v35, %v2531_v31  ;;  %2820 = vadd.xlane.f32.xlu1 %v2711_v60  ;;  %4413 = vrsqrt.f32 %v2868_v13 }
 0x403   : > { %v2533_v39 = vpop.f32.mrf.mxu1  ;;  %v2753_v24 = vpop.xlane.xlu1 %2752 }
 0x404   : > { %v4408_v52 = vpop.eup %4407  ;;  %2648 = vst [vmem:[%s5735_s29 + $0x170] sm:$0xff] %v6082_v21  ;;  %v2869_v19 = vmax.f32 %v2753_v24, 1e-24  ;;  %v2712_v51 = vmul.f32 %v6082_v21, %v6082_v21 }
 0x405   : > { %v2993_v11 = vmul.f32 %v4408_v52, %v5790_v18  ;;  %v2534_v12 = vpop.f32.mrf.mxu1 }
 0x406   : > { %4415 = vrsqrt.f32 %v2869_v19  ;;  %v6091_v1 = vadd.f32 %v5728_v35, %v2534_v12  ;;  %2822 = vadd.xlane.f32.xlu0 %v2712_v51 }
 0x407   : > { %v3882_v61 = vpack.c.bf16 %v2993_v11, %v2992_v49  ;;  %v2536_v58 = vpop.f32.mrf.mxu1  ;;  %v2755_v6 = vpop.xlane.xlu0 %2754 }
 0x408   : > { %2649 = vst [vmem:[%s5735_s29 + $0x178] sm:$0xff] %v6091_v1  ;;  %v2870_v18 = vmax.f32 %v2755_v6, 1e-24  ;;  %v2713_v26 = vmul.f32 %v6091_v1, %v6091_v1  ;;  %v4410_v27 = vpop.eup %4409 }
 0x409   : > { %4026 = vst [vmem:[%s6040_s12 + $0x18] sm:$0xff] %v3882_v61   ;;  %v2539_v36 = vpop.f32.mrf.mxu1  ;;  %v2994_v30 = vmul.f32 %v4410_v27, %v5798_v9 }
 0x40a   : > { %v6099_v3 = vadd.f32 %v5728_v35, %v2539_v36  ;;  %2824 = vadd.xlane.f32.xlu1 %v2713_v26  ;;  %4417 = vrsqrt.f32 %v2870_v18 }
 0x40b   : > { %v4412_v5 = vpop.eup %4411  ;;  %v2541_v37 = vpop.f32.mrf.mxu1 }
 0x40c   : > { %v2757_v20 = vpop.xlane.xlu1 %2756  ;;  %v2995_v13 = vmul.f32 %v4412_v5, %v5806_v22  ;;  %2650 = vst [vmem:[%s5735_s29 + $0x180] sm:$0xff] %v6099_v3  ;;  %v2714_v31 = vmul.f32 %v6099_v3, %v6099_v3 }
 0x40d   : > { %v2871_v60 = vmax.f32 %v2757_v20, 1e-24  ;;  %v2542_v52 = vpop.f32.mrf.mxu1 }
 0x40e   : > { %v3887_v49 = vpack.c.bf16 %v2995_v13, %v2994_v30  ;;  %v6108_v39 = vadd.f32 %v5728_v35, %v2542_v52  ;;  %2826 = vadd.xlane.f32.xlu0 %v2714_v31 }
 0x40f   : > { %4419 = vrsqrt.f32 %v2871_v60  ;;  %v2544_v24 = vpop.f32.mrf.mxu1  ;;  %v2759_v11 = vpop.xlane.xlu0 %2758 }
 0x410   : > { %4027 = vst [vmem:[%s6040_s12 + $0x20] sm:$0xff] %v3887_v49   ;;  %2651 = vst [vmem:[%s5735_s29 + $0x188] sm:$0xff] %v6108_v39  ;;  %v2872_v9 = vmax.f32 %v2759_v11, 1e-24  ;;  %v2715_v22 = vmul.f32 %v6108_v39, %v6108_v39  ;;  %v4414_v19 = vpop.eup %4413 }
 0x411   : > { %v2547_v51 = vpop.f32.mrf.mxu1  ;;  %v2996_v18 = vmul.f32 %v4414_v19, %v5814_v59 }
 0x412   : > { %v6116_v12 = vadd.f32 %v5728_v35, %v2547_v51  ;;  %2828 = vadd.xlane.f32.xlu1 %v2715_v22  ;;  %4421 = vrsqrt.f32 %v2872_v9 }
 0x413   : > { %v4416_v61 = vpop.eup %4415  ;;  %v2549_v58 = vpop.f32.mrf.mxu1 }
 0x414   : > { %v2761_v6 = vpop.xlane.xlu1 %2760  ;;  %v2997_v26 = vmul.f32 %v4416_v61, %v5822_v29  ;;  %2652 = vst [vmem:[%s5735_s29 + $0x190] sm:$0xff] %v6116_v12  ;;  %v2716_v36 = vmul.f32 %v6116_v12, %v6116_v12 }
 0x415   : > { %v2873_v27 = vmax.f32 %v2761_v6, 1e-24  ;;  %v2550_v5 = vpop.f32.mrf.mxu1 }
 0x416   : > { %v3892_v37 = vpack.c.bf16 %v2997_v26, %v2996_v18  ;;  %v6125_v20 = vadd.f32 %v5728_v35, %v2550_v5  ;;  %2830 = vadd.xlane.f32.xlu0 %v2716_v36 }
 0x417   : > { %4423 = vrsqrt.f32 %v2873_v27  ;;  %v2552_v30 = vpop.f32.mrf.mxu1  ;;  %v2763_v13 = vpop.xlane.xlu0 %2762 }
 0x418   : > { %v4418_v60 = vpop.eup %4417  ;;  %4028 = vst [vmem:[%s6040_s12 + $0x28] sm:$0xff] %v3892_v37   ;;  %2653 = vst [vmem:[%s5735_s29 + $0x198] sm:$0xff] %v6125_v20  ;;  %v2874_v59 = vmax.f32 %v2763_v13, 1e-24  ;;  %v2717_v29 = vmul.f32 %v6125_v20, %v6125_v20 }
 0x419   : > { %v2555_v31 = vpop.f32.mrf.mxu1  ;;  %v2998_v24 = vmul.f32 %v4418_v60, %v5830_v53 }
 0x41a   : > { %v6133_v52 = vadd.f32 %v5728_v35, %v2555_v31  ;;  %2832 = vadd.xlane.f32.xlu1 %v2717_v29  ;;  %4425 = vrsqrt.f32 %v2874_v59 }
 0x41b   : > { %v2557_v11 = vpop.f32.mrf.mxu1  ;;  %v2765_v9 = vpop.xlane.xlu1 %2764 }
 0x41c   : > { %v4420_v49 = vpop.eup %4419  ;;  %2654 = vst [vmem:[%s5735_s29 + $0x1a0] sm:$0xff] %v6133_v52  ;;  %v2875_v19 = vmax.f32 %v2765_v9, 1e-24  ;;  %v2718_v51 = vmul.f32 %v6133_v52, %v6133_v52 }
 0x41d   : > { %v2999_v22 = vmul.f32 %v4420_v49, %v5838_v56  ;;  %v2558_v61 = vpop.f32.mrf.mxu1 }
 0x41e   : > { %4427 = vrsqrt.f32 %v2875_v19  ;;  %v6142_v6 = vadd.f32 %v5728_v35, %v2558_v61  ;;  %2834 = vadd.xlane.f32.xlu0 %v2718_v51 }
 0x41f   : > { %v3897_v58 = vpack.c.bf16 %v2999_v22, %v2998_v24  ;;  %v2560_v53 = vpop.f32.mrf.mxu1  ;;  %v2767_v18 = vpop.xlane.xlu0 %2766 }
 0x420   : > { %v4422_v26 = vpop.eup %4421  ;;  %2655 = vst [vmem:[%s5735_s29 + $0x1a8] sm:$0xff] %v6142_v6  ;;  %v2876_v56 = vmax.f32 %v2767_v18, 1e-24  ;;  %v2719_v27 = vmul.f32 %v6142_v6, %v6142_v6 }
 0x421   : > { %4029 = vst [vmem:[%s6040_s12 + $0x30] sm:$0xff] %v3897_v58   ;;  %v2563_v36 = vpop.f32.mrf.mxu1  ;;  %v3000_v30 = vmul.f32 %v4422_v26, %v5846_v8 }
 0x422   : > { %v6150_v5 = vadd.f32 %v5728_v35, %v2563_v36  ;;  %2836 = vadd.xlane.f32.xlu1 %v2719_v27  ;;  %4429 = vrsqrt.f32 %v2876_v56 }
 0x423   : > { %v2565_v13 = vpop.f32.mrf.mxu1  ;;  %v2769_v60 = vpop.xlane.xlu1 %2768 }
 0x424   : > { %v4424_v37 = vpop.eup %4423  ;;  %2656 = vst [vmem:[%s5735_s29 + $0x1b0] sm:$0xff] %v6150_v5  ;;  %v2877_v29 = vmax.f32 %v2769_v60, 1e-24  ;;  %v2720_v31 = vmul.f32 %v6150_v5, %v6150_v5 }
 0x425   : > { %v3001_v59 = vmul.f32 %v4424_v37, %v5853_v23  ;;  %v2566_v49 = vpop.f32.mrf.mxu1 }
 0x426   : > { %4431 = vrsqrt.f32 %v2877_v29  ;;  %v6159_v11 = vadd.f32 %v5728_v35, %v2566_v49  ;;  %2838 = vadd.xlane.f32.xlu0 %v2720_v31 }
 0x427   : > { %v3902_v24 = vpack.c.bf16 %v3001_v59, %v3000_v30  ;;  %v2568_v8 = vpop.f32.mrf.mxu1  ;;  %v2771_v9 = vpop.xlane.xlu0 %2770 }
 0x428   : > { %2657 = vst [vmem:[%s5735_s29 + $0x1b8] sm:$0xff] %v6159_v11  ;;  %v2878_v23 = vmax.f32 %v2771_v9, 1e-24  ;;  %v2721_v22 = vmul.f32 %v6159_v11, %v6159_v11  ;;  %v4426_v19 = vpop.eup %4425 }
 0x429   : > { %4030 = vst [vmem:[%s6040_s12 + $0x38] sm:$0xff] %v3902_v24   ;;  %v2571_v51 = vpop.f32.mrf.mxu1  ;;  %v3002_v26 = vmul.f32 %v4426_v19, %v5860_v43 }
 0x42a   : > { %v6167_v61 = vadd.f32 %v5728_v35, %v2571_v51  ;;  %2840 = vadd.xlane.f32.xlu1 %v2721_v22  ;;  %4433 = vrsqrt.f32 %v2878_v23 }
 0x42b   : > { %v4428_v58 = vpop.eup %4427  ;;  %v2573_v53 = vpop.f32.mrf.mxu1 }
 0x42c   : > { %v2773_v18 = vpop.xlane.xlu1 %2772  ;;  %v3003_v56 = vmul.f32 %v4428_v58, %v5867_v28  ;;  %2658 = vst [vmem:[%s5735_s29 + $0x1c0] sm:$0xff] %v6167_v61  ;;  %v2722_v36 = vmul.f32 %v6167_v61, %v6167_v61 }
 0x42d   : > { %v2879_v27 = vmax.f32 %v2773_v18, 1e-24  ;;  %v2574_v37 = vpop.f32.mrf.mxu1 }
 0x42e   : > { %v3907_v30 = vpack.c.bf16 %v3003_v56, %v3002_v26  ;;  %v6176_v13 = vadd.f32 %v5728_v35, %v2574_v37  ;;  %2842 = vadd.xlane.f32.xlu0 %v2722_v36  ;;  %v4521_v37 = vld [vmem:[#allocation10] ss:$0 sm:$0xff] }
 0x42f   : > { %4435 = vrsqrt.f32 %v2879_v27  ;;  %v2576_v60 = vpop.f32.mrf.mxu1  ;;  %v2775_v59 = vpop.xlane.xlu0 %2774 }
 0x430   : > { %4031 = vst [vmem:[%s6040_s12 + $0x40] sm:$0xff] %v3907_v30   ;;  %2659 = vst [vmem:[%s5735_s29 + $0x1c8] sm:$0xff] %v6176_v13  ;;  %v2880_v43 = vmax.f32 %v2775_v59, 1e-24  ;;  %v2723_v28 = vmul.f32 %v6176_v13, %v6176_v13  ;;  %v4430_v29 = vpop.eup %4429 }
 0x431   : > { %v2579_v31 = vpop.f32.mrf.mxu1  ;;  %v3004_v23 = vmul.f32 %v4430_v29, %v5874_v47 }
 0x432   : > { %v6184_v49 = vadd.f32 %v5728_v35, %v2579_v31  ;;  %2844 = vadd.xlane.f32.xlu1 %v2723_v28  ;;  %4437 = vrsqrt.f32 %v2880_v43 }
 0x433   : > { %v4432_v24 = vpop.eup %4431  ;;  %v2581_v8 = vpop.f32.mrf.mxu1 }
 0x434   : > { %v2777_v9 = vpop.xlane.xlu1 %2776  ;;  %v3005_v22 = vmul.f32 %v4432_v24, %v5881_v46  ;;  %2660 = vst [vmem:[%s5735_s29 + $0x1d0] sm:$0xff] %v6184_v49  ;;  %v2724_v51 = vmul.f32 %v6184_v49, %v6184_v49 }
 0x435   : > { %v2881_v19 = vmax.f32 %v2777_v9, 1e-24  ;;  %v2582_v58 = vpop.f32.mrf.mxu1 }
 0x436   : > { %v3912_v53 = vpack.c.bf16 %v3005_v22, %v3004_v23  ;;  %v6193_v18 = vadd.f32 %v5728_v35, %v2582_v58  ;;  %2846 = vadd.xlane.f32.xlu0 %v2724_v51 }
 0x437   : > { %4439 = vrsqrt.f32 %v2881_v19  ;;  %v2584_v26 = vpop.f32.mrf.mxu1  ;;  %v2779_v56 = vpop.xlane.xlu0 %2778 }
 0x438   : > { %v4434_v27 = vpop.eup %4433  ;;  %4032 = vst [vmem:[%s6040_s12 + $0x48] sm:$0xff] %v3912_v53   ;;  %2661 = vst [vmem:[%s5735_s29 + $0x1d8] sm:$0xff] %v6193_v18  ;;  %v2882_v47 = vmax.f32 %v2779_v56, 1e-24  ;;  %v2725_v46 = vmul.f32 %v6193_v18, %v6193_v18 }
 0x439   : > { %v2587_v36 = vpop.f32.mrf.mxu1  ;;  %v3006_v35 = vmul.f32 %v4434_v27, %v5888_v25 }
 0x43a   : > { %v6200_v30 = vadd.f32 %v4521_v37, %v2587_v36  ;;  %2848 = vadd.xlane.f32.xlu1 %v2725_v46  ;;  %4441 = vrsqrt.f32 %v2882_v47 }
 0x43b   : > { %v2589_v59 = vpop.f32.mrf.mxu1  ;;  %v2781_v43 = vpop.xlane.xlu1 %2780 }
 0x43c   : > { %v4436_v60 = vpop.eup %4435  ;;  %2662 = vst [vmem:[%s5735_s29 + $0x1e0] sm:$0xff] %v6200_v30  ;;  %v2883_v29 = vmax.f32 %v2781_v43, 1e-24  ;;  %v2726_v31 = vmul.f32 %v6200_v30, %v6200_v30 }
 0x43d   : > { %v3007_v28 = vmul.f32 %v4436_v60, %v5895_v32  ;;  %v2590_v24 = vpop.f32.mrf.mxu1 }
 0x43e   : > { %4443 = vrsqrt.f32 %v2883_v29  ;;  %v6208_v9 = vadd.f32 %v4521_v37, %v2590_v24  ;;  %2850 = vadd.xlane.f32.xlu0 %v2726_v31 }
 0x43f   : > { %v3917_v8 = vpack.c.bf16 %v3007_v28, %v3006_v35  ;;  %v2592_v25 = vpop.f32.mrf.mxu1  ;;  %v2783_v23 = vpop.xlane.xlu0 %2782 }
 0x440   : > { %v4438_v22 = vpop.eup %4437  ;;  %2663 = vst [vmem:[%s5735_s29 + $0x1e8] sm:$0xff] %v6208_v9  ;;  %v2884_v32 = vmax.f32 %v2783_v23, 1e-24  ;;  %v2727_v19 = vmul.f32 %v6208_v9, %v6208_v9 }
 0x441   : > { %4033 = vst [vmem:[%s6040_s12 + $0x50] sm:$0xff] %v3917_v8   ;;  %v2595_v51 = vpop.f32.mrf.mxu1  ;;  %v3008_v26 = vmul.f32 %v4438_v22, %v5902_v38 }
 0x442   : > { %v6215_v58 = vadd.f32 %v4521_v37, %v2595_v51  ;;  %2852 = vadd.xlane.f32.xlu1 %v2727_v19  ;;  %4445 = vrsqrt.f32 %v2884_v32 }
 0x443   : > { %v2597_v56 = vpop.f32.mrf.mxu1  ;;  %v2785_v27 = vpop.xlane.xlu1 %2784 }
 0x444   : > { %v4440_v53 = vpop.eup %4439  ;;  %2664 = vst [vmem:[%s5735_s29 + $0x1f0] sm:$0xff] %v6215_v58  ;;  %v2885_v46 = vmax.f32 %v2785_v27, 1e-24  ;;  %v2728_v36 = vmul.f32 %v6215_v58, %v6215_v58 }
 0x445   : > { %v3009_v47 = vmul.f32 %v4440_v53, %v5909_v63  ;;  %v2598_v60 = vpop.f32.mrf.mxu1 }
 0x446   : > { %4447 = vrsqrt.f32 %v2885_v46  ;;  %v6223_v59 = vadd.f32 %v4521_v37, %v2598_v60  ;;  %2854 = vadd.xlane.f32.xlu0 %v2728_v36 }
 0x447   : > { %v3922_v35 = vpack.c.bf16 %v3009_v47, %v3008_v26  ;;  %v2600_v43 = vpop.f32.mrf.mxu1  ;;  %v2787_v38 = vpop.xlane.xlu0 %2786 }
 0x448   : > { %2665 = vst [vmem:[%s5735_s29 + $0x1f8] sm:$0xff] %v6223_v59  ;;  %v2886_v63 = vmax.f32 %v2787_v38, 1e-24  ;;  %v2729_v28 = vmul.f32 %v6223_v59, %v6223_v59  ;;  %v4442_v29 = vpop.eup %4441 }
 0x449   : > { %4034 = vst [vmem:[%s6040_s12 + $0x58] sm:$0xff] %v3922_v35   ;;  %v3010_v8 = vmul.f32 %v4442_v29, %v5916_v7 }
 0x44a   : > { %2856 = vadd.xlane.f32.xlu1 %v2729_v28  ;;  %4449 = vrsqrt.f32 %v2886_v63 }
 0x44b   : > { %v4444_v31 = vpop.eup %4443  ;;  %v2789_v24 = vpop.xlane.xlu1 %2788 }
 0x44c   : > { %v3011_v37 = vmul.f32 %v4444_v31, %v5923_v15  ;;  %v2887_v25 = vmax.f32 %v2789_v24, 1e-24 }
 0x44e   : > { %v3927_v23 = vpack.c.bf16 %v3011_v37, %v3010_v8  ;;  %4451 = vrsqrt.f32 %v2887_v25 }
 0x44f   : > { %v2791_v22 = vpop.xlane.xlu0 %2790  ;;  %v4446_v19 = vpop.eup %4445 }
 0x450   : > { %4035 = vst [vmem:[%s6040_s12 + $0x60] sm:$0xff] %v3927_v23   ;;  %v2888_v32 = vmax.f32 %v2791_v22, 1e-24  ;;  %v3012_v26 = vmul.f32 %v4446_v19, %v5930_v2 }
 0x452   : > { %4453 = vrsqrt.f32 %v2888_v32 }
 0x453   : > { %v4448_v51 = vpop.eup %4447  ;;  %v2793_v53 = vpop.xlane.xlu1 %2792 }
 0x454   : > { %v3013_v56 = vmul.f32 %v4448_v51, %v5937_v48  ;;  %v2889_v27 = vmax.f32 %v2793_v53, 1e-24 }
 0x456   : > { %v3932_v7 = vpack.c.bf16 %v3013_v56, %v3012_v26  ;;  %4455 = vrsqrt.f32 %v2889_v27 }
 0x457   : > { %v2795_v15 = vpop.xlane.xlu0 %2794  ;;  %v4450_v46 = vpop.eup %4449 }
 0x458   : > { %4036 = vst [vmem:[%s6040_s12 + $0x68] sm:$0xff] %v3932_v7   ;;  %v2890_v47 = vmax.f32 %v2795_v15, 1e-24  ;;  %v3014_v35 = vmul.f32 %v4450_v46, %v5944_v34 }
 0x45a   : > { %4457 = vrsqrt.f32 %v2890_v47 }
 0x45b   : > { %v4452_v36 = vpop.eup %4451  ;;  %v2797_v60 = vpop.xlane.xlu1 %2796 }
 0x45c   : > { %v3015_v43 = vmul.f32 %v4452_v36, %v5951_v62  ;;  %v2891_v38 = vmax.f32 %v2797_v60, 1e-24 }
 0x45e   : > { %v3937_v2 = vpack.c.bf16 %v3015_v43, %v3014_v35  ;;  %4459 = vrsqrt.f32 %v2891_v38 }
 0x45f   : > { %v2799_v48 = vpop.xlane.xlu0 %2798  ;;  %v4454_v28 = vpop.eup %4453 }
 0x460   : > { %4037 = vst [vmem:[%s6040_s12 + $0x70] sm:$0xff] %v3937_v2   ;;  %v2892_v63 = vmax.f32 %v2799_v48, 1e-24  ;;  %v3016_v24 = vmul.f32 %v4454_v28, %v5958_v57 }
 0x462   : > { %4461 = vrsqrt.f32 %v2892_v63 }
 0x463   : > { %v4456_v29 = vpop.eup %4455  ;;  %v2801_v31 = vpop.xlane.xlu1 %2800 }
 0x464   : > { %v3017_v34 = vmul.f32 %v4456_v29, %v5965_v54  ;;  %v2893_v62 = vmax.f32 %v2801_v31, 1e-24 }
 0x466   : > { %v3942_v8 = vpack.c.bf16 %v3017_v34, %v3016_v24  ;;  %4463 = vrsqrt.f32 %v2893_v62 }
 0x467   : > { %v2803_v37 = vpop.xlane.xlu0 %2802  ;;  %v4458_v23 = vpop.eup %4457 }
 0x468   : > { %4038 = vst [vmem:[%s6040_s12 + $0x78] sm:$0xff] %v3942_v8   ;;  %v2894_v25 = vmax.f32 %v2803_v37, 1e-24 }
 0x46b   : > { %v4460_v57 = vpop.eup %4459  ;;  %v2805_v54 = vpop.xlane.xlu1 %2804 }
 0x46c   : > { %4667 = shalt.err (!%p4664_p1)
}
 0x46d   : > { %s4668_s27 = scalar_lea.hbm %s6247_s18, 8192  ;;  %s4672_s14 = scalar_lea.hbm %s6376_s5, 24576 }
 0x46e   : > { %p4669_p0 = scmp.ne.s32.totalorder %s6247_s18, %s4668_s27  ;;  %p4673_p10 = scmp.lt.s32.totalorder %s6247_s18, %s6376_s5 }
 0x46f   : > { %p4674_p2 = scmp.lt.s32.totalorder %s4672_s14, %s4668_s27 }
 0x470   : > { %p4670_p8 = pnand %p4669_p0, %p6500_p11 }
 0x471   : > { %p4675_p5 = por %p4674_p2, %p4673_p10 }
 0x472   : > { %p4671_p12 = pneg %p4670_p8 }
 0x474   : > { %p4676_p4 = pnand %p4675_p5, %p4671_p12 }
 0x476   : > { %4679 = shalt.err (!%p4676_p4)
}
 0x477   : > { %s4771_s8 = smov 128   ;;  %s4772_s11 = smov 8   ;;  %v3018_v22 = vmul.f32 %v4458_v23, %v5972_v16  ;;  %v3019_v32 = vmul.f32 %v4460_v57, %v5979_v17  ;;  %4465 = vrsqrt.f32 %v2894_v25  ;;  %v2895_v19 = vmax.f32 %v2805_v54, 1e-24  ;;  %v2807_v53 = vpop.xlane.xlu0 %2806  ;;  %v4462_v56 = vpop.eup %4461 }
 0x478   : > { %4092 = dma.vmem_to_hbm [thread:$0]  (%p6500_p11), %s6249_s15, 8192, %s6247_s18, %s3371_s16, %s4771_s8, %s4771_s8, %s4772_s11   ;;  %v2896_v26 = vmax.f32 %v2807_v53, 1e-24  ;;  %v4464_v27 = vpop.eup %4463  ;;  %v2809_v7 = vpop.xlane.xlu1 %2808  ;;  %v3020_v15 = vmul.f32 %v4462_v56, %v5986_v55 }
 0x479   : > { %v3947_v51 = vpack.c.bf16 %v3019_v32, %v3018_v22  ;;  %4467 = vrsqrt.f32 %v2895_v19  ;;  %v3021_v47 = vmul.f32 %v4464_v27, %v5993_v41  ;;  %v2897_v46 = vmax.f32 %v2809_v7, 1e-24  ;;  %s3863_s15 = sshll.u32 %s4832_s25, 12  ;;  %s3405_s18 = sshll.u32 %s6040_s12, 4  ;;  %s6328_s18 = int_to_ptr.vmem [resolvable:$true] %s3405_s18 }
 0x47a   : > { %4469 = vrsqrt.f32 %v2896_v26  ;;  %s6326_s26 = scalar_lea.hbm %s6377_s6, %s3863_s15  ;;  %s3376_s27 = scalar_lea.sflag [#allocation13], %s4953_s7 }
 0x47b   : > { %4039 = vst [vmem:[%s6040_s12 + $0x80] sm:$0xff] %v3947_v51   ;;  %v3952_v16 = vpack.c.bf16 %v3021_v47, %v3020_v15  ;;  %4471 = vrsqrt.f32 %v2897_v46  ;;  %v2811_v17 = vpop.xlane.xlu0 %2810  ;;  %s4680_s25 = scalar_lea.vmem %s6328_s18, 4096  ;;  %s4773_s29 = smov [#allocation12]  }
 0x47c   : > { %v2898_v36 = vmax.f32 %v2811_v17, 1e-24  ;;  %v2813_v43 = vpop.xlane.xlu1 %2812  ;;  %p4681_p6 = scmp.ne.s32.totalorder %s6328_s18, %s4680_s25  ;;  %s4684_s9 = sshll.u32 %s4773_s29, 4  ;;  %s4685_s9 = int_to_ptr.vmem [resolvable:$false] %s4684_s9 }
 0x47d   : > { %4040 = vst [vmem:[%s6040_s12 + $0x88] sm:$0xff] %v3952_v16   ;;  %v2899_v48 = vmax.f32 %v2813_v43, 1e-24  ;;  %s4686_s14 = scalar_lea.vmem %s4685_s9, 8192  ;;  %p4687_p13 = scmp.lt.s32.totalorder %s6328_s18, %s4685_s9 }
 0x47e   : > { %4473 = vrsqrt.f32 %v2898_v36  ;;  %p4682_p7 = pnand %p4681_p6, %p6500_p11  ;;  %p4688_p3 = scmp.lt.s32.totalorder %s4686_s14, %s4680_s25 }
 0x47f   : > { %4475 = vrsqrt.f32 %v2899_v48  ;;  %v2815_v41 = vpop.xlane.xlu0 %2814 }
 0x480   : > { %v2900_v63 = vmax.f32 %v2815_v41, 1e-24  ;;  %p4683_p9 = pneg %p4682_p7  ;;  %p4689_p1 = por %p4688_p3, %p4687_p13 }
 0x482   : > { %4477 = vrsqrt.f32 %v2900_v63  ;;  %p4690_p0 = pnand %p4689_p1, %p4683_p9 }
 0x483   : > { %v2817_v31 = vpop.xlane.xlu1 %2816 }
 0x484   : > { %v4466_v60 = vpop.eup %4465  ;;  %v2901_v62 = vmax.f32 %v2817_v31, 1e-24 }
 0x485   : > { %v3022_v38 = vmul.f32 %v4466_v60, %v6000_v44 }
 0x486   : > { %v4468_v35 = vpop.eup %4467  ;;  %4479 = vrsqrt.f32 %v2901_v62 }
 0x487   : > { %v3023_v2 = vmul.f32 %v4468_v35, %v6007_v0  ;;  %v4470_v28 = vpop.eup %4469  ;;  %v2819_v0 = vpop.xlane.xlu0 %2818 }
 0x488   : > { %v4472_v29 = vpop.eup %4471  ;;  %v3024_v24 = vmul.f32 %v4470_v28, %v6014_v45  ;;  %v2902_v8 = vmax.f32 %v2819_v0, 1e-24 }
 0x489   : > { %v3957_v55 = vpack.c.bf16 %v3023_v2, %v3022_v38  ;;  %v3025_v34 = vmul.f32 %v4472_v29, %v6021_v50 }
 0x48a   : > { %4481 = vrsqrt.f32 %v2902_v8 }
 0x48b   : > { %4041 = vst [vmem:[%s6040_s12 + $0x90] sm:$0xff] %v3957_v55   ;;  %v3962_v44 = vpack.c.bf16 %v3025_v34, %v3024_v24  ;;  %v4474_v37 = vpop.eup %4473  ;;  %v2821_v23 = vpop.xlane.xlu1 %2820 }
 0x48c   : > { %v4476_v25 = vpop.eup %4475  ;;  %v3026_v57 = vmul.f32 %v4474_v37, %v6029_v14  ;;  %v2903_v22 = vmax.f32 %v2821_v23, 1e-24 }
 0x48d   : > { %4042 = vst [vmem:[%s6040_s12 + $0x98] sm:$0xff] %v3962_v44   ;;  %v3027_v54 = vmul.f32 %v4476_v25, %v6038_v33 }
 0x48e   : > { %4483 = vrsqrt.f32 %v2903_v22 }
 0x48f   : > { %v3967_v45 = vpack.c.bf16 %v3027_v54, %v3026_v57  ;;  %v2823_v50 = vpop.xlane.xlu0 %2822  ;;  %v4478_v19 = vpop.eup %4477 }
 0x490   : > { %v2904_v32 = vmax.f32 %v2823_v50, 1e-24  ;;  %v3028_v26 = vmul.f32 %v4478_v19, %v6048_v40 }
 0x491   : > { %4043 = vst [vmem:[%s6040_s12 + $0xa0] sm:$0xff] %v3967_v45  }
 0x492   : > { %4485 = vrsqrt.f32 %v2904_v32 }
 0x493   : > { %v4480_v51 = vpop.eup %4479  ;;  %v2825_v53 = vpop.xlane.xlu1 %2824 }
 0x494   : > { %v3029_v56 = vmul.f32 %v4480_v51, %v6057_v10  ;;  %v2905_v27 = vmax.f32 %v2825_v53, 1e-24 }
 0x496   : > { %v3972_v14 = vpack.c.bf16 %v3029_v56, %v3028_v26  ;;  %4487 = vrsqrt.f32 %v2905_v27 }
 0x497   : > { %v2827_v33 = vpop.xlane.xlu0 %2826  ;;  %v4482_v15 = vpop.eup %4481 }
 0x498   : > { %4044 = vst [vmem:[%s6040_s12 + $0xa8] sm:$0xff] %v3972_v14   ;;  %v2906_v7 = vmax.f32 %v2827_v33, 1e-24  ;;  %v3030_v16 = vmul.f32 %v4482_v15, %v6065_v4 }
 0x49a   : > { %4489 = vrsqrt.f32 %v2906_v7 }
 0x49b   : > { %v4484_v47 = vpop.eup %4483  ;;  %v2829_v46 = vpop.xlane.xlu1 %2828 }
 0x49c   : > { %v3031_v17 = vmul.f32 %v4484_v47, %v6074_v42  ;;  %v2907_v36 = vmax.f32 %v2829_v46, 1e-24 }
 0x49e   : > { %v3977_v40 = vpack.c.bf16 %v3031_v17, %v3030_v16  ;;  %4491 = vrsqrt.f32 %v2907_v36 }
 0x49f   : > { %v2831_v10 = vpop.xlane.xlu0 %2830  ;;  %v4486_v35 = vpop.eup %4485 }
 0x4a0   : > { %4045 = vst [vmem:[%s6040_s12 + $0xb0] sm:$0xff] %v3977_v40   ;;  %v2908_v60 = vmax.f32 %v2831_v10, 1e-24  ;;  %v3032_v2 = vmul.f32 %v4486_v35, %v6082_v21 }
 0x4a2   : > { %4493 = vrsqrt.f32 %v2908_v60 }
 0x4a3   : > { %v4488_v43 = vpop.eup %4487  ;;  %v2833_v38 = vpop.xlane.xlu1 %2832 }
 0x4a4   : > { %v3033_v48 = vmul.f32 %v4488_v43, %v6091_v1  ;;  %v2909_v55 = vmax.f32 %v2833_v38, 1e-24 }
 0x4a6   : > { %v3982_v4 = vpack.c.bf16 %v3033_v48, %v3032_v2  ;;  %4495 = vrsqrt.f32 %v2909_v55 }
 0x4a7   : > { %v2835_v42 = vpop.xlane.xlu0 %2834  ;;  %v4490_v63 = vpop.eup %4489 }
 0x4a8   : > { %4046 = vst [vmem:[%s6040_s12 + $0xb8] sm:$0xff] %v3982_v4   ;;  %v2910_v41 = vmax.f32 %v2835_v42, 1e-24  ;;  %v3034_v31 = vmul.f32 %v4490_v63, %v6099_v3 }
 0x4aa   : > { %4497 = vrsqrt.f32 %v2910_v41 }
 0x4ab   : > { %v4492_v28 = vpop.eup %4491  ;;  %v2837_v29 = vpop.xlane.xlu1 %2836 }
 0x4ac   : > { %v3035_v24 = vmul.f32 %v4492_v28, %v6108_v39  ;;  %v2911_v34 = vmax.f32 %v2837_v29, 1e-24 }
 0x4ae   : > { %v3987_v21 = vpack.c.bf16 %v3035_v24, %v3034_v31  ;;  %4499 = vrsqrt.f32 %v2911_v34 }
 0x4af   : > { %v2839_v1 = vpop.xlane.xlu0 %2838  ;;  %v4494_v44 = vpop.eup %4493 }
 0x4b0   : > { %4047 = vst [vmem:[%s6040_s12 + $0xc0] sm:$0xff] %v3987_v21   ;;  %v2912_v62 = vmax.f32 %v2839_v1, 1e-24  ;;  %v3036_v37 = vmul.f32 %v4494_v44, %v6116_v12 }
 0x4b2   : > { %4501 = vrsqrt.f32 %v2912_v62 }
 0x4b3   : > { %v4496_v0 = vpop.eup %4495  ;;  %v2841_v8 = vpop.xlane.xlu1 %2840 }
 0x4b4   : > { %v3037_v25 = vmul.f32 %v4496_v0, %v6125_v20  ;;  %v2913_v23 = vmax.f32 %v2841_v8, 1e-24 }
 0x4b6   : > { %v3992_v3 = vpack.c.bf16 %v3037_v25, %v3036_v37  ;;  %4503 = vrsqrt.f32 %v2913_v23 }
 0x4b7   : > { %v2843_v39 = vpop.xlane.xlu0 %2842  ;;  %v4498_v54 = vpop.eup %4497 }
 0x4b8   : > { %4048 = vst [vmem:[%s6040_s12 + $0xc8] sm:$0xff] %v3992_v3   ;;  %v2914_v57 = vmax.f32 %v2843_v39, 1e-24  ;;  %v3038_v50 = vmul.f32 %v4498_v54, %v6133_v52 }
 0x4ba   : > { %4505 = vrsqrt.f32 %v2914_v57 }
 0x4bb   : > { %v4500_v22 = vpop.eup %4499  ;;  %v2845_v45 = vpop.xlane.xlu1 %2844 }
 0x4bc   : > { %v3039_v32 = vmul.f32 %v4500_v22, %v6142_v6  ;;  %v2915_v19 = vmax.f32 %v2845_v45, 1e-24 }
 0x4be   : > { %v3997_v12 = vpack.c.bf16 %v3039_v32, %v3038_v50  ;;  %4507 = vrsqrt.f32 %v2915_v19 }
 0x4bf   : > { %v2847_v20 = vpop.xlane.xlu0 %2846  ;;  %v4502_v53 = vpop.eup %4501 }
 0x4c0   : > { %4049 = vst [vmem:[%s6040_s12 + $0xd0] sm:$0xff] %v3997_v12   ;;  %v2916_v51 = vmax.f32 %v2847_v20, 1e-24  ;;  %v3040_v27 = vmul.f32 %v4502_v53, %v6150_v5 }
 0x4c2   : > { %4509 = vrsqrt.f32 %v2916_v51 }
 0x4c3   : > { %v4504_v26 = vpop.eup %4503  ;;  %v2849_v56 = vpop.xlane.xlu1 %2848 }
 0x4c4   : > { %v3041_v14 = vmul.f32 %v4504_v26, %v6159_v11  ;;  %v2917_v33 = vmax.f32 %v2849_v56, 1e-24 }
 0x4c6   : > { %v4002_v52 = vpack.c.bf16 %v3041_v14, %v3040_v27  ;;  %4511 = vrsqrt.f32 %v2917_v33 }
 0x4c7   : > { %v2851_v6 = vpop.xlane.xlu0 %2850  ;;  %v4506_v15 = vpop.eup %4505 }
 0x4c8   : > { %4050 = vst [vmem:[%s6040_s12 + $0xd8] sm:$0xff] %v4002_v52   ;;  %v2918_v7 = vmax.f32 %v2851_v6, 1e-24  ;;  %v3042_v16 = vmul.f32 %v4506_v15, %v6167_v61 }
 0x4ca   : > { %4513 = vrsqrt.f32 %v2918_v7 }
 0x4cb   : > { %v4508_v47 = vpop.eup %4507  ;;  %v2853_v46 = vpop.xlane.xlu1 %2852 }
 0x4cc   : > { %v3043_v17 = vmul.f32 %v4508_v47, %v6176_v13  ;;  %v2919_v5 = vmax.f32 %v2853_v46, 1e-24 }
 0x4ce   : > { %v4007_v36 = vpack.c.bf16 %v3043_v17, %v3042_v16  ;;  %4515 = vrsqrt.f32 %v2919_v5 }
 0x4cf   : > { %v2855_v11 = vpop.xlane.xlu0 %2854  ;;  %v4510_v10 = vpop.eup %4509 }
 0x4d0   : > { %4051 = vst [vmem:[%s6040_s12 + $0xe0] sm:$0xff] %v4007_v36   ;;  %v2920_v40 = vmax.f32 %v2855_v11, 1e-24  ;;  %v3044_v43 = vmul.f32 %v4510_v10, %v6184_v49 }
 0x4d2   : > { %4517 = vrsqrt.f32 %v2920_v40 }
 0x4d3   : > { %v4512_v60 = vpop.eup %4511  ;;  %v2857_v35 = vpop.xlane.xlu1 %2856 }
 0x4d4   : > { %v3045_v61 = vmul.f32 %v4512_v60, %v6193_v18  ;;  %v2921_v13 = vmax.f32 %v2857_v35, 1e-24 }
 0x4d6   : > { %v4012_v38 = vpack.c.bf16 %v3045_v61, %v3044_v43  ;;  %4519 = vrsqrt.f32 %v2921_v13 }
 0x4d7   : > { %v4514_v2 = vpop.eup %4513 }
 0x4d8   : > { %4052 = vst [vmem:[%s6040_s12 + $0xe8] sm:$0xff] %v4012_v38   ;;  %v3046_v55 = vmul.f32 %v4514_v2, %v6200_v30 }
 0x4db   : > { %v4516_v48 = vpop.eup %4515 }
 0x4dc   : > { %v3047_v4 = vmul.f32 %v4516_v48, %v6208_v9 }
 0x4de   : > { %v4017_v42 = vpack.c.bf16 %v3047_v4, %v3046_v55 }
 0x4df   : > { %v4518_v41 = vpop.eup %4517 }
 0x4e0   : > { %4053 = vst [vmem:[%s6040_s12 + $0xf0] sm:$0xff] %v4017_v42   ;;  %v3048_v18 = vmul.f32 %v4518_v41, %v6215_v58 }
 0x4e3   : > { %v4520_v49 = vpop.eup %4519 }
 0x4e4   : > { %v3049_v63 = vmul.f32 %v4520_v49, %v6223_v59 }
 0x4e6   : > { %v4022_v30 = vpack.c.bf16 %v3049_v63, %v3048_v18 }
 0x4e8   : > { %4054 = vst [vmem:[%s6040_s12 + $0xf8] sm:$0xff] %v4022_v30  }
 0x4e9   : > { %4693 = shalt.err (!%p4690_p0)
}
 0x4ea   : > { %s4694_s12 = scalar_lea.hbm %s6326_s26, 4096  ;;  %s4698_s8 = scalar_lea.hbm %s6377_s6, 12288 }
 0x4eb   : > { %p4695_p8 = scmp.ne.s32.totalorder %s6326_s26, %s4694_s12  ;;  %p4699_p2 = scmp.lt.s32.totalorder %s6326_s26, %s6377_s6 }
 0x4ec   : > { %p4700_p5 = scmp.lt.s32.totalorder %s4698_s8, %s4694_s12 }
 0x4ed   : > { %p4696_p12 = pnand %p4695_p8, %p6500_p11 }
 0x4ee   : > { %p4701_p4 = por %p4700_p5, %p4699_p2 }
 0x4ef   : > { %p4697_p10 = pneg %p4696_p12 }
 0x4f1   : > { %p4702_p6 = pnand %p4701_p4, %p4697_p10 }
 0x4f3   : > { %4705 = shalt.err (!%p4702_p6)
}
 0x4f4   : > { %s4774_s16 = smov 64   ;;  %s4775_s10 = smov 4  }
 0x4f5   : > { %4093 = dma.vmem_to_hbm [thread:$0]  (%p6500_p11), %s6328_s18, 4096, %s6326_s26, %s3376_s27, %s4774_s16, %s4774_s16, %s4775_s10  }
 0x4f6 PF: > { %p4129_p7 = scmp.ge.s32.totalorder %s4756_s24, 2  ;;  %s3420_s25 = sand.u32 1, %s4744_s21  }
 0x4f7   : > { %p6501_p9 = scmp.ne.s32.totalorder %s6385_s28, 0  ;;  %s3421_s29 = scalar_lea.sflag [#allocation4], %s3420_s25 }
 0x4f9   : > { %p4114_p13 = pnand %p4129_p7, %p6501_p9 }
 0x4fb   : > { %p4115_p3 = pneg %p4114_p13 }
 0x4fd   : > { %4735 = dma.done.wait (%p4115_p3), %s3421_s29, 8192  }
 0x4fe   : > { %4737 = vsyncadd (%p4115_p3), %s3421_s29, 4294959104  ;;  %s3430_s9 = scalar_lea.sflag [#allocation13], %s3420_s25 }
 0x4ff   : > { %4739 = dma.done.wait (%p4115_p3), %s3430_s9, 4096  }
 0x500   : > { %4741 = vsyncadd (%p4115_p3), %s3430_s9, 4294963200  ;;  %p25_p11 = scmp.ge.s32.totalorder %s4898_s17, 5   ;;  %s6502_s21 = smov %s4748_s22 }
 0x501   : > { %s6503_s22 = smov %s4752_s23  ;;  %s6504_s23 = smov %s4907_s19 }
 0x502   : > { %s6505_s24 = smov %s4898_s17  ;;  %27 = sbr.rel (!%p25_p11) target bundleno = 9 (0x9), region = 118 }
 0x507   :  { %3435 = vsyncpa [#allocation3], 1 }
 0x508   :  { %3437 = vsyncpa [#allocation3 + $0x1], 1 }
 0x509   :  { %3438 = vsyncpa [#allocation6], 1 }
 0x50a   :  { %3439 = vsyncpa [#allocation9], 1 }
 0x50b   :  { %3440 = vsyncpa [#allocation4], 1 }
 0x50c   :  { %3442 = vsyncpa [#allocation4 + $0x1], 1 }
 0x50d   :  { %3443 = vsyncpa [#allocation13], 1 }
 0x50e   :  { %3445 = vsyncpa [#allocation13 + $0x1], 1 }

</bundles_post_ra>
